<compile_context>
chip_gen: v7x
topology: tpu7x:2x2x1
jax: 0.10.0
libtpu: 0.0.40
codegen_flags: <defaults>
</compile_context>

<pallas_src>
import math

import numpy as np
import jax
import jax.numpy as jnp
from jax import lax
from jax.experimental import pallas as pl
from jax.experimental.pallas import tpu as pltpu

# ---------------------------------------------------------------------------
# Config consistent with Transformer(depth, dim, hidden_dim, head_dim)
# ---------------------------------------------------------------------------
DEPTH = 2
DIM = 64
HIDDEN = 128
HEAD_DIM = 16
N_HEADS = DIM // HEAD_DIM
N_EXPERTS = 3
VOCAB = 256
N_CLASSES = 10
ROT2 = HEAD_DIM // 4          # cos/sin width; rotary_dim = 2*ROT2 = HEAD_DIM//2
LN_EPS = 1e-5
NEG_INF = -1e30


def _layernorm(x, w, b):
    mu = jnp.mean(x, axis=-1, keepdims=True)
    var = jnp.mean(jnp.square(x - mu), axis=-1, keepdims=True)
    return (x - mu) * lax.rsqrt(var + LN_EPS) * w + b


# ---------------------------------------------------------------------------
# Fused transformer-blocks kernel: grid = (batch, depth)
#   depth axis is "arbitrary": x lives in a VMEM scratch across layers.
#   Attention inside each layer is flash-tiled over (q, kv) with online softmax.
# ---------------------------------------------------------------------------
def fused_blocks(x_emb, params, cos_qk, sin_qk, rmat, *, tq):
    b, t, d = x_emb.shape
    depth = params['qkv_w'].shape[0]
    assert t % tq == 0
    tk = tq
    n_q = t // tq

    def kernel(x_emb_ref, cos_ref, sin_ref, rmat_ref,
               alnw_ref, alnb_ref, qkvw_ref, aow_ref,
               flnw_ref, flnb_ref, upw_ref, dnw_ref,
               olnw_ref, olnb_ref, o_ref, x_res):
        d_step = pl.program_id(1)

        @pl.when(d_step == 0)
        def _():
            x_res[...] = x_emb_ref[0]

        x = x_res[...]                                            # (t, DIM) f32

        # ---- self-attention: pre-LN, fused QKV, partial rotary -------------
        xn = _layernorm(x, alnw_ref[0], alnb_ref[0])
        qkv = jnp.dot(xn.astype(jnp.bfloat16), qkvw_ref[0],
                      preferred_element_type=jnp.float32)         # (t, 3*DIM) f32

        # Partial rotary on q & k at full width: v*cos + (v @ R)*sin, R is a
        # static signed rotate-half permutation (bf16 MXU filler).  The
        # 1/sqrt(head_dim) scale is folded into the q half of cos/sin.
        qk = qkv[:, :2 * DIM]
        qk = qk * cos_ref[...] + jnp.dot(
            qk.astype(jnp.bfloat16), rmat_ref[...],
            preferred_element_type=jnp.float32) * sin_ref[...]

        def split_heads(m):                  # (t, DIM) -> (H, t, HD) bf16
            return jnp.stack([m[:, h * HEAD_DIM:(h + 1) * HEAD_DIM]
                              for h in range(N_HEADS)],
                             axis=0).astype(jnp.bfloat16)

        q = split_heads(qk[:, :DIM])         # pre-scaled by 1/sqrt(head_dim)
        k = split_heads(qk[:, DIM:])
        v = split_heads(qkv[:, 2 * DIM:])
        aow = aow_ref[0]                                          # (DIM, DIM) bf16

        # ---- flash attention: static loops over q / kv tiles ---------------
        for qi in range(n_q):
            q_t = q[:, qi * tq:(qi + 1) * tq, :]                  # (H, tq, HD)
            m_i = jnp.full((N_HEADS, tq, 1), NEG_INF, jnp.float32)
            l_i = jnp.zeros((N_HEADS, tq, 1), jnp.float32)
            acc = jnp.zeros((N_HEADS, tq, HEAD_DIM), jnp.float32)
            for ki in range(qi + 1):                              # causal: skip upper tiles
                k_t = k[:, ki * tk:(ki + 1) * tk, :]
                v_t = v[:, ki * tk:(ki + 1) * tk, :]
                s = jnp.einsum('hqd,hkd->hqk', q_t, k_t,
                               preferred_element_type=jnp.float32)
                if ki == qi:                                      # diagonal tile only
                    row = lax.broadcasted_iota(jnp.int32, (tq, tk), 0)
                    col = lax.broadcasted_iota(jnp.int32, (tq, tk), 1)
                    s = jnp.where((row >= col)[None, :, :], s, NEG_INF)
                m_new = jnp.maximum(m_i, jnp.max(s, axis=-1, keepdims=True))
                alpha = jnp.exp(m_i - m_new)
                p = jnp.exp(s - m_new)
                l_i = alpha * l_i + jnp.sum(p, axis=-1, keepdims=True)
                acc = alpha * acc + jnp.einsum('hqk,hkd->hqd',
                                               p.astype(jnp.bfloat16), v_t,
                                               preferred_element_type=jnp.float32)
                m_i = m_new
            o_t = acc / l_i                                       # exact normalize
            # concat heads on the lane axis -> one (DIM, DIM) out-proj GEMM
            o_cat = jnp.concatenate([o_t[h] for h in range(N_HEADS)], axis=-1)
            proj = jnp.dot(o_cat.astype(jnp.bfloat16), aow,
                           preferred_element_type=jnp.float32)
            x_res[pl.ds(qi * tq, tq), :] = x[qi * tq:(qi + 1) * tq, :] + proj

        # ---- feed-forward (pre-LN SwiGLU) -----------------------------------
        x = x_res[...]
        xn = _layernorm(x, flnw_ref[0], flnb_ref[0])
        u = jnp.dot(xn.astype(jnp.bfloat16), upw_ref[0],
                    preferred_element_type=jnp.float32)           # (t, 2*HIDDEN)
        a = u[:, :HIDDEN]
        g = u[:, HIDDEN:]
        hgate = a * (g * jax.nn.sigmoid(g))                       # x * silu(gate)
        x = x + jnp.dot(hgate.astype(jnp.bfloat16), dnw_ref[0],
                        preferred_element_type=jnp.float32)
        x_res[...] = x

        @pl.when(d_step == pl.num_programs(1) - 1)
        def _():
            o_ref[0] = _layernorm(x, olnw_ref[...], olnb_ref[...]).astype(jnp.bfloat16)

    return pl.pallas_call(
        kernel,
        out_shape=jax.ShapeDtypeStruct((b, t, d), jnp.bfloat16),
        grid=(b, depth),
        in_specs=[
            pl.BlockSpec((1, t, d), lambda i, j: (i, 0, 0)),                  # x_emb f32
            pl.BlockSpec((t, 2 * d), lambda i, j: (0, 0)),                    # cos (scale folded into q half)
            pl.BlockSpec((t, 2 * d), lambda i, j: (0, 0)),                    # sin
            pl.BlockSpec((2 * d, 2 * d), lambda i, j: (0, 0)),                # rotate-half matrix bf16
            pl.BlockSpec((1, 1, d), lambda i, j: (j, 0, 0)),                  # attn LN w
            pl.BlockSpec((1, 1, d), lambda i, j: (j, 0, 0)),                  # attn LN b
            pl.BlockSpec((1, d, 3 * d), lambda i, j: (j, 0, 0)),              # qkv w bf16
            pl.BlockSpec((1, d, d), lambda i, j: (j, 0, 0)),                  # attn out w bf16
            pl.BlockSpec((1, 1, d), lambda i, j: (j, 0, 0)),                  # ff LN w
            pl.BlockSpec((1, 1, d), lambda i, j: (j, 0, 0)),                  # ff LN b
            pl.BlockSpec((1, d, 2 * HIDDEN), lambda i, j: (j, 0, 0)),         # up w bf16
            pl.BlockSpec((1, HIDDEN, d), lambda i, j: (j, 0, 0)),             # down w bf16
            pl.BlockSpec((1, d), lambda i, j: (0, 0)),                        # out LN w
            pl.BlockSpec((1, d), lambda i, j: (0, 0)),                        # out LN b
        ],
        out_specs=pl.BlockSpec((1, t, d), lambda i, j: (i, 0, 0)),
        scratch_shapes=[pltpu.VMEM((t, d), jnp.float32)],
        compiler_params=pltpu.CompilerParams(
            dimension_semantics=("parallel", "arbitrary"),
            vmem_limit_bytes=48 * 1024 * 1024),
    )(x_emb, cos_qk, sin_qk, rmat,
      params['attn_ln_w'], params['attn_ln_b'], params['qkv_w'],
      params['attn_out_w'], params['ff_ln_w'], params['ff_ln_b'],
      params['up_w'], params['down_w'],
      params['out_norm_w'], params['out_norm_b'])


# ---------------------------------------------------------------------------
# out_proj DMoELinear as a row-tiled grouped GEMM: grid (experts, row_tiles),
# both axes "parallel" (rows pre-grouped by the static position%3 pattern via a
# reshape/transpose in the wrapper -- no gathers).
# ---------------------------------------------------------------------------
def moe_group_matmul_kernel(x_ref, w_ref, o_ref):
    o_ref[0] = jnp.dot(x_ref[0], w_ref[0],
                       preferred_element_type=jnp.float32).astype(o_ref.dtype)


def moe_grouped_matmul(xg, w_t, row_tile):
    e, g, din = xg.shape
    dout = w_t.shape[-1]
    assert g % row_tile == 0
    return pl.pallas_call(
        moe_group_matmul_kernel,
        out_shape=jax.ShapeDtypeStruct((e, g, dout), jnp.bfloat16),
        grid=(e, g // row_tile),
        in_specs=[pl.BlockSpec((1, row_tile, din), lambda i, r: (i, r, 0)),
                  pl.BlockSpec((1, din, dout), lambda i, r: (i, 0, 0))],
        out_specs=pl.BlockSpec((1, row_tile, dout), lambda i, r: (i, r, 0)),
        compiler_params=pltpu.CompilerParams(
            dimension_semantics=("parallel", "parallel"),
            vmem_limit_bytes=48 * 1024 * 1024),
    )(xg, w_t)


# ---------------------------------------------------------------------------
# Parameters & rotary tables (deterministic, in-script; weights pre-transposed,
# MXU operands stored in bf16)
# ---------------------------------------------------------------------------
def init_params(key):
    ks = jax.random.split(key, 4 + 4 * DEPTH)

    def nrm(k, shape, scale=0.02):
        return (scale * jax.random.normal(k, shape)).astype(jnp.float32)

    # DMoE weights in torch layout (E, out, in); stored pre-transposed + bf16.
    w_img = nrm(ks[0], (N_EXPERTS, DIM, VOCAB))
    w_out = nrm(ks[1], (N_EXPERTS, VOCAB, DIM))

    qkv_w, attn_out_w, up_w, down_w = [], [], [], []
    for dblk in range(DEPTH):
        k0, k1, k2, k3 = ks[4 + 4 * dblk: 8 + 4 * dblk]
        qkv_w.append(nrm(k0, (3 * DIM, DIM)).T)                   # (DIM, 3*DIM)
        # NOTE: reference zero-inits attn.out_proj / ff.down; random here so the
        # residual branches are actually exercised.
        attn_out_w.append(nrm(k1, (DIM, DIM)).T)                  # (DIM, DIM)
        up_w.append(nrm(k2, (2 * HIDDEN, DIM)).T)                 # (DIM, 2*HIDDEN)
        down_w.append(nrm(k3, (DIM, HIDDEN)).T)                   # (HIDDEN, DIM)

    return dict(
        class_embed=nrm(ks[2], (N_CLASSES, DIM)),
        # (E*VOCAB, DIM) bf16 embedding table: row e*VOCAB+tok == w_img[e,:,tok]
        image_embed_tab=jnp.transpose(w_img, (0, 2, 1))
                           .reshape(N_EXPERTS * VOCAB, DIM).astype(jnp.bfloat16),
        out_proj_w_t=jnp.transpose(w_out, (0, 2, 1)).astype(jnp.bfloat16),  # (E, DIM, VOCAB)
        out_norm_w=jnp.ones((1, DIM), jnp.float32),
        out_norm_b=jnp.zeros((1, DIM), jnp.float32),
        attn_ln_w=jnp.ones((DEPTH, 1, DIM), jnp.float32),
        attn_ln_b=jnp.zeros((DEPTH, 1, DIM), jnp.float32),
        ff_ln_w=jnp.ones((DEPTH, 1, DIM), jnp.float32),
        ff_ln_b=jnp.zeros((DEPTH, 1, DIM), jnp.float32),
        qkv_w=jnp.stack(qkv_w).astype(jnp.bfloat16),
        attn_out_w=jnp.stack(attn_out_w).astype(jnp.bfloat16),
        up_w=jnp.stack(up_w).astype(jnp.bfloat16),
        down_w=jnp.stack(down_w).astype(jnp.bfloat16),
    )


def make_axial_pos(h, w):
    h_pos = jnp.linspace(-1.0, 1.0, h + 1)
    w_pos = jnp.linspace(-1.0, 1.0, w + 1)
    h_pos = (h_pos[:-1] + h_pos[1:]) / 2
    w_pos = (w_pos[:-1] + w_pos[1:]) / 2
    hh, ww = jnp.meshgrid(h_pos, w_pos, indexing='ij')
    return jnp.stack([hh, ww], axis=-1).reshape(h * w, 2)


def make_tables():
    """Full-width (T_max, 2*DIM) cos/sin tables for q|k (1/sqrt(head_dim) folded
    into the q half) plus the static signed rotate-half permutation (bf16)."""
    freqs = jnp.exp(jnp.linspace(math.log(math.pi), math.log(10 * math.pi),
                                 HEAD_DIM // 8))
    pos = make_axial_pos(32, 32 * 3)
    pos = jnp.concatenate([jnp.zeros((1, 2)), pos], axis=0)               # (3073, 2)
    theta = jnp.concatenate([pos[:, 0:1] * freqs, pos[:, 1:2] * freqs], axis=-1)
    cos = jnp.cos(theta)                                                  # (3073, ROT2)
    sin = jnp.sin(theta)
    n = cos.shape[0]
    ones = jnp.ones((n, HEAD_DIM - 2 * ROT2), jnp.float32)
    zeros = jnp.zeros_like(ones)
    cos_head = jnp.concatenate([cos, cos, ones], axis=-1)                 # (n, HEAD_DIM)
    sin_head = jnp.concatenate([sin, sin, zeros], axis=-1)
    cos_row = jnp.tile(cos_head, (1, N_HEADS))                            # (n, DIM)
    sin_row = jnp.tile(sin_head, (1, N_HEADS))
    scale = 1.0 / math.sqrt(HEAD_DIM)
    cos_qk = jnp.concatenate([cos_row * scale, cos_row], axis=-1).astype(jnp.float32)
    sin_qk = jnp.concatenate([sin_row * scale, sin_row], axis=-1).astype(jnp.float32)

    rmat = np.zeros((2 * DIM, 2 * DIM), np.float32)
    for slot in range(2 * N_HEADS):            # 8 head slots across q and k
        off = slot * HEAD_DIM
        for i in range(ROT2):
            rmat[off + ROT2 + i, off + i] = -1.0   # col off+i      gets -v[off+ROT2+i]
            rmat[off + i, off + ROT2 + i] = 1.0    # col off+ROT2+i gets +v[off+i]
    return dict(cos_qk=cos_qk, sin_qk=sin_qk,
                rmat=jnp.asarray(rmat, dtype=jnp.bfloat16))


# ---------------------------------------------------------------------------
# Forward pass (training path: cache=None, index=None)
# ---------------------------------------------------------------------------
def transformer_forward(params, x_tokens, y_labels, tables):
    b, s = x_tokens.shape
    t = s + 1

    # channel ids: torch.arange(3).tile((B, 1024)) -> position p uses expert p % 3
    ch_in = jnp.arange(s, dtype=jnp.int32) % N_EXPERTS                    # (S,)

    # image_embed (DMoELinear on one-hot tokens) == bf16 embedding-row gather
    flat_idx = (ch_in[None, :] * VOCAB + x_tokens).reshape(-1)
    img = jnp.take(params['image_embed_tab'], flat_idx, axis=0).reshape(b, s, DIM)

    cls = params['class_embed'][y_labels]                                 # (B, DIM) f32
    x = jnp.concatenate([cls[:, None, :], img.astype(jnp.float32)], axis=1)  # (B,T,DIM)

    # flash tile size: 512/1024 at production T (per generation); 8 at toy T so
    # the multi-tile online-softmax path is exercised.  Pad T to a multiple of
    # the tile; padded rows are causally inert and sliced off below.
    tq = 512 if t > 512 else 8
    t_attn = ((t + tq - 1) // tq) * tq
    if t_attn > t:
        x = jnp.pad(x, ((0, 0), (0, t_attn - t), (0, 0)))

    cos = tables['cos_qk']
    sin = tables['sin_qk']
    if t_attn > cos.shape[0]:
        pad = t_attn - cos.shape[0]
        cos = jnp.pad(cos, ((0, pad), (0, 0)))
        sin = jnp.pad(sin, ((0, pad), (0, 0)))
    else:
        cos = cos[:t_attn]
        sin = sin[:t_attn]

    # all transformer blocks + final LayerNorm in one fused pallas_call
    xn = fused_blocks(x, params, cos, sin, tables['rmat'], tq=tq)         # (B,T_attn,DIM) bf16
    xn = xn[:, :t, :]

    # out_proj DMoELinear: expert = position % 3 -> pad to a multiple of 3 and
    # regroup with a pure reshape/transpose (no gathers), then row-tiled GEMM.
    t3 = ((t + N_EXPERTS - 1) // N_EXPERTS) * N_EXPERTS
    if t3 > t:
        xn = jnp.pad(xn, ((0, 0), (0, t3 - t), (0, 0)))
    n3 = t3 // N_EXPERTS
    xg = jnp.transpose(xn.reshape(b, n3, N_EXPERTS, DIM),
                       (2, 0, 1, 3)).reshape(N_EXPERTS, b * n3, DIM)
    g = b * n3
    row_tile = 512 if g >= 512 else ((g + 7) // 8) * 8
    g_pad = ((g + row_tile - 1) // row_tile) * row_tile
    if g_pad > g:
        xg = jnp.pad(xg, ((0, 0), (0, g_pad - g), (0, 0)))
    outg = moe_grouped_matmul(xg, params['out_proj_w_t'], row_tile)       # (E, g_pad, VOCAB)
    out = jnp.transpose(outg[:, :g, :].reshape(N_EXPERTS, b, n3, VOCAB),
                        (1, 2, 0, 3)).reshape(b, t3, VOCAB)
    return out[:, :t, :]                                                  # bf16 logits


if __name__ == "__main__":
    key = jax.random.PRNGKey(0)
    kp, kx, ky = jax.random.split(key, 3)
    params = init_params(kp)
    tables = make_tables()

    B, S = 2, 8
    x_tokens = jax.random.randint(kx, (B, S), 0, VOCAB, dtype=jnp.int32)
    y_labels = jax.random.randint(ky, (B,), 0, N_CLASSES, dtype=jnp.int32)

    fwd = jax.jit(transformer_forward)
    out = fwd(params, x_tokens, y_labels, tables)
    out = jax.block_until_ready(out)
    assert out.shape == (B, S + 1, VOCAB), out.shape
    assert out.dtype == jnp.bfloat16, out.dtype
    assert bool(jnp.all(jnp.isfinite(out.astype(jnp.float32))))
    print("KERNEL_OK")
</pallas_src>

<mosaic_0001>
module attributes {stable_mosaic.version = 11 : i64} {
  func.func @kernel(%arg0: i32, %arg1: i32, %arg2: memref<1x16x64xf32, #tpu.memory_space<vmem>>, %arg3: memref<16x128xf32, #tpu.memory_space<vmem>>, %arg4: memref<16x128xf32, #tpu.memory_space<vmem>>, %arg5: memref<128x128xbf16, #tpu.memory_space<vmem>>, %arg6: memref<1x1x64xf32, #tpu.memory_space<vmem>>, %arg7: memref<1x1x64xf32, #tpu.memory_space<vmem>>, %arg8: memref<1x64x192xbf16, #tpu.memory_space<vmem>>, %arg9: memref<1x64x64xbf16, #tpu.memory_space<vmem>>, %arg10: memref<1x1x64xf32, #tpu.memory_space<vmem>>, %arg11: memref<1x1x64xf32, #tpu.memory_space<vmem>>, %arg12: memref<1x64x256xbf16, #tpu.memory_space<vmem>>, %arg13: memref<1x128x64xbf16, #tpu.memory_space<vmem>>, %arg14: memref<1x64xf32, #tpu.memory_space<vmem>>, %arg15: memref<1x64xf32, #tpu.memory_space<vmem>>, %arg16: memref<1x16x64xbf16, #tpu.memory_space<vmem>>, %arg17: memref<16x64xf32, #tpu.memory_space<vmem>>) attributes {dimension_semantics = [#tpu.dimension_semantics<parallel>, #tpu.dimension_semantics<arbitrary>], iteration_bounds = array<i64: 2, 2>, scalar_prefetch = 0 : i64, scratch_operands = 1 : i64, tpu.core_type = #tpu.core_type<tc>, window_params = [{transform_indices = @transform_0, window_bounds = array<i64: 1, 16, 64>}, {pipeline_mode = #tpu.pipeline_mode<synchronous>, transform_indices = @transform_1, window_bounds = array<i64: 16, 128>}, {pipeline_mode = #tpu.pipeline_mode<synchronous>, transform_indices = @transform_2, window_bounds = array<i64: 16, 128>}, {pipeline_mode = #tpu.pipeline_mode<synchronous>, transform_indices = @transform_3, window_bounds = array<i64: 128, 128>}, {transform_indices = @transform_4, window_bounds = array<i64: 1, 1, 64>}, {transform_indices = @transform_5, window_bounds = array<i64: 1, 1, 64>}, {transform_indices = @transform_6, window_bounds = array<i64: 1, 64, 192>}, {transform_indices = @transform_7, window_bounds = array<i64: 1, 64, 64>}, {transform_indices = @transform_8, window_bounds = array<i64: 1, 1, 64>}, {transform_indices = @transform_9, window_bounds = array<i64: 1, 1, 64>}, {transform_indices = @transform_10, window_bounds = array<i64: 1, 64, 256>}, {transform_indices = @transform_11, window_bounds = array<i64: 1, 128, 64>}, {pipeline_mode = #tpu.pipeline_mode<synchronous>, transform_indices = @transform_12, window_bounds = array<i64: 1, 64>}, {pipeline_mode = #tpu.pipeline_mode<synchronous>, transform_indices = @transform_13, window_bounds = array<i64: 1, 64>}, {transform_indices = @transform_14, window_bounds = array<i64: 1, 16, 64>}]} {
    %c0_i32 = arith.constant 0 : i32
    %0 = arith.cmpi eq, %arg1, %c0_i32 : i32
    %1 = arith.extui %0 : i1 to i32
    %c0_i32_0 = arith.constant 0 : i32
    %2 = arith.cmpi ne, %1, %c0_i32_0 : i32
    scf.if %2 {
      %c0_76 = arith.constant 0 : index
      %c0_77 = arith.constant 0 : index
      %c0_78 = arith.constant 0 : index
      %243 = vector.load %arg2[%c0_76, %c0_77, %c0_78] : memref<1x16x64xf32, #tpu.memory_space<vmem>>, vector<1x16x64xf32>
      %244 = vector.shape_cast %243 : vector<1x16x64xf32> to vector<16x64xf32>
      %c0_79 = arith.constant 0 : index
      %c0_80 = arith.constant 0 : index
      %245 = vector.load %arg17[%c0_79, %c0_80] : memref<16x64xf32, #tpu.memory_space<vmem>>, vector<16x64xf32>
      tpu.vector_store %arg17[%c0_79, %c0_80], %244 {strides = array<i32>} : memref<16x64xf32, #tpu.memory_space<vmem>>, vector<16x64xf32>,
    } else {
    }
    %c0 = arith.constant 0 : index
    %c0_1 = arith.constant 0 : index
    %3 = vector.load %arg17[%c0, %c0_1] : memref<16x64xf32, #tpu.memory_space<vmem>>, vector<16x64xf32>
    %c0_2 = arith.constant 0 : index
    %c0_3 = arith.constant 0 : index
    %c0_4 = arith.constant 0 : index
    %4 = vector.load %arg6[%c0_2, %c0_3, %c0_4] : memref<1x1x64xf32, #tpu.memory_space<vmem>>, vector<1x1x64xf32>
    %5 = vector.shape_cast %4 : vector<1x1x64xf32> to vector<1x64xf32>
    %c0_5 = arith.constant 0 : index
    %c0_6 = arith.constant 0 : index
    %c0_7 = arith.constant 0 : index
    %6 = vector.load %arg7[%c0_5, %c0_6, %c0_7] : memref<1x1x64xf32, #tpu.memory_space<vmem>>, vector<1x1x64xf32>
    %7 = vector.shape_cast %6 : vector<1x1x64xf32> to vector<1x64xf32>
    %cst = arith.constant dense<0.000000e+00> : vector<16xf32>
    %8 = vector.multi_reduction <add>, %3, %cst [1] : vector<16x64xf32> to vector<16xf32>
    %9 = vector.shape_cast %8 : vector<16xf32> to vector<16x1xf32>
    %cst_8 = arith.constant 6.400000e+01 : f32
    %10 = vector.broadcast %cst_8 : f32 to vector<16x1xf32>
    %11 = arith.divf %9, %10 : vector<16x1xf32>
    %12 = vector.broadcast %11 : vector<16x1xf32> to vector<16x64xf32>
    %13 = arith.subf %3, %12 : vector<16x64xf32>
    %14 = arith.mulf %13, %13 : vector<16x64xf32>
    %cst_9 = arith.constant dense<0.000000e+00> : vector<16xf32>
    %15 = vector.multi_reduction <add>, %14, %cst_9 [1] : vector<16x64xf32> to vector<16xf32>
    %16 = vector.shape_cast %15 : vector<16xf32> to vector<16x1xf32>
    %cst_10 = arith.constant 6.400000e+01 : f32
    %17 = vector.broadcast %cst_10 : f32 to vector<16x1xf32>
    %18 = arith.divf %16, %17 : vector<16x1xf32>
    %19 = vector.broadcast %11 : vector<16x1xf32> to vector<16x64xf32>
    %20 = arith.subf %3, %19 : vector<16x64xf32>
    %cst_11 = arith.constant 9.99999974E-6 : f32
    %21 = vector.broadcast %cst_11 : f32 to vector<16x1xf32>
    %22 = arith.addf %18, %21 : vector<16x1xf32>
    %23 = math.rsqrt %22 : vector<16x1xf32>
    %24 = vector.broadcast %23 : vector<16x1xf32> to vector<16x64xf32>
    %25 = arith.mulf %20, %24 : vector<16x64xf32>
    %26 = vector.broadcast %5 : vector<1x64xf32> to vector<16x64xf32>
    %27 = arith.mulf %25, %26 : vector<16x64xf32>
    %28 = vector.broadcast %7 : vector<1x64xf32> to vector<16x64xf32>
    %29 = arith.addf %27, %28 : vector<16x64xf32>
    %30 = arith.truncf %29 : vector<16x64xf32> to vector<16x64xbf16>
    %c0_12 = arith.constant 0 : index
    %c0_13 = arith.constant 0 : index
    %c0_14 = arith.constant 0 : index
    %31 = vector.load %arg8[%c0_12, %c0_13, %c0_14] : memref<1x64x192xbf16, #tpu.memory_space<vmem>>, vector<1x64x192xbf16>
    %32 = vector.shape_cast %31 : vector<1x64x192xbf16> to vector<64x192xbf16>
    %cst_15 = arith.constant dense<0.000000e+00> : vector<16x192xf32>
    %33 = tpu.matmul %30, %32, %cst_15 {dimension_numbers = #tpu.dot_dimension_numbers<[1], [0], [0], [1], [0, 0, 1, 1], [], []>} : vector<16x64xbf16>, vector<64x192xbf16>, vector<16x192xf32> -> vector<16x192xf32>
    %34 = vector.extract_strided_slice %33 {offsets = [0, 0], sizes = [16, 128], strides = [1, 1]} : vector<16x192xf32> to vector<16x128xf32>
    %c0_16 = arith.constant 0 : index
    %c0_17 = arith.constant 0 : index
    %35 = vector.load %arg3[%c0_16, %c0_17] : memref<16x128xf32, #tpu.memory_space<vmem>>, vector<16x128xf32>
    %36 = arith.mulf %34, %35 : vector<16x128xf32>
    %37 = arith.truncf %34 : vector<16x128xf32> to vector<16x128xbf16>
    %c0_18 = arith.constant 0 : index
    %c0_19 = arith.constant 0 : index
    %38 = vector.load %arg5[%c0_18, %c0_19] : memref<128x128xbf16, #tpu.memory_space<vmem>>, vector<128x128xbf16>
    %cst_20 = arith.constant dense<0.000000e+00> : vector<16x128xf32>
    %39 = tpu.matmul %37, %38, %cst_20 {dimension_numbers = #tpu.dot_dimension_numbers<[1], [0], [0], [1], [0, 0, 1, 1], [], []>} : vector<16x128xbf16>, vector<128x128xbf16>, vector<16x128xf32> -> vector<16x128xf32>
    %c0_21 = arith.constant 0 : index
    %c0_22 = arith.constant 0 : index
    %40 = vector.load %arg4[%c0_21, %c0_22] : memref<16x128xf32, #tpu.memory_space<vmem>>, vector<16x128xf32>
    %41 = arith.mulf %39, %40 : vector<16x128xf32>
    %42 = arith.addf %36, %41 : vector<16x128xf32>
    %43 = vector.extract_strided_slice %42 {offsets = [0, 0], sizes = [16, 64], strides = [1, 1]} : vector<16x128xf32> to vector<16x64xf32>
    %44 = vector.extract_strided_slice %43 {offsets = [0, 0], sizes = [16, 16], strides = [1, 1]} : vector<16x64xf32> to vector<16x16xf32>
    %45 = vector.extract_strided_slice %43 {offsets = [0, 16], sizes = [16, 16], strides = [1, 1]} : vector<16x64xf32> to vector<16x16xf32>
    %46 = vector.extract_strided_slice %43 {offsets = [0, 32], sizes = [16, 16], strides = [1, 1]} : vector<16x64xf32> to vector<16x16xf32>
    %47 = vector.extract_strided_slice %43 {offsets = [0, 48], sizes = [16, 16], strides = [1, 1]} : vector<16x64xf32> to vector<16x16xf32>
    %48 = vector.shape_cast %44 : vector<16x16xf32> to vector<1x16x16xf32>
    %49 = vector.shape_cast %45 : vector<16x16xf32> to vector<1x16x16xf32>
    %50 = vector.shape_cast %46 : vector<16x16xf32> to vector<1x16x16xf32>
    %51 = vector.shape_cast %47 : vector<16x16xf32> to vector<1x16x16xf32>
    %52 = tpu.concatenate %48, %49, %50, %51 in 0 : vector<1x16x16xf32>, vector<1x16x16xf32>, vector<1x16x16xf32>, vector<1x16x16xf32> -> vector<4x16x16xf32>
    %53 = arith.truncf %52 : vector<4x16x16xf32> to vector<4x16x16xbf16>
    %54 = vector.extract_strided_slice %42 {offsets = [0, 64], sizes = [16, 64], strides = [1, 1]} : vector<16x128xf32> to vector<16x64xf32>
    %55 = vector.extract_strided_slice %54 {offsets = [0, 0], sizes = [16, 16], strides = [1, 1]} : vector<16x64xf32> to vector<16x16xf32>
    %56 = vector.extract_strided_slice %54 {offsets = [0, 16], sizes = [16, 16], strides = [1, 1]} : vector<16x64xf32> to vector<16x16xf32>
    %57 = vector.extract_strided_slice %54 {offsets = [0, 32], sizes = [16, 16], strides = [1, 1]} : vector<16x64xf32> to vector<16x16xf32>
    %58 = vector.extract_strided_slice %54 {offsets = [0, 48], sizes = [16, 16], strides = [1, 1]} : vector<16x64xf32> to vector<16x16xf32>
    %59 = vector.shape_cast %55 : vector<16x16xf32> to vector<1x16x16xf32>
    %60 = vector.shape_cast %56 : vector<16x16xf32> to vector<1x16x16xf32>
    %61 = vector.shape_cast %57 : vector<16x16xf32> to vector<1x16x16xf32>
    %62 = vector.shape_cast %58 : vector<16x16xf32> to vector<1x16x16xf32>
    %63 = tpu.concatenate %59, %60, %61, %62 in 0 : vector<1x16x16xf32>, vector<1x16x16xf32>, vector<1x16x16xf32>, vector<1x16x16xf32> -> vector<4x16x16xf32>
    %64 = arith.truncf %63 : vector<4x16x16xf32> to vector<4x16x16xbf16>
    %65 = vector.extract_strided_slice %33 {offsets = [0, 128], sizes = [16, 64], strides = [1, 1]} : vector<16x192xf32> to vector<16x64xf32>
    %66 = vector.extract_strided_slice %65 {offsets = [0, 0], sizes = [16, 16], strides = [1, 1]} : vector<16x64xf32> to vector<16x16xf32>
    %67 = vector.extract_strided_slice %65 {offsets = [0, 16], sizes = [16, 16], strides = [1, 1]} : vector<16x64xf32> to vector<16x16xf32>
    %68 = vector.extract_strided_slice %65 {offsets = [0, 32], sizes = [16, 16], strides = [1, 1]} : vector<16x64xf32> to vector<16x16xf32>
    %69 = vector.extract_strided_slice %65 {offsets = [0, 48], sizes = [16, 16], strides = [1, 1]} : vector<16x64xf32> to vector<16x16xf32>
    %70 = vector.shape_cast %66 : vector<16x16xf32> to vector<1x16x16xf32>
    %71 = vector.shape_cast %67 : vector<16x16xf32> to vector<1x16x16xf32>
    %72 = vector.shape_cast %68 : vector<16x16xf32> to vector<1x16x16xf32>
    %73 = vector.shape_cast %69 : vector<16x16xf32> to vector<1x16x16xf32>
    %74 = tpu.concatenate %70, %71, %72, %73 in 0 : vector<1x16x16xf32>, vector<1x16x16xf32>, vector<1x16x16xf32>, vector<1x16x16xf32> -> vector<4x16x16xf32>
    %75 = arith.truncf %74 : vector<4x16x16xf32> to vector<4x16x16xbf16>
    %c0_23 = arith.constant 0 : index
    %c0_24 = arith.constant 0 : index
    %c0_25 = arith.constant 0 : index
    %76 = vector.load %arg9[%c0_23, %c0_24, %c0_25] : memref<1x64x64xbf16, #tpu.memory_space<vmem>>, vector<1x64x64xbf16>
    %77 = vector.shape_cast %76 : vector<1x64x64xbf16> to vector<64x64xbf16>
    %78 = vector.extract_strided_slice %53 {offsets = [0, 0, 0], sizes = [4, 8, 16], strides = [1, 1, 1]} : vector<4x16x16xbf16> to vector<4x8x16xbf16>
    %cst_26 = arith.constant -1.000000e+30 : f32
    %79 = vector.broadcast %cst_26 : f32 to vector<4x8x1xf32>
    %cst_27 = arith.constant 0.000000e+00 : f32
    %80 = vector.broadcast %cst_27 : f32 to vector<4x8x1xf32>
    %cst_28 = arith.constant 0.000000e+00 : f32
    %81 = vector.broadcast %cst_28 : f32 to vector<4x8x16xf32>
    %82 = vector.extract_strided_slice %64 {offsets = [0, 0, 0], sizes = [4, 8, 16], strides = [1, 1, 1]} : vector<4x16x16xbf16> to vector<4x8x16xbf16>
    %83 = vector.extract_strided_slice %75 {offsets = [0, 0, 0], sizes = [4, 8, 16], strides = [1, 1, 1]} : vector<4x16x16xbf16> to vector<4x8x16xbf16>
    "tpu.trace_start"() <{level = 10 : i32, message = "hqd,hkd->hqk"}> : () -> ()
    %cst_29 = arith.constant dense<0.000000e+00> : vector<4x8x8xf32>
    %84 = tpu.matmul %78, %82, %cst_29 {dimension_numbers = #tpu.dot_dimension_numbers<[2], [2], [1], [1], [0, 0, 0, 1, 1, 1], [0], [0]>} : vector<4x8x16xbf16>, vector<4x8x16xbf16>, vector<4x8x8xf32> -> vector<4x8x8xf32>
    "tpu.trace_stop"() : () -> ()
    %85 = tpu.iota {dimensions = array<i32: 0>} : vector<8x8xi32>
    %86 = tpu.iota {dimensions = array<i32: 1>} : vector<8x8xi32>
    %87 = arith.cmpi sge, %85, %86 : vector<8x8xi32>
    %88 = vector.shape_cast %87 : vector<8x8xi1> to vector<1x8x8xi1>
    %cst_30 = arith.constant -1.000000e+30 : f32
    %89 = vector.shape_cast %88 : vector<1x8x8xi1> to vector<1x8x8xi1>
    %90 = vector.broadcast %89 : vector<1x8x8xi1> to vector<4x8x8xi1>
    %91 = vector.broadcast %cst_30 : f32 to vector<4x8x8xf32>
    %92 = arith.select %90, %84, %91 : vector<4x8x8xi1>, vector<4x8x8xf32>
    %cst_31 = arith.constant dense<0xFF800000> : vector<4x8xf32>
    %93 = vector.multi_reduction <maximumf>, %92, %cst_31 [2] : vector<4x8x8xf32> to vector<4x8xf32>
    %94 = vector.shape_cast %93 : vector<4x8xf32> to vector<4x8x1xf32>
    %95 = arith.maximumf %79, %94 : vector<4x8x1xf32>
    %96 = arith.subf %79, %95 : vector<4x8x1xf32>
    %97 = math.exp %96 : vector<4x8x1xf32>
    %98 = vector.broadcast %95 : vector<4x8x1xf32> to vector<4x8x8xf32>
    %99 = arith.subf %92, %98 : vector<4x8x8xf32>
    %100 = math.exp %99 : vector<4x8x8xf32>
    %101 = arith.mulf %97, %80 : vector<4x8x1xf32>
    %cst_32 = arith.constant dense<0.000000e+00> : vector<4x8xf32>
    %102 = vector.multi_reduction <add>, %100, %cst_32 [2] : vector<4x8x8xf32> to vector<4x8xf32>
    %103 = vector.shape_cast %102 : vector<4x8xf32> to vector<4x8x1xf32>
    %104 = arith.addf %101, %103 : vector<4x8x1xf32>
    %105 = vector.broadcast %97 : vector<4x8x1xf32> to vector<4x8x16xf32>
    %106 = arith.mulf %105, %81 : vector<4x8x16xf32>
    %107 = arith.truncf %100 : vector<4x8x8xf32> to vector<4x8x8xbf16>
    "tpu.trace_start"() <{level = 10 : i32, message = "hqk,hkd->hqd"}> : () -> ()
    %cst_33 = arith.constant dense<0.000000e+00> : vector<4x8x16xf32>
    %108 = tpu.matmul %107, %83, %cst_33 {dimension_numbers = #tpu.dot_dimension_numbers<[2], [1], [1], [2], [0, 0, 0, 1, 1, 2], [0], [0]>} : vector<4x8x8xbf16>, vector<4x8x16xbf16>, vector<4x8x16xf32> -> vector<4x8x16xf32>
    "tpu.trace_stop"() : () -> ()
    %109 = arith.addf %106, %108 : vector<4x8x16xf32>
    %110 = vector.broadcast %104 : vector<4x8x1xf32> to vector<4x8x16xf32>
    %111 = arith.divf %109, %110 : vector<4x8x16xf32>
    %112 = vector.extract_strided_slice %111 {offsets = [0, 0, 0], sizes = [1, 8, 16], strides = [1, 1, 1]} : vector<4x8x16xf32> to vector<1x8x16xf32>
    %113 = vector.shape_cast %112 : vector<1x8x16xf32> to vector<8x16xf32>
    %114 = vector.extract_strided_slice %111 {offsets = [1, 0, 0], sizes = [1, 8, 16], strides = [1, 1, 1]} : vector<4x8x16xf32> to vector<1x8x16xf32>
    %115 = vector.shape_cast %114 : vector<1x8x16xf32> to vector<8x16xf32>
    %116 = vector.extract_strided_slice %111 {offsets = [2, 0, 0], sizes = [1, 8, 16], strides = [1, 1, 1]} : vector<4x8x16xf32> to vector<1x8x16xf32>
    %117 = vector.shape_cast %116 : vector<1x8x16xf32> to vector<8x16xf32>
    %118 = vector.extract_strided_slice %111 {offsets = [3, 0, 0], sizes = [1, 8, 16], strides = [1, 1, 1]} : vector<4x8x16xf32> to vector<1x8x16xf32>
    %119 = vector.shape_cast %118 : vector<1x8x16xf32> to vector<8x16xf32>
    %120 = tpu.concatenate %113, %115, %117, %119 in 1 : vector<8x16xf32>, vector<8x16xf32>, vector<8x16xf32>, vector<8x16xf32> -> vector<8x64xf32>
    %121 = arith.truncf %120 : vector<8x64xf32> to vector<8x64xbf16>
    %cst_34 = arith.constant dense<0.000000e+00> : vector<8x64xf32>
    %122 = tpu.matmul %121, %77, %cst_34 {dimension_numbers = #tpu.dot_dimension_numbers<[1], [0], [0], [1], [0, 0, 1, 1], [], []>} : vector<8x64xbf16>, vector<64x64xbf16>, vector<8x64xf32> -> vector<8x64xf32>
    %123 = vector.extract_strided_slice %3 {offsets = [0, 0], sizes = [8, 64], strides = [1, 1]} : vector<16x64xf32> to vector<8x64xf32>
    %124 = arith.addf %123, %122 : vector<8x64xf32>
    %c0_35 = arith.constant 0 : index
    %c0_36 = arith.constant 0 : index
    %125 = vector.load %arg17[%c0_35, %c0_36] : memref<16x64xf32, #tpu.memory_space<vmem>>, vector<8x64xf32>
    tpu.vector_store %arg17[%c0_35, %c0_36], %124 {strides = array<i32>} : memref<16x64xf32, #tpu.memory_space<vmem>>, vector<8x64xf32>,
    %126 = vector.extract_strided_slice %53 {offsets = [0, 8, 0], sizes = [4, 8, 16], strides = [1, 1, 1]} : vector<4x16x16xbf16> to vector<4x8x16xbf16>
    %cst_37 = arith.constant -1.000000e+30 : f32
    %127 = vector.broadcast %cst_37 : f32 to vector<4x8x1xf32>
    %cst_38 = arith.constant 0.000000e+00 : f32
    %128 = vector.broadcast %cst_38 : f32 to vector<4x8x1xf32>
    %cst_39 = arith.constant 0.000000e+00 : f32
    %129 = vector.broadcast %cst_39 : f32 to vector<4x8x16xf32>
    %130 = vector.extract_strided_slice %64 {offsets = [0, 0, 0], sizes = [4, 8, 16], strides = [1, 1, 1]} : vector<4x16x16xbf16> to vector<4x8x16xbf16>
    %131 = vector.extract_strided_slice %75 {offsets = [0, 0, 0], sizes = [4, 8, 16], strides = [1, 1, 1]} : vector<4x16x16xbf16> to vector<4x8x16xbf16>
    "tpu.trace_start"() <{level = 10 : i32, message = "hqd,hkd->hqk"}> : () -> ()
    %cst_40 = arith.constant dense<0.000000e+00> : vector<4x8x8xf32>
    %132 = tpu.matmul %126, %130, %cst_40 {dimension_numbers = #tpu.dot_dimension_numbers<[2], [2], [1], [1], [0, 0, 0, 1, 1, 1], [0], [0]>} : vector<4x8x16xbf16>, vector<4x8x16xbf16>, vector<4x8x8xf32> -> vector<4x8x8xf32>
    "tpu.trace_stop"() : () -> ()
    %cst_41 = arith.constant dense<0xFF800000> : vector<4x8xf32>
    %133 = vector.multi_reduction <maximumf>, %132, %cst_41 [2] : vector<4x8x8xf32> to vector<4x8xf32>
    %134 = vector.shape_cast %133 : vector<4x8xf32> to vector<4x8x1xf32>
    %135 = arith.maximumf %127, %134 : vector<4x8x1xf32>
    %136 = arith.subf %127, %135 : vector<4x8x1xf32>
    %137 = math.exp %136 : vector<4x8x1xf32>
    %138 = vector.broadcast %135 : vector<4x8x1xf32> to vector<4x8x8xf32>
    %139 = arith.subf %132, %138 : vector<4x8x8xf32>
    %140 = math.exp %139 : vector<4x8x8xf32>
    %141 = arith.mulf %137, %128 : vector<4x8x1xf32>
    %cst_42 = arith.constant dense<0.000000e+00> : vector<4x8xf32>
    %142 = vector.multi_reduction <add>, %140, %cst_42 [2] : vector<4x8x8xf32> to vector<4x8xf32>
    %143 = vector.shape_cast %142 : vector<4x8xf32> to vector<4x8x1xf32>
    %144 = arith.addf %141, %143 : vector<4x8x1xf32>
    %145 = vector.broadcast %137 : vector<4x8x1xf32> to vector<4x8x16xf32>
    %146 = arith.mulf %145, %129 : vector<4x8x16xf32>
    %147 = arith.truncf %140 : vector<4x8x8xf32> to vector<4x8x8xbf16>
    "tpu.trace_start"() <{level = 10 : i32, message = "hqk,hkd->hqd"}> : () -> ()
    %cst_43 = arith.constant dense<0.000000e+00> : vector<4x8x16xf32>
    %148 = tpu.matmul %147, %131, %cst_43 {dimension_numbers = #tpu.dot_dimension_numbers<[2], [1], [1], [2], [0, 0, 0, 1, 1, 2], [0], [0]>} : vector<4x8x8xbf16>, vector<4x8x16xbf16>, vector<4x8x16xf32> -> vector<4x8x16xf32>
    "tpu.trace_stop"() : () -> ()
    %149 = arith.addf %146, %148 : vector<4x8x16xf32>
    %150 = vector.extract_strided_slice %64 {offsets = [0, 8, 0], sizes = [4, 8, 16], strides = [1, 1, 1]} : vector<4x16x16xbf16> to vector<4x8x16xbf16>
    %151 = vector.extract_strided_slice %75 {offsets = [0, 8, 0], sizes = [4, 8, 16], strides = [1, 1, 1]} : vector<4x16x16xbf16> to vector<4x8x16xbf16>
    "tpu.trace_start"() <{level = 10 : i32, message = "hqd,hkd->hqk"}> : () -> ()
    %cst_44 = arith.constant dense<0.000000e+00> : vector<4x8x8xf32>
    %152 = tpu.matmul %126, %150, %cst_44 {dimension_numbers = #tpu.dot_dimension_numbers<[2], [2], [1], [1], [0, 0, 0, 1, 1, 1], [0], [0]>} : vector<4x8x16xbf16>, vector<4x8x16xbf16>, vector<4x8x8xf32> -> vector<4x8x8xf32>
    "tpu.trace_stop"() : () -> ()
    %153 = tpu.iota {dimensions = array<i32: 0>} : vector<8x8xi32>
    %154 = tpu.iota {dimensions = array<i32: 1>} : vector<8x8xi32>
    %155 = arith.cmpi sge, %153, %154 : vector<8x8xi32>
    %156 = vector.shape_cast %155 : vector<8x8xi1> to vector<1x8x8xi1>
    %cst_45 = arith.constant -1.000000e+30 : f32
    %157 = vector.shape_cast %156 : vector<1x8x8xi1> to vector<1x8x8xi1>
    %158 = vector.broadcast %157 : vector<1x8x8xi1> to vector<4x8x8xi1>
    %159 = vector.broadcast %cst_45 : f32 to vector<4x8x8xf32>
    %160 = arith.select %158, %152, %159 : vector<4x8x8xi1>, vector<4x8x8xf32>
    %cst_46 = arith.constant dense<0xFF800000> : vector<4x8xf32>
    %161 = vector.multi_reduction <maximumf>, %160, %cst_46 [2] : vector<4x8x8xf32> to vector<4x8xf32>
    %162 = vector.shape_cast %161 : vector<4x8xf32> to vector<4x8x1xf32>
    %163 = arith.maximumf %135, %162 : vector<4x8x1xf32>
    %164 = arith.subf %135, %163 : vector<4x8x1xf32>
    %165 = math.exp %164 : vector<4x8x1xf32>
    %166 = vector.broadcast %163 : vector<4x8x1xf32> to vector<4x8x8xf32>
    %167 = arith.subf %160, %166 : vector<4x8x8xf32>
    %168 = math.exp %167 : vector<4x8x8xf32>
    %169 = arith.mulf %165, %144 : vector<4x8x1xf32>
    %cst_47 = arith.constant dense<0.000000e+00> : vector<4x8xf32>
    %170 = vector.multi_reduction <add>, %168, %cst_47 [2] : vector<4x8x8xf32> to vector<4x8xf32>
    %171 = vector.shape_cast %170 : vector<4x8xf32> to vector<4x8x1xf32>
    %172 = arith.addf %169, %171 : vector<4x8x1xf32>
    %173 = vector.broadcast %165 : vector<4x8x1xf32> to vector<4x8x16xf32>
    %174 = arith.mulf %173, %149 : vector<4x8x16xf32>
    %175 = arith.truncf %168 : vector<4x8x8xf32> to vector<4x8x8xbf16>
    "tpu.trace_start"() <{level = 10 : i32, message = "hqk,hkd->hqd"}> : () -> ()
    %cst_48 = arith.constant dense<0.000000e+00> : vector<4x8x16xf32>
    %176 = tpu.matmul %175, %151, %cst_48 {dimension_numbers = #tpu.dot_dimension_numbers<[2], [1], [1], [2], [0, 0, 0, 1, 1, 2], [0], [0]>} : vector<4x8x8xbf16>, vector<4x8x16xbf16>, vector<4x8x16xf32> -> vector<4x8x16xf32>
    "tpu.trace_stop"() : () -> ()
    %177 = arith.addf %174, %176 : vector<4x8x16xf32>
    %178 = vector.broadcast %172 : vector<4x8x1xf32> to vector<4x8x16xf32>
    %179 = arith.divf %177, %178 : vector<4x8x16xf32>
    %180 = vector.extract_strided_slice %179 {offsets = [0, 0, 0], sizes = [1, 8, 16], strides = [1, 1, 1]} : vector<4x8x16xf32> to vector<1x8x16xf32>
    %181 = vector.shape_cast %180 : vector<1x8x16xf32> to vector<8x16xf32>
    %182 = vector.extract_strided_slice %179 {offsets = [1, 0, 0], sizes = [1, 8, 16], strides = [1, 1, 1]} : vector<4x8x16xf32> to vector<1x8x16xf32>
    %183 = vector.shape_cast %182 : vector<1x8x16xf32> to vector<8x16xf32>
    %184 = vector.extract_strided_slice %179 {offsets = [2, 0, 0], sizes = [1, 8, 16], strides = [1, 1, 1]} : vector<4x8x16xf32> to vector<1x8x16xf32>
    %185 = vector.shape_cast %184 : vector<1x8x16xf32> to vector<8x16xf32>
    %186 = vector.extract_strided_slice %179 {offsets = [3, 0, 0], sizes = [1, 8, 16], strides = [1, 1, 1]} : vector<4x8x16xf32> to vector<1x8x16xf32>
    %187 = vector.shape_cast %186 : vector<1x8x16xf32> to vector<8x16xf32>
    %188 = tpu.concatenate %181, %183, %185, %187 in 1 : vector<8x16xf32>, vector<8x16xf32>, vector<8x16xf32>, vector<8x16xf32> -> vector<8x64xf32>
    %189 = arith.truncf %188 : vector<8x64xf32> to vector<8x64xbf16>
    %cst_49 = arith.constant dense<0.000000e+00> : vector<8x64xf32>
    %190 = tpu.matmul %189, %77, %cst_49 {dimension_numbers = #tpu.dot_dimension_numbers<[1], [0], [0], [1], [0, 0, 1, 1], [], []>} : vector<8x64xbf16>, vector<64x64xbf16>, vector<8x64xf32> -> vector<8x64xf32>
    %191 = vector.extract_strided_slice %3 {offsets = [8, 0], sizes = [8, 64], strides = [1, 1]} : vector<16x64xf32> to vector<8x64xf32>
    %192 = arith.addf %191, %190 : vector<8x64xf32>
    %c8 = arith.constant 8 : index
    %c0_50 = arith.constant 0 : index
    %193 = vector.load %arg17[%c8, %c0_50] : memref<16x64xf32, #tpu.memory_space<vmem>>, vector<8x64xf32>
    tpu.vector_store %arg17[%c8, %c0_50], %192 {strides = array<i32>} : memref<16x64xf32, #tpu.memory_space<vmem>>, vector<8x64xf32>,
    %c0_51 = arith.constant 0 : index
    %c0_52 = arith.constant 0 : index
    %194 = vector.load %arg17[%c0_51, %c0_52] : memref<16x64xf32, #tpu.memory_space<vmem>>, vector<16x64xf32>
    %c0_53 = arith.constant 0 : index
    %c0_54 = arith.constant 0 : index
    %c0_55 = arith.constant 0 : index
    %195 = vector.load %arg10[%c0_53, %c0_54, %c0_55] : memref<1x1x64xf32, #tpu.memory_space<vmem>>, vector<1x1x64xf32>
    %196 = vector.shape_cast %195 : vector<1x1x64xf32> to vector<1x64xf32>
    %c0_56 = arith.constant 0 : index
    %c0_57 = arith.constant 0 : index
    %c0_58 = arith.constant 0 : index
    %197 = vector.load %arg11[%c0_56, %c0_57, %c0_58] : memref<1x1x64xf32, #tpu.memory_space<vmem>>, vector<1x1x64xf32>
    %198 = vector.shape_cast %197 : vector<1x1x64xf32> to vector<1x64xf32>
    %cst_59 = arith.constant dense<0.000000e+00> : vector<16xf32>
    %199 = vector.multi_reduction <add>, %194, %cst_59 [1] : vector<16x64xf32> to vector<16xf32>
    %200 = vector.shape_cast %199 : vector<16xf32> to vector<16x1xf32>
    %cst_60 = arith.constant 6.400000e+01 : f32
    %201 = vector.broadcast %cst_60 : f32 to vector<16x1xf32>
    %202 = arith.divf %200, %201 : vector<16x1xf32>
    %203 = vector.broadcast %202 : vector<16x1xf32> to vector<16x64xf32>
    %204 = arith.subf %194, %203 : vector<16x64xf32>
    %205 = arith.mulf %204, %204 : vector<16x64xf32>
    %cst_61 = arith.constant dense<0.000000e+00> : vector<16xf32>
    %206 = vector.multi_reduction <add>, %205, %cst_61 [1] : vector<16x64xf32> to vector<16xf32>
    %207 = vector.shape_cast %206 : vector<16xf32> to vector<16x1xf32>
    %cst_62 = arith.constant 6.400000e+01 : f32
    %208 = vector.broadcast %cst_62 : f32 to vector<16x1xf32>
    %209 = arith.divf %207, %208 : vector<16x1xf32>
    %210 = vector.broadcast %202 : vector<16x1xf32> to vector<16x64xf32>
    %211 = arith.subf %194, %210 : vector<16x64xf32>
    %cst_63 = arith.constant 9.99999974E-6 : f32
    %212 = vector.broadcast %cst_63 : f32 to vector<16x1xf32>
    %213 = arith.addf %209, %212 : vector<16x1xf32>
    %214 = math.rsqrt %213 : vector<16x1xf32>
    %215 = vector.broadcast %214 : vector<16x1xf32> to vector<16x64xf32>
    %216 = arith.mulf %211, %215 : vector<16x64xf32>
    %217 = vector.broadcast %196 : vector<1x64xf32> to vector<16x64xf32>
    %218 = arith.mulf %216, %217 : vector<16x64xf32>
    %219 = vector.broadcast %198 : vector<1x64xf32> to vector<16x64xf32>
    %220 = arith.addf %218, %219 : vector<16x64xf32>
    %221 = arith.truncf %220 : vector<16x64xf32> to vector<16x64xbf16>
    %c0_64 = arith.constant 0 : index
    %c0_65 = arith.constant 0 : index
    %c0_66 = arith.constant 0 : index
    %222 = vector.load %arg12[%c0_64, %c0_65, %c0_66] : memref<1x64x256xbf16, #tpu.memory_space<vmem>>, vector<1x64x256xbf16>
    %223 = vector.shape_cast %222 : vector<1x64x256xbf16> to vector<64x256xbf16>
    %cst_67 = arith.constant dense<0.000000e+00> : vector<16x256xf32>
    %224 = tpu.matmul %221, %223, %cst_67 {dimension_numbers = #tpu.dot_dimension_numbers<[1], [0], [0], [1], [0, 0, 1, 1], [], []>} : vector<16x64xbf16>, vector<64x256xbf16>, vector<16x256xf32> -> vector<16x256xf32>
    %225 = vector.extract_strided_slice %224 {offsets = [0, 0], sizes = [16, 128], strides = [1, 1]} : vector<16x256xf32> to vector<16x128xf32>
    %226 = vector.extract_strided_slice %224 {offsets = [0, 128], sizes = [16, 128], strides = [1, 1]} : vector<16x256xf32> to vector<16x128xf32>
    %227 = arith.negf %226 : vector<16x128xf32>
    %228 = math.exp %227 : vector<16x128xf32>
    %cst_68 = arith.constant 1.000000e+00 : f32
    %229 = vector.broadcast %cst_68 : f32 to vector<16x128xf32>
    %230 = arith.addf %229, %228 : vector<16x128xf32>
    %231 = arith.divf %229, %230 : vector<16x128xf32>
    %232 = arith.mulf %226, %231 : vector<16x128xf32>
    %233 = arith.mulf %225, %232 : vector<16x128xf32>
    %234 = arith.truncf %233 : vector<16x128xf32> to vector<16x128xbf16>
    %c0_69 = arith.constant 0 : index
    %c0_70 = arith.constant 0 : index
    %c0_71 = arith.constant 0 : index
    %235 = vector.load %arg13[%c0_69, %c0_70, %c0_71] : memref<1x128x64xbf16, #tpu.memory_space<vmem>>, vector<1x128x64xbf16>
    %236 = vector.shape_cast %235 : vector<1x128x64xbf16> to vector<128x64xbf16>
    %cst_72 = arith.constant dense<0.000000e+00> : vector<16x64xf32>
    %237 = tpu.matmul %234, %236, %cst_72 {dimension_numbers = #tpu.dot_dimension_numbers<[1], [0], [0], [1], [0, 0, 1, 1], [], []>} : vector<16x128xbf16>, vector<128x64xbf16>, vector<16x64xf32> -> vector<16x64xf32>
    %238 = arith.addf %194, %237 : vector<16x64xf32>
    %c0_73 = arith.constant 0 : index
    %c0_74 = arith.constant 0 : index
    %239 = vector.load %arg17[%c0_73, %c0_74] : memref<16x64xf32, #tpu.memory_space<vmem>>, vector<16x64xf32>
    tpu.vector_store %arg17[%c0_73, %c0_74], %238 {strides = array<i32>} : memref<16x64xf32, #tpu.memory_space<vmem>>, vector<16x64xf32>,
    %c1_i32 = arith.constant 1 : i32
    %240 = arith.cmpi eq, %arg1, %c1_i32 : i32
    %241 = arith.extui %240 : i1 to i32
    %c0_i32_75 = arith.constant 0 : i32
    %242 = arith.cmpi ne, %241, %c0_i32_75 : i32
    scf.if %242 {
      %c0_76 = arith.constant 0 : index
      %c0_77 = arith.constant 0 : index
      %243 = vector.load %arg14[%c0_76, %c0_77] : memref<1x64xf32, #tpu.memory_space<vmem>>, vector<1x64xf32>
      %c0_78 = arith.constant 0 : index
      %c0_79 = arith.constant 0 : index
      %244 = vector.load %arg15[%c0_78, %c0_79] : memref<1x64xf32, #tpu.memory_space<vmem>>, vector<1x64xf32>
      %cst_80 = arith.constant dense<0.000000e+00> : vector<16xf32>
      %245 = vector.multi_reduction <add>, %238, %cst_80 [1] : vector<16x64xf32> to vector<16xf32>
      %246 = vector.shape_cast %245 : vector<16xf32> to vector<16x1xf32>
      %cst_81 = arith.constant 6.400000e+01 : f32
      %247 = vector.broadcast %cst_81 : f32 to vector<16x1xf32>
      %248 = arith.divf %246, %247 : vector<16x1xf32>
      %249 = vector.broadcast %248 : vector<16x1xf32> to vector<16x64xf32>
      %250 = arith.subf %238, %249 : vector<16x64xf32>
      %251 = arith.mulf %250, %250 : vector<16x64xf32>
      %cst_82 = arith.constant dense<0.000000e+00> : vector<16xf32>
      %252 = vector.multi_reduction <add>, %251, %cst_82 [1] : vector<16x64xf32> to vector<16xf32>
      %253 = vector.shape_cast %252 : vector<16xf32> to vector<16x1xf32>
      %cst_83 = arith.constant 6.400000e+01 : f32
      %254 = vector.broadcast %cst_83 : f32 to vector<16x1xf32>
      %255 = arith.divf %253, %254 : vector<16x1xf32>
      %256 = vector.broadcast %248 : vector<16x1xf32> to vector<16x64xf32>
      %257 = arith.subf %238, %256 : vector<16x64xf32>
      %cst_84 = arith.constant 9.99999974E-6 : f32
      %258 = vector.broadcast %cst_84 : f32 to vector<16x1xf32>
      %259 = arith.addf %255, %258 : vector<16x1xf32>
      %260 = math.rsqrt %259 : vector<16x1xf32>
      %261 = vector.broadcast %260 : vector<16x1xf32> to vector<16x64xf32>
      %262 = arith.mulf %257, %261 : vector<16x64xf32>
      %263 = vector.broadcast %243 : vector<1x64xf32> to vector<16x64xf32>
      %264 = arith.mulf %262, %263 : vector<16x64xf32>
      %265 = vector.broadcast %244 : vector<1x64xf32> to vector<16x64xf32>
      %266 = arith.addf %264, %265 : vector<16x64xf32>
      %267 = arith.truncf %266 : vector<16x64xf32> to vector<16x64xbf16>
      %c0_85 = arith.constant 0 : index
      %c0_86 = arith.constant 0 : index
      %c0_87 = arith.constant 0 : index
      %268 = vector.load %arg16[%c0_85, %c0_86, %c0_87] : memref<1x16x64xbf16, #tpu.memory_space<vmem>>, vector<1x16x64xbf16>
      %269 = vector.shape_cast %268 : vector<1x16x64xbf16> to vector<16x64xbf16>
      %270 = vector.shape_cast %267 : vector<16x64xbf16> to vector<1x16x64xbf16>
      tpu.vector_store %arg16[%c0_85, %c0_86, %c0_87], %270 {strides = array<i32>} : memref<1x16x64xbf16, #tpu.memory_space<vmem>>, vector<1x16x64xbf16>,
    } else {
    }
    return
  }
  func.func @transform_0(%arg0: i32, %arg1: i32) -> (i32, i32, i32) {
    %c0_i32 = arith.constant 0 : i32
    %c0_i32_0 = arith.constant 0 : i32
    %c0_i32_1 = arith.constant 0 : i32
    return %arg0, %c0_i32, %c0_i32_0 : i32, i32, i32
  }
  func.func @transform_1(%arg0: i32, %arg1: i32) -> (i32, i32) {
    %c0_i32 = arith.constant 0 : i32
    %c0_i32_0 = arith.constant 0 : i32
    %c0_i32_1 = arith.constant 0 : i32
    return %c0_i32, %c0_i32_0 : i32, i32
  }
  func.func @transform_2(%arg0: i32, %arg1: i32) -> (i32, i32) {
    %c0_i32 = arith.constant 0 : i32
    %c0_i32_0 = arith.constant 0 : i32
    %c0_i32_1 = arith.constant 0 : i32
    return %c0_i32, %c0_i32_0 : i32, i32
  }
  func.func @transform_3(%arg0: i32, %arg1: i32) -> (i32, i32) {
    %c0_i32 = arith.constant 0 : i32
    %c0_i32_0 = arith.constant 0 : i32
    %c0_i32_1 = arith.constant 0 : i32
    return %c0_i32, %c0_i32_0 : i32, i32
  }
  func.func @transform_4(%arg0: i32, %arg1: i32) -> (i32, i32, i32) {
    %c0_i32 = arith.constant 0 : i32
    %c0_i32_0 = arith.constant 0 : i32
    %c0_i32_1 = arith.constant 0 : i32
    return %arg1, %c0_i32, %c0_i32_0 : i32, i32, i32
  }
  func.func @transform_5(%arg0: i32, %arg1: i32) -> (i32, i32, i32) {
    %c0_i32 = arith.constant 0 : i32
    %c0_i32_0 = arith.constant 0 : i32
    %c0_i32_1 = arith.constant 0 : i32
    return %arg1, %c0_i32, %c0_i32_0 : i32, i32, i32
  }
  func.func @transform_6(%arg0: i32, %arg1: i32) -> (i32, i32, i32) {
    %c0_i32 = arith.constant 0 : i32
    %c0_i32_0 = arith.constant 0 : i32
    %c0_i32_1 = arith.constant 0 : i32
    return %arg1, %c0_i32, %c0_i32_0 : i32, i32, i32
  }
  func.func @transform_7(%arg0: i32, %arg1: i32) -> (i32, i32, i32) {
    %c0_i32 = arith.constant 0 : i32
    %c0_i32_0 = arith.constant 0 : i32
    %c0_i32_1 = arith.constant 0 : i32
    return %arg1, %c0_i32, %c0_i32_0 : i32, i32, i32
  }
  func.func @transform_8(%arg0: i32, %arg1: i32) -> (i32, i32, i32) {
    %c0_i32 = arith.constant 0 : i32
    %c0_i32_0 = arith.constant 0 : i32
    %c0_i32_1 = arith.constant 0 : i32
    return %arg1, %c0_i32, %c0_i32_0 : i32, i32, i32
  }
  func.func @transform_9(%arg0: i32, %arg1: i32) -> (i32, i32, i32) {
    %c0_i32 = arith.constant 0 : i32
    %c0_i32_0 = arith.constant 0 : i32
    %c0_i32_1 = arith.constant 0 : i32
    return %arg1, %c0_i32, %c0_i32_0 : i32, i32, i32
  }
  func.func @transform_10(%arg0: i32, %arg1: i32) -> (i32, i32, i32) {
    %c0_i32 = arith.constant 0 : i32
    %c0_i32_0 = arith.constant 0 : i32
    %c0_i32_1 = arith.constant 0 : i32
    return %arg1, %c0_i32, %c0_i32_0 : i32, i32, i32
  }
  func.func @transform_11(%arg0: i32, %arg1: i32) -> (i32, i32, i32) {
    %c0_i32 = arith.constant 0 : i32
    %c0_i32_0 = arith.constant 0 : i32
    %c0_i32_1 = arith.constant 0 : i32
    return %arg1, %c0_i32, %c0_i32_0 : i32, i32, i32
  }
  func.func @transform_12(%arg0: i32, %arg1: i32) -> (i32, i32) {
    %c0_i32 = arith.constant 0 : i32
    %c0_i32_0 = arith.constant 0 : i32
    %c0_i32_1 = arith.constant 0 : i32
    return %c0_i32, %c0_i32_0 : i32, i32
  }
  func.func @transform_13(%arg0: i32, %arg1: i32) -> (i32, i32) {
    %c0_i32 = arith.constant 0 : i32
    %c0_i32_0 = arith.constant 0 : i32
    %c0_i32_1 = arith.constant 0 : i32
    return %c0_i32, %c0_i32_0 : i32, i32
  }
  func.func @transform_14(%arg0: i32, %arg1: i32) -> (i32, i32, i32) {
    %c0_i32 = arith.constant 0 : i32
    %c0_i32_0 = arith.constant 0 : i32
    %c0_i32_1 = arith.constant 0 : i32
    return %arg0, %c0_i32, %c0_i32_0 : i32, i32, i32
  }
}

module attributes {stable_mosaic.version = 11 : i64} {
  func.func @moe_group_matmul_kernel(%arg0: i32, %arg1: i32, %arg2: memref<1x8x64xbf16, #tpu.memory_space<vmem>>, %arg3: memref<1x64x256xbf16, #tpu.memory_space<vmem>>, %arg4: memref<1x8x256xbf16, #tpu.memory_space<vmem>>) attributes {dimension_semantics = [#tpu.dimension_semantics<parallel>, #tpu.dimension_semantics<parallel>], iteration_bounds = array<i64: 3, 1>, scalar_prefetch = 0 : i64, scratch_operands = 0 : i64, tpu.core_type = #tpu.core_type<tc>, window_params = [{transform_indices = @transform_0, window_bounds = array<i64: 1, 8, 64>}, {transform_indices = @transform_1, window_bounds = array<i64: 1, 64, 256>}, {transform_indices = @transform_2, window_bounds = array<i64: 1, 8, 256>}]} {
    %c0 = arith.constant 0 : index
    %c0_0 = arith.constant 0 : index
    %c0_1 = arith.constant 0 : index
    %0 = vector.load %arg2[%c0, %c0_0, %c0_1] : memref<1x8x64xbf16, #tpu.memory_space<vmem>>, vector<1x8x64xbf16>
    %1 = vector.shape_cast %0 : vector<1x8x64xbf16> to vector<8x64xbf16>
    %c0_2 = arith.constant 0 : index
    %c0_3 = arith.constant 0 : index
    %c0_4 = arith.constant 0 : index
    %2 = vector.load %arg3[%c0_2, %c0_3, %c0_4] : memref<1x64x256xbf16, #tpu.memory_space<vmem>>, vector<1x64x256xbf16>
    %3 = vector.shape_cast %2 : vector<1x64x256xbf16> to vector<64x256xbf16>
    %cst = arith.constant dense<0.000000e+00> : vector<8x256xf32>
    %4 = tpu.matmul %1, %3, %cst {dimension_numbers = #tpu.dot_dimension_numbers<[1], [0], [0], [1], [0, 0, 1, 1], [], []>} : vector<8x64xbf16>, vector<64x256xbf16>, vector<8x256xf32> -> vector<8x256xf32>
    %5 = arith.truncf %4 : vector<8x256xf32> to vector<8x256xbf16>
    %c0_5 = arith.constant 0 : index
    %c0_6 = arith.constant 0 : index
    %c0_7 = arith.constant 0 : index
    %6 = vector.load %arg4[%c0_5, %c0_6, %c0_7] : memref<1x8x256xbf16, #tpu.memory_space<vmem>>, vector<1x8x256xbf16>
    %7 = vector.shape_cast %6 : vector<1x8x256xbf16> to vector<8x256xbf16>
    %8 = vector.shape_cast %5 : vector<8x256xbf16> to vector<1x8x256xbf16>
    tpu.vector_store %arg4[%c0_5, %c0_6, %c0_7], %8 {strides = array<i32>} : memref<1x8x256xbf16, #tpu.memory_space<vmem>>, vector<1x8x256xbf16>,
    return
  }
  func.func @transform_0(%arg0: i32, %arg1: i32) -> (i32, i32, i32) {
    %c0_i32 = arith.constant 0 : i32
    %c0_i32_0 = arith.constant 0 : i32
    return %arg0, %arg1, %c0_i32 : i32, i32, i32
  }
  func.func @transform_1(%arg0: i32, %arg1: i32) -> (i32, i32, i32) {
    %c0_i32 = arith.constant 0 : i32
    %c0_i32_0 = arith.constant 0 : i32
    %c0_i32_1 = arith.constant 0 : i32
    return %arg0, %c0_i32, %c0_i32_0 : i32, i32, i32
  }
  func.func @transform_2(%arg0: i32, %arg1: i32) -> (i32, i32, i32) {
    %c0_i32 = arith.constant 0 : i32
    %c0_i32_0 = arith.constant 0 : i32
    return %arg0, %arg1, %c0_i32 : i32, i32, i32
  }
}

</mosaic_0001>

<bundles_post_ra>
// kernel: transformer_forward.3
= control target key start
LH: loop header
LB: loop body
LE: loop exit
PB: predicated region body
PF: predicated region fallthrough
CT: control target
= control target key end

     0   :  { %7 = vsyncpa [#allocation3], 0  ;;  %s753_s0 = inlined_call_operand.vmem [shape: bf16[3,8,64], index: 0, kind: input, shape index: {}]   ;;  %s754_s1 = inlined_call_operand.hbm [shape: bf16[3,64,256], index: 1, kind: input, shape index: {}]   ;;  %s755_s2 = inlined_call_operand.vmem [shape: bf16[3,8,256], index: 2, kind: output, shape index: {}]  }
   0x1   :  { %9 = vsyncpa [#allocation3 + $0x1], 0  ;;  %s626_s9 = smov 0   ;;  %s628_s10 = smov 0  }
   0x2   :  { %s630_s11 = smov 0   ;;  %s632_s12 = smov 0  }
   0x3   :  { %s634_s13 = smov 0   ;;  %s636_s14 = smov 0  }
   0x4 LB: > { %s428_s15 = sadd.s32 4294967295, %s605_s14   ;;  %s27_s16 = sadd.s32 1, %s601_s13  ;;  %s605_s14 = sphi %s636_s14, %s15_s14   ;;  %s601_s13 = sphi %s634_s13, %s763_s13   ;;  %s597_s12 = sphi %s632_s12, %s762_s12   ;;  %s593_s11 = sphi %s630_s11, %s761_s11   ;;  %s589_s10 = sphi %s628_s10, %s760_s10   ;;  %s585_s9 = sphi %s626_s9, %s759_s9  }
   0x5   : > { %p29_p0 = scmp.ge.s32.totalorder %s27_s16, 3  ;;  %s62_s17 = sadd.s32 1, %s593_s11 }
   0x6   : > { %p69_p1 = scmp.ne.s32.totalorder %s593_s11, %s589_s10  ;;  %p70_p2 = scmp.eq.s32.totalorder %s605_s14, 0 }
   0x7   : > { %s765_s16 = smov (%p29_p0, %s27_s16), 0  ;;  %p75_p4 = scmp.ne.s32.totalorder %s589_s10, %s585_s9 }
   0x8   : > { %p662_p3 = por %p70_p2, %p69_p1  ;;  %s59_s19 = ssub.s32 %s601_s13, %s765_s16 }
   0x9   : > { %p76_p5 = scmp.eq.s32.totalorder %s428_s15, 0  ;;  %p60_p6 = scmp.eq.s32.totalorder %s59_s19, 0 }
   0xa   : > { %p461_p8 = scmp.lt.s32.totalorder %s605_s14, 3  ;;  %s137_s22 = sand.u32 1, %s593_s11  }
   0xb   : > { %p669_p7 = por %p76_p5, %p75_p4  ;;  %s452_s23 = sshll.u32 %s601_s13, 10 }
   0xc   : > { %s675_s21 = scalar_select %p60_p6, %s593_s11, %s62_s17  }
   0xd   : > { %s432_s24 = sshll.u32 %s137_s22, 6  ;;  %s682_s27 = scalar_lea.hbm %s754_s1, %s452_s23 }
   0xe   : > { %s141_s28 = scalar_lea.vmem [#allocation2], %s432_s24  ;;  %p686_p9 = pnand %p461_p8, %p662_p3 }
   0xf   : > { %s148_s29 = sshll.u32 %s141_s28, 4  ;;  %s692_s3 = scalar_lea.sflag [#allocation3], %s137_s22  ;;  %s690_s29 = int_to_ptr.vmem [resolvable:$true] %s148_s29 }
  0x10   : > { %s525_s4 = scalar_lea.hbm %s682_s27, 1024  ;;  %p527_p11 = pneg %p686_p9 }
  0x11   : > { %p526_p10 = scmp.ne.s32.totalorder %s682_s27, %s525_s4  ;;  %s530_s7 = scalar_lea.hbm %s754_s1, 3072 }
  0x12   : > { %p531_p0 = scmp.lt.u32.totalorder %s682_s27, %s754_s1  ;;  %p532_p1 = scmp.lt.u32.totalorder %s530_s7, %s525_s4 }
  0x13   : > { %p528_p12 = pnand %p527_p11, %p526_p10  ;;  %p534_p3 = scmp.lt.u32.totalorder %s525_s4, %s682_s27 }
  0x14   : > { %p533_p2 = por %p532_p1, %p531_p0 }
  0x15   : > { %p529_p13 = pneg %p528_p12 }
  0x16   : > { %p535_p4 = por %p534_p3, %p533_p2 }
  0x18   : > { %p536_p5 = pnand %p535_p4, %p529_p13 }
  0x1a   : > { %539 = shalt.err (!%p536_p5)
}
  0x1b   : > { %s540_s15 = scalar_lea.vmem %s690_s29, 1024  ;;  %s607_s17 = smov [#allocation2]  }
  0x1c   : > { %p541_p6 = scmp.ne.s32.totalorder %s690_s29, %s540_s15  ;;  %s545_s18 = sshll.u32 %s607_s17, 4  ;;  %s546_s18 = int_to_ptr.vmem [resolvable:$false] %s545_s18 }
  0x1d   : > { %s547_s19 = scalar_lea.vmem %s546_s18, 2048  ;;  %p548_p12 = scmp.lt.s32.totalorder %s690_s29, %s546_s18 }
  0x1e   : > { %p543_p8 = pnand %p541_p6, %p527_p11  ;;  %p549_p0 = scmp.lt.s32.totalorder %s547_s19, %s540_s15 }
  0x20   : > { %p544_p10 = pneg %p543_p8  ;;  %p550_p1 = por %p549_p0, %p548_p12 }
  0x22   : > { %p551_p2 = pnand %p550_p1, %p544_p10 }
  0x24   : > { %554 = shalt.err (!%p551_p2)
}
  0x25   : > { %s608_s22 = smov 128   ;;  %s609_s23 = smov 8  }
  0x26   : > { %460 = dma.hbm_to_vmem [thread:$0]  (!%p686_p9), %s682_s27, 1024, %s690_s29, %s692_s3, %s608_s22, %s608_s22, %s609_s23  }
  0x27   : > { %p435_p11 = scmp.ge.s32.totalorder %s605_s14, 1  ;;  %p156_p13 = scmp.lt.s32.totalorder %s605_s14, 4 }
  0x29   : > { %p157_p3 = pnand %p435_p11, %p156_p13 }
  0x2a   : > { %s162_s24 = sand.u32 (!%p157_p3), 1, %s589_s10  }
  0x2b   : > { %160 = sbr.rel (%p157_p3) target bundleno = 284 (0x11c), region = 28  ;;  %s436_s25 = sshll.u32 (!%p157_p3), %s162_s24, 6 }
  0x2c   : > { %s163_s26 = scalar_lea.sflag (!%p157_p3), [#allocation3], %s162_s24  ;;  %s166_s28 = scalar_lea.vmem (!%p157_p3), [#allocation2], %s436_s25 }
  0x32   : > { %580 = dma.done.wait (%p669_p7), %s163_s26, 1024  }
  0x33   : > { %582 = vsyncadd (%p669_p7), %s163_s26, 4294966272  ;;  %v610_v0 = vmov 0   ;;  %v513_v1 = vld [vmem:[%s166_s28 + $0x4] ss:$8 sps:$4 sm:$0xff]   ;;  %v515_v2 = vld [vmem:[%s166_s28] ss:$8 sps:$4 sm:$0xff]  }
  0x34   : > { %300 = vmatprep.mubr.bf16.mxu0 %v610_v0  ;;  %p198_p9 = scmp.lt.s32.totalorder %s597_s12, 2  ;;  %268 = vmatprep.subr.bf16.mxu0 %v513_v1  ;;  %v516_v3 = vld [vmem:[%s166_s28 + $0x14] ss:$8 sps:$4 sm:$0xff]   ;;  %v518_v4 = vld [vmem:[%s166_s28 + $0x10] ss:$8 sps:$4 sm:$0xff]   ;;  %vm264_vm0 = vcmask 523264  }
  0x35   : > { %269 = vmatpush1.bf16.msra.mxu0 %v515_v2  ;;  %v519_v5 = vld [vmem:[%s166_s28 + $0x24] ss:$8 sps:$4 sm:$0xff]   ;;  %v521_v6 = vld [vmem:[%s166_s28 + $0x20] ss:$8 sps:$4 sm:$0xff]   ;;  %v522_v7 = vld [vmem:[%s166_s28 + $0x34] ss:$8 sps:$4 sm:$0xff]  }
  0x36   : > { %270 = vmatprep.subr.bf16.mxu0 %v516_v3  ;;  %s767_s12 = smov (!%p198_p9, %s597_s12), 2  ;;  %v524_v8 = vld [vmem:[%s166_s28 + $0x30] ss:$8 sps:$4 sm:$0xff]  }
  0x37   : > { %s437_s20 = sshll.u32 %s767_s12, 2  ;;  %s453_s3 = sshll.u32 %s767_s12, 3 }
  0x38   : > { %s204_s30 = scalar_lea.vmem %s753_s0, %s437_s20  ;;  %s213_s6 = scalar_lea.vmem %s755_s2, %s453_s3 }
  0x39   : > { %271 = vmatpush1.bf16.msra.mxu0 %v518_v4  ;;  %v215_v9 = vld [vmem:[%s204_s30] sm:$0xf] }
  0x3a   : > { %272 = vmatprep.subr.bf16.mxu0 %v519_v5 }
  0x3d   : > { %273 = vmatpush1.bf16.msra.mxu0 %v521_v6 }
  0x3e   : > { %274 = vmatprep.subr.bf16.mxu0 %v522_v7 }
  0x41   : > { %275 = vmatpush1.bf16.msra.mxu0 %v524_v8 }
  0x44   : > { %448 = vmatmul.mubr.msk.bf16.vlgmr.msra.gmra.mrb[0].mxu0 %vm264_vm0, %v215_v9 }
 0x117   : > { %v302_v10 = vpop.f32.mrb[0].mxu0 }
 0x118   : > { %v304_v11 = vpop.f32.mrb[1].mxu0 }
 0x119   : > { %v454_v12 = vpack.c.bf16 %v304_v11, %v302_v10  ;;  %v306_v13 = vpop.f32.mrb[2].mxu0 }
 0x11a   : > { %v307_v14 = vpop.f32.mrb[3].mxu0 }
 0x11b   : > { %317 = vst [vmem:[%s213_s6] sm:$0xff] %v454_v12 }
 0x11c PF: > { %s15_s14 = sadd.s32 1, %s605_s14   ;;  %s759_s9 = smov %s589_s10 }
 0x11d   : > { %p12_p7 = scmp.ge.s32.totalorder %s15_s14, 5   ;;  %s760_s10 = smov %s593_s11 }
 0x11e   : > { %s761_s11 = smov %s675_s21  ;;  %s762_s12 = smov %s601_s13 }
 0x11f   : > { %s763_s13 = smov %s765_s16  ;;  %14 = sbr.rel (!%p12_p7) target bundleno = 4 (0x4), region = 71 }
 0x126   :  { %347 = vsyncpa [#allocation3], 1 }
 0x127   :  { %349 = vsyncpa [#allocation3 + $0x1], 1 }

// kernel: transformer_forward.2
= control target key start
LH: loop header
LB: loop body
LE: loop exit
PB: predicated region body
PF: predicated region fallthrough
CT: control target
= control target key end

     0   :  { %s5378_s0 = inlined_call_operand.vmem [shape: f32[2,16,64], index: 0, kind: input, shape index: {}]   ;;  %s5379_s1 = inlined_call_operand.vmem [shape: f32[16,128], index: 1, kind: input, shape index: {}]   ;;  %s5380_s2 = inlined_call_operand.vmem [shape: f32[16,128], index: 2, kind: input, shape index: {}]   ;;  %s5381_s3 = inlined_call_operand.hbm [shape: bf16[128,128], index: 3, kind: input, shape index: {}]   ;;  %s5382_s4 = inlined_call_operand.hbm [shape: f32[2,1,64], index: 4, kind: input, shape index: {}]   ;;  %s5383_s5 = inlined_call_operand.hbm [shape: f32[2,1,64], index: 5, kind: input, shape index: {}]   ;;  %s5384_s6 = inlined_call_operand.hbm [shape: bf16[2,64,192], index: 6, kind: input, shape index: {}]   ;;  %s5385_s7 = inlined_call_operand.hbm [shape: bf16[2,64,64], index: 7, kind: input, shape index: {}]   ;;  %s5386_s8 = inlined_call_operand.hbm [shape: f32[2,1,64], index: 8, kind: input, shape index: {}]   ;;  %s5387_s9 = inlined_call_operand.hbm [shape: f32[2,1,64], index: 9, kind: input, shape index: {}]   ;;  %s5388_s10 = inlined_call_operand.hbm [shape: bf16[2,64,256], index: 10, kind: input, shape index: {}]   ;;  %s5389_s11 = inlined_call_operand.vmem [shape: bf16[2,128,64], index: 11, kind: input, shape index: {}]   ;;  %s5390_s12 = inlined_call_operand.hbm [shape: f32[1,64], index: 12, kind: input, shape index: {}]   ;;  %s5391_s13 = inlined_call_operand.hbm [shape: f32[1,64], index: 13, kind: input, shape index: {}]   ;;  %s5392_s14 = inlined_call_operand.vmem [shape: bf16[2,16,64], index: 14, kind: output, shape index: {}]  }
   0x1   :  { %5427 = sst [smem:[#allocation39_spill]] %s5378_s0 }
   0x2   :  { %5428 = sst [smem:[#allocation40_spill]] %s5379_s1 }
   0x3   :  { %5429 = sst [smem:[#allocation41_spill]] %s5380_s2 }
   0x4   :  { %5430 = sst [smem:[#allocation42_spill]] %s5382_s4 }
   0x5   :  { %5431 = sst [smem:[#allocation43_spill]] %s5384_s6 }
   0x6   :  { %5432 = sst [smem:[#allocation44_spill]] %s5386_s8 }
   0x7   :  { %5433 = sst [smem:[#allocation45_spill]] %s5388_s10 }
   0x8   :  { %5434 = sst [smem:[#allocation46_spill]] %s5389_s11 }
   0x9   :  { %5435 = sst [smem:[#allocation47_spill]] %s5390_s12 }
   0xa   :  { %5436 = sst [smem:[#allocation48_spill]] %s5392_s14 }
   0xb   :  { %19 = vsyncpa [#allocation4], 0 }
   0xc   :  { %20 = vsyncpa [#allocation6], 0 }
   0xd   :  { %22 = vsyncpa [#allocation6 + $0x1], 0 }
   0xe   :  { %23 = vsyncpa [#allocation9], 0 }
   0xf   :  { %25 = vsyncpa [#allocation9 + $0x1], 0 }
  0x10   :  { %26 = vsyncpa [#allocation12], 0 }
  0x11   :  { %28 = vsyncpa [#allocation12 + $0x1], 0 }
  0x12   :  { %29 = vsyncpa [#allocation15], 0 }
  0x13   :  { %31 = vsyncpa [#allocation15 + $0x1], 0 }
  0x14   :  { %32 = vsyncpa [#allocation18], 0  ;;  %s4371_s29 = smov 0   ;;  %s4373_s30 = smov 0  }
  0x15   :  { %s4375_s15 = smov 0   ;;  %s4377_s16 = smov 0  }
  0x16   :  { %s4379_s17 = smov 0   ;;  %s4381_s18 = smov 0  }
  0x17   :  { %s4383_s19 = smov 0   ;;  %s4385_s20 = smov 0  }
  0x18 LB: > { %5437 = sst [smem:[#allocation26_spill]] %s4246_s30  ;;  %s5393_s21 = sadd.s32 4294967295, %s4270_s20   ;;  %s4270_s20 = sphi %s4385_s20, %s38_s20   ;;  %s4266_s19 = sphi %s4383_s19, %s5505_s19   ;;  %s4262_s18 = sphi %s4381_s18, %s5507_s18   ;;  %s4258_s17 = sphi %s4379_s17, %s5503_s17   ;;  %s4254_s16 = sphi %s4377_s16, %s5506_s16   ;;  %s4250_s15 = sphi %s4375_s15, %s5502_s15   ;;  %s4246_s30 = sphi %s4373_s30, %s5501_s30   ;;  %s4242_s29 = sphi %s4371_s29, %s5500_s29  }
  0x19   : > { %5438 = sst [smem:[#allocation27_spill]] %s4250_s15  ;;  %p153_p0 = scmp.ne.s32.totalorder %s4250_s15, %s4246_s30 }
  0x1a   : > { %5439 = sst [smem:[#allocation28_spill]] %s4254_s16  ;;  %p154_p1 = scmp.eq.s32.totalorder %s4270_s20, 0 }
  0x1b   : > { %5440 = sst [smem:[#allocation29_spill]] %s4258_s17  ;;  %p159_p2 = scmp.ne.s32.totalorder %s4246_s30, %s4242_s29 }
  0x1c   : > { %5441 = sst [smem:[#allocation30_spill]] %s4266_s19  ;;  %p4417_p3 = scmp.eq.s32.totalorder %s5393_s21, 0 }
  0x1d   : > { %5442 = sst [smem:[#allocation31_spill]] %s4270_s20  ;;  %p155_p4 = por %p154_p1, %p153_p0 }
  0x1e   : > { %s5443_s23 = scalar_select %p4417_p3, 1, 0 }
  0x1f   : > { %p3180_p5 = scmp.ge.s32.totalorder %s4270_s20, 1  ;;  %p4424_p6 = por %p4417_p3, %p159_p2 }
  0x20   : > { %5444 = sst [smem:[#allocation32_spill]] %s5443_s23  ;;  %p420_p7 = scmp.lt.s32.totalorder %s4270_s20, 5 }
  0x21   : > { %s5445_s24 = scalar_select %p4424_p6, 1, 0 }
  0x22   : > { %p4429_p8 = pnand %p3180_p5, %p420_p7  ;;  %s4272_s26 = smov [#allocation16]  }
  0x23   : > { %5446 = sst [smem:[#allocation33_spill]] %s5445_s24  ;;  %s452_s27 = sshll.u32 %s4272_s26, 4  ;;  %s453_s27 = int_to_ptr.vmem [resolvable:$true] %s452_s27 }
  0x24   : > { %s5447_s25 = scalar_select %p4429_p8, 1, 0 }
  0x25   : > { %p3607_p9 = pneg %p4429_p8  ;;  %p3642_p10 = scmp.lt.s32.totalorder %s4270_s20, 4 }
  0x26   : > { %5448 = sst [smem:[#allocation34_spill]] %s5447_s25  ;;  %s5451_s12 = sld [smem:[#allocation47_spill]] }
  0x27   : > { %p4438_p11 = pnand %p3607_p9, %p4417_p3  ;;  %p4442_p12 = pnand %p3642_p10, %p155_p4 }
  0x29   : > { %s5449_s28 = scalar_select %p4438_p11, 1, 0 }
  0x2a   : > { %s5450_s29 = scalar_select %p4442_p12, 1, 0 }
  0x2b   : > { %p4454_p0 = pneg %p4438_p11 }
  0x2c   : > { %s3886_s2 = scalar_lea.hbm %s5451_s12, 16 }
  0x2d   : > { %p3887_p13 = scmp.ne.s32.totalorder %s5451_s12, %s3886_s2  ;;  %p3893_p4 = scmp.lt.u32.totalorder %s3886_s2, %s5451_s12 }
  0x2e   : > { %s5452_s14 = scalar_select %p4454_p0, 1, 0 }
  0x2f   : > { %p3889_p1 = pnand %p4454_p0, %p3887_p13 }
  0x31   : > { %p3890_p2 = pneg %p3889_p1 }
  0x33   : > { %p3895_p5 = pnand %p3893_p4, %p3890_p2 }
  0x35   : > { %3898 = shalt.err (!%p3895_p5)
}
  0x36   : > { %s3899_s21 = scalar_lea.vmem %s453_s27, 16  ;;  %s3906_s1 = scalar_lea.vmem %s453_s27, 32 }
  0x37   : > { %p3900_p7 = scmp.ne.s32.totalorder %s453_s27, %s3899_s21  ;;  %p3907_p6 = scmp.lt.s32.totalorder %s453_s27, %s453_s27 }
  0x38   : > { %p3908_p3 = scmp.lt.s32.totalorder %s3906_s1, %s3899_s21 }
  0x39   : > { %p3902_p9 = pnand %p3900_p7, %p4454_p0 }
  0x3a   : > { %p3909_p8 = por %p3908_p3, %p3907_p6 }
  0x3b   : > { %p3903_p10 = pneg %p3902_p9 }
  0x3d   : > { %p3910_p12 = pnand %p3909_p8, %p3903_p10 }
  0x3f   : > { %3913 = shalt.err (!%p3910_p12)
}
  0x40   : > { %3613 = dma.hbm_to_vmem [thread:$0]  (!%p4438_p11), %s5451_s12, 16, %s453_s27, [#allocation15]  }
  0x41   : > { %s47_s0 = sadd.s32 1, %s4262_s18  ;;  %s50_s2 = sadd.s32 1, %s4266_s19 }
  0x42   : > { %p48_p3 = scmp.ge.s32.totalorder %s47_s0, 2  ;;  %s4473_s11 = sand.u32 1, %s4270_s20  }
  0x43   : > { %s4476_s21 = sand.u32 1, %s4250_s15   ;;  %s4484_s22 = sshll.u32 %s4262_s18, 4 }
  0x44   : > { %s5509_s0 = smov (%p48_p3, %s47_s0), 0  ;;  %s5511_s2 = smov (!%p48_p3, %s50_s2), %s4266_s19 }
  0x45   : > { %5453 = sst [smem:[#allocation35_spill]] %s5509_s0  ;;  %s143_s1 = ssub.s32 %s4262_s18, %s5509_s0 }
  0x46   : > { %p52_p6 = scmp.ge.s32.totalorder %s5511_s2, 2  ;;  %p144_p8 = scmp.eq.s32.totalorder %s143_s1, 0 }
  0x47   : > { %s485_s27 = scalar_lea.vmem [#allocation5], %s4476_s21  ;;  %s5455_s12 = sadd.s32 1, %s4250_s15 }
  0x48   : > { %s492_s26 = sshll.u32 %s485_s27, 4  ;;  %s5513_s2 = smov (%p52_p6, %s5511_s2), 0  ;;  %s4500_s26 = int_to_ptr.vmem [resolvable:$true] %s492_s26 }
  0x49   : > { %5454 = sst [smem:[#allocation36_spill]] %s5513_s2  ;;  %s5457_s4 = sld [smem:[#allocation42_spill]] }
  0x4a   : > { %s4492_s16 = scalar_select %p144_p8, %s4250_s15, %s5455_s12  }
  0x4b   : > { %p5458_p13 = scmp.ne.s32.totalorder %s5450_s29, 0 }
  0x4c   : > { %5456 = sst [smem:[#allocation37_spill]] %s4492_s16 }
  0x4d   : > { %p4507_p1 = pneg %p5458_p13 }
  0x4f   : > { %s4498_s30 = scalar_lea.hbm %s5457_s4, %s4484_s22  ;;  %s3919_s24 = scalar_lea.hbm %s5457_s4, 32 }
  0x50   : > { %s3914_s0 = scalar_lea.hbm %s4498_s30, 16  ;;  %p3920_p5 = scmp.lt.u32.totalorder %s4498_s30, %s5457_s4 }
  0x51   : > { %p3915_p12 = scmp.ne.s32.totalorder %s4498_s30, %s3914_s0  ;;  %p3921_p7 = scmp.lt.u32.totalorder %s3919_s24, %s3914_s0 }
  0x52   : > { %s5459_s27 = scalar_select %p4507_p1, 1, 0 }
  0x53   : > { %p3917_p2 = pnand %p4507_p1, %p3915_p12  ;;  %p3922_p9 = por %p3921_p7, %p3920_p5 }
  0x54   : > { %p3923_p10 = scmp.lt.u32.totalorder %s3914_s0, %s4498_s30 }
  0x55   : > { %p3918_p4 = pneg %p3917_p2 }
  0x56   : > { %p3924_p3 = por %p3923_p10, %p3922_p9 }
  0x58   : > { %p3925_p6 = pnand %p3924_p3, %p3918_p4 }
  0x5a   : > { %3928 = shalt.err (!%p3925_p6)
}
  0x5b   : > { %s3929_s1 = scalar_lea.vmem %s4500_s26, 16  ;;  %s4273_s12 = smov [#allocation5]  }
  0x5c   : > { %p3930_p8 = scmp.ne.s32.totalorder %s4500_s26, %s3929_s1  ;;  %s3934_s17 = sshll.u32 %s4273_s12, 4  ;;  %s3935_s17 = int_to_ptr.vmem [resolvable:$false] %s3934_s17 }
  0x5d   : > { %s3936_s19 = scalar_lea.vmem %s3935_s17, 32  ;;  %p3937_p11 = scmp.lt.s32.totalorder %s4500_s26, %s3935_s17 }
  0x5e   : > { %p3932_p12 = pnand %p3930_p8, %p4507_p1  ;;  %p3938_p0 = scmp.lt.s32.totalorder %s3936_s19, %s3929_s1 }
  0x60   : > { %p3933_p2 = pneg %p3932_p12  ;;  %p3939_p5 = por %p3938_p0, %p3937_p11 }
  0x62   : > { %p3940_p7 = pnand %p3939_p5, %p3933_p2 }
  0x64   : > { %3943 = shalt.err (!%p3940_p7)
}
  0x65   : > { %s5460_s0 = scalar_lea.sflag [#allocation6], %s4473_s11  ;;  %s3187_s2 = sshll.u32 %s4476_s21, 6 }
  0x66   : > { %3620 = dma.hbm_to_vmem [thread:$0]  (!%p5458_p13), %s4498_s30, 16, %s4500_s26, %s5460_s0  }
  0x67   : > { %s3289_s24 = sshll.u32 %s4262_s18, 10  ;;  %s5461_s6 = sld [smem:[#allocation43_spill]] }
  0x68   : > { %s520_s19 = scalar_lea.vmem [#allocation8], %s3187_s2  ;;  %s5420_s16 = scalar_lea.sflag [#allocation9], %s4473_s11 }
  0x69   : > { %s527_s4 = sshll.u32 %s520_s19, 4  ;;  %s4543_s4 = int_to_ptr.vmem [resolvable:$true] %s527_s4 }
  0x6d   : > { %s4539_s17 = scalar_lea.hbm %s5461_s6, %s3289_s24  ;;  %s3949_s0 = scalar_lea.hbm %s5461_s6, 2048 }
  0x6e   : > { %s3944_s15 = scalar_lea.hbm %s4539_s17, 1024  ;;  %p3950_p9 = scmp.lt.u32.totalorder %s4539_s17, %s5461_s6 }
  0x6f   : > { %p3945_p11 = scmp.ne.s32.totalorder %s4539_s17, %s3944_s15  ;;  %p3951_p10 = scmp.lt.u32.totalorder %s3949_s0, %s3944_s15 }
  0x70   : > { %p3953_p6 = scmp.lt.u32.totalorder %s3944_s15, %s4539_s17 }
  0x71   : > { %p3947_p0 = pnand %p3945_p11, %p4507_p1  ;;  %p3952_p3 = por %p3951_p10, %p3950_p9 }
  0x73   : > { %p3948_p4 = pneg %p3947_p0  ;;  %p3954_p8 = por %p3953_p6, %p3952_p3 }
  0x75   : > { %p3955_p12 = pnand %p3954_p8, %p3948_p4 }
  0x77   : > { %3958 = shalt.err (!%p3955_p12)
}
  0x78   : > { %s3959_s19 = scalar_lea.vmem %s4543_s4, 1024  ;;  %s4274_s30 = smov [#allocation8]  }
  0x79   : > { %p3960_p2 = scmp.ne.s32.totalorder %s4543_s4, %s3959_s19  ;;  %s3964_s26 = sshll.u32 %s4274_s30, 4  ;;  %s3965_s26 = int_to_ptr.vmem [resolvable:$false] %s3964_s26 }
  0x7a   : > { %s3966_s1 = scalar_lea.vmem %s3965_s26, 2048  ;;  %p3967_p11 = scmp.lt.s32.totalorder %s4543_s4, %s3965_s26 }
  0x7b   : > { %p3962_p5 = pnand %p3960_p2, %p4507_p1  ;;  %p3968_p0 = scmp.lt.s32.totalorder %s3966_s1, %s3959_s19 }
  0x7d   : > { %p3963_p7 = pneg %p3962_p5  ;;  %p3969_p9 = por %p3968_p0, %p3967_p11 }
  0x7f   : > { %p3970_p10 = pnand %p3969_p9, %p3963_p7 }
  0x81   : > { %3973 = shalt.err (!%p3970_p10)
}
  0x82   : > { %s5416_s15 = smov 128   ;;  %s5417_s0 = smov 8  }
  0x83   : > { %3626 = dma.hbm_to_vmem [thread:$0]  (!%p5458_p13), %s4539_s17, 1024, %s4543_s4, %s5420_s16, %s5416_s15, %s5416_s15, %s5417_s0  }
  0x84   : > { %s5462_s10 = sld [smem:[#allocation45_spill]]  ;;  %s596_s26 = scalar_lea.vmem [#allocation14], %s3187_s2 }
  0x85   : > { %s603_s1 = sshll.u32 %s596_s26, 4  ;;  %s5464_s8 = sld [smem:[#allocation44_spill]]  ;;  %s4581_s1 = int_to_ptr.vmem [resolvable:$true] %s603_s1 }
  0x86   : > { %5463 = sst [smem:[#allocation38_spill]] %s4581_s1  ;;  %s561_s4 = scalar_lea.vmem [#allocation11], %s4476_s21 }
  0x87   : > { %s568_s17 = sshll.u32 %s561_s4, 4  ;;  %s5419_s12 = scalar_lea.sflag [#allocation12], %s4473_s11  ;;  %s569_s17 = int_to_ptr.vmem [resolvable:$true] %s568_s17 }
  0x8a   : > { %s4577_s30 = scalar_lea.hbm %s5462_s10, %s3289_s24 }
  0x8b   : > { %s4587_s23 = scalar_lea.hbm %s5464_s8, %s4484_s22  ;;  %s3979_s26 = scalar_lea.hbm %s5464_s8, 32 }
  0x8c   : > { %s3974_s24 = scalar_lea.hbm %s4587_s23, 16  ;;  %p3980_p8 = scmp.lt.u32.totalorder %s4587_s23, %s5464_s8 }
  0x8d   : > { %p3975_p4 = scmp.ne.s32.totalorder %s4587_s23, %s3974_s24  ;;  %p3981_p12 = scmp.lt.u32.totalorder %s3979_s26, %s3974_s24 }
  0x8e   : > { %p3983_p5 = scmp.lt.u32.totalorder %s3974_s24, %s4587_s23 }
  0x8f   : > { %p3977_p3 = pnand %p3975_p4, %p4507_p1  ;;  %p3982_p2 = por %p3981_p12, %p3980_p8 }
  0x91   : > { %p3978_p6 = pneg %p3977_p3  ;;  %p3984_p7 = por %p3983_p5, %p3982_p2 }
  0x93   : > { %p3985_p11 = pnand %p3984_p7, %p3978_p6 }
  0x95   : > { %3988 = shalt.err (!%p3985_p11)
}
  0x96   : > { %s3989_s4 = scalar_lea.vmem %s569_s17, 16  ;;  %s4277_s15 = smov [#allocation11]  }
  0x97   : > { %p3990_p0 = scmp.ne.s32.totalorder %s569_s17, %s3989_s4  ;;  %s3994_s0 = sshll.u32 %s4277_s15, 4  ;;  %s3995_s0 = int_to_ptr.vmem [resolvable:$false] %s3994_s0 }
  0x98   : > { %s3996_s2 = scalar_lea.vmem %s3995_s0, 32  ;;  %p3997_p4 = scmp.lt.s32.totalorder %s569_s17, %s3995_s0 }
  0x99   : > { %p3992_p9 = pnand %p3990_p0, %p4507_p1  ;;  %p3998_p3 = scmp.lt.s32.totalorder %s3996_s2, %s3989_s4 }
  0x9b   : > { %p3993_p10 = pneg %p3992_p9  ;;  %p3999_p13 = por %p3998_p3, %p3997_p4 }
  0x9d   : > { %p4000_p8 = pnand %p3999_p13, %p3993_p10 }
  0x9f   : > { %4003 = shalt.err (!%p4000_p8)
}
  0xa0   : > { %p5465_p12 = scmp.ne.s32.totalorder %s5450_s29, 0  ;;  %s4278_s24 = smov [#allocation3]  }
  0xa1   : > { %s438_s19 = sshll.u32 %s4278_s24, 4  ;;  %s4004_s15 = scalar_lea.hbm %s5381_s3, 1024  ;;  %s439_s19 = int_to_ptr.vmem [resolvable:$true] %s438_s19 }
  0xa2   : > { %3632 = dma.hbm_to_vmem [thread:$0]  (!%p5465_p12), %s4587_s23, 16, %s569_s17, %s5419_s12  }
  0xa3   : > { %p4005_p6 = scmp.ne.s32.totalorder %s5381_s3, %s4004_s15  ;;  %p5466_p13 = scmp.ne.s32.totalorder %s5452_s14, 0 }
  0xa4   : > { %p4011_p7 = scmp.lt.u32.totalorder %s4004_s15, %s5381_s3 }
  0xa5   : > { %p4007_p2 = pnand %p4005_p6, %p5466_p13 }
  0xa7   : > { %p4008_p5 = pneg %p4007_p2 }
  0xa9   : > { %p4013_p11 = pnand %p4011_p7, %p4008_p5 }
  0xab   : > { %4016 = shalt.err (!%p4013_p11)
}
  0xac   : > { %s4017_s23 = scalar_lea.vmem %s439_s19, 1024  ;;  %p4025_p4 = scmp.lt.s32.totalorder %s439_s19, %s439_s19 }
  0xad   : > { %p4018_p0 = scmp.ne.s32.totalorder %s439_s19, %s4017_s23  ;;  %p4026_p3 = scmp.lt.s32.totalorder %s4017_s23, %s4017_s23 }
  0xaf   : > { %p4020_p9 = pnand %p4018_p0, %p5466_p13  ;;  %p4027_p8 = por %p4026_p3, %p4025_p4 }
  0xb1   : > { %p4021_p10 = pneg %p4020_p9 }
  0xb3   : > { %p4028_p12 = pnand %p4027_p8, %p4021_p10 }
  0xb5   : > { %4031 = shalt.err (!%p4028_p12)
}
  0xb6   : > { %s4279_s17 = smov 64   ;;  %s4280_s24 = smov 4  }
  0xb7   : > { %p5467_p6 = scmp.ne.s32.totalorder %s5449_s28, 0  ;;  %s4281_s15 = smov [#allocation17]  }
  0xb8   : > { %s463_s20 = sshll.u32 %s4281_s15, 4  ;;  %s4635_s2 = scalar_lea.hbm %s5383_s5, %s4484_s22  ;;  %s464_s20 = int_to_ptr.vmem [resolvable:$true] %s463_s20 }
  0xb9   : > { %3610 = dma.hbm_to_vmem [thread:$0]  (!%p5467_p6), %s5381_s3, 1024, %s439_s19, [#allocation4], %s4279_s17, %s4279_s17, %s4280_s24  }
  0xba   : > { %s502_s23 = scalar_lea.vmem [#allocation7], %s4476_s21  ;;  %s4032_s25 = scalar_lea.hbm %s5391_s13, 16 }
  0xbb   : > { %s509_s12 = sshll.u32 %s502_s23, 4  ;;  %p4033_p12 = scmp.ne.s32.totalorder %s5391_s13, %s4032_s25  ;;  %s510_s12 = int_to_ptr.vmem [resolvable:$true] %s509_s12 }
  0xbc   : > { %p4039_p7 = scmp.lt.u32.totalorder %s4032_s25, %s5391_s13 }
  0xbd   : > { %p4035_p2 = pnand %p4033_p12, %p5466_p13 }
  0xbf   : > { %p4036_p5 = pneg %p4035_p2 }
  0xc1   : > { %p4041_p11 = pnand %p4039_p7, %p4036_p5 }
  0xc3   : > { %4044 = shalt.err (!%p4041_p11)
}
  0xc4   : > { %s4045_s6 = scalar_lea.vmem %s464_s20, 16  ;;  %s4052_s8 = scalar_lea.vmem %s464_s20, 32 }
  0xc5   : > { %p4046_p0 = scmp.ne.s32.totalorder %s464_s20, %s4045_s6  ;;  %p4053_p4 = scmp.lt.s32.totalorder %s464_s20, %s464_s20 }
  0xc6   : > { %p4054_p3 = scmp.lt.s32.totalorder %s4052_s8, %s4045_s6 }
  0xc7   : > { %p4048_p9 = pnand %p4046_p0, %p5466_p13 }
  0xc8   : > { %p4055_p8 = por %p4054_p3, %p4053_p4 }
  0xc9   : > { %p4049_p10 = pneg %p4048_p9 }
  0xcb   : > { %p4056_p1 = pnand %p4055_p8, %p4049_p10 }
  0xcd   : > { %4059 = shalt.err (!%p4056_p1)
}
  0xce   : > { %3616 = dma.hbm_to_vmem [thread:$0]  (!%p5467_p6), %s5391_s13, 16, %s464_s20, [#allocation18]  }
  0xcf   : > { %s3190_s14 = sshll.u32 %s4476_s21, 5  ;;  %s4060_s25 = scalar_lea.hbm %s4635_s2, 16 }
  0xd0   : > { %p4061_p13 = scmp.ne.s32.totalorder %s4635_s2, %s4060_s25  ;;  %p5468_p12 = scmp.ne.s32.totalorder %s5459_s27, 0 }
  0xd1   : > { %s4065_s28 = scalar_lea.hbm %s5383_s5, 32  ;;  %p4066_p1 = scmp.lt.u32.totalorder %s4635_s2, %s5383_s5 }
  0xd2   : > { %p4063_p2 = pnand %p4061_p13, %p5468_p12  ;;  %p4067_p7 = scmp.lt.u32.totalorder %s4065_s28, %s4060_s25 }
  0xd3   : > { %p4069_p0 = scmp.lt.u32.totalorder %s4060_s25, %s4635_s2 }
  0xd4   : > { %p4064_p5 = pneg %p4063_p2  ;;  %p4068_p11 = por %p4067_p7, %p4066_p1 }
  0xd6   : > { %p4070_p9 = por %p4069_p0, %p4068_p11 }
  0xd8   : > { %p4071_p6 = pnand %p4070_p9, %p4064_p5 }
  0xda   : > { %4074 = shalt.err (!%p4071_p6)
}
  0xdb   : > { %s4075_s20 = scalar_lea.vmem %s510_s12, 16  ;;  %s4282_s23 = smov [#allocation7]  }
  0xdc   : > { %p4076_p10 = scmp.ne.s32.totalorder %s510_s12, %s4075_s20  ;;  %s4080_s19 = sshll.u32 %s4282_s23, 4  ;;  %s4081_s19 = int_to_ptr.vmem [resolvable:$false] %s4080_s19 }
  0xdd   : > { %s4082_s26 = scalar_lea.vmem %s4081_s19, 32  ;;  %p4083_p8 = scmp.lt.s32.totalorder %s510_s12, %s4081_s19 }
  0xde   : > { %p4078_p4 = pnand %p4076_p10, %p5468_p12  ;;  %p4084_p13 = scmp.lt.s32.totalorder %s4082_s26, %s4075_s20 }
  0xe0   : > { %p4079_p3 = pneg %p4078_p4  ;;  %p4085_p2 = por %p4084_p13, %p4083_p8 }
  0xe2   : > { %p4086_p1 = pnand %p4085_p2, %p4079_p3 }
  0xe4   : > { %4089 = shalt.err (!%p4086_p1)
}
  0xe5   : > { %p5469_p7 = scmp.ne.s32.totalorder %s5450_s29, 0  ;;  %s5470_s6 = scalar_lea.sflag [#allocation6], %s4473_s11 }
  0xe6   : > { %s3290_s8 = sshll.u32 %s4262_s18, 9  ;;  %s541_s1 = scalar_lea.vmem [#allocation10], %s3190_s14 }
  0xe7   : > { %3623 = dma.hbm_to_vmem [thread:$0]  (!%p5469_p7), %s4635_s2, 16, %s510_s12, %s5470_s6  }
  0xe8   : > { %s4680_s25 = scalar_lea.hbm %s5385_s7, %s3290_s8  ;;  %s548_s15 = sshll.u32 %s541_s1, 4  ;;  %s4684_s15 = int_to_ptr.vmem [resolvable:$true] %s548_s15 }
  0xe9   : > { %s4090_s28 = scalar_lea.hbm %s4680_s25, 512  ;;  %s4095_s0 = scalar_lea.hbm %s5385_s7, 1024 }
  0xea   : > { %p4091_p5 = scmp.ne.s32.totalorder %s4680_s25, %s4090_s28  ;;  %p4096_p9 = scmp.lt.u32.totalorder %s4680_s25, %s5385_s7 }
  0xeb   : > { %p4097_p6 = scmp.lt.u32.totalorder %s4095_s0, %s4090_s28  ;;  %p4099_p4 = scmp.lt.u32.totalorder %s4090_s28, %s4680_s25 }
  0xec   : > { %p4093_p11 = pnand %p4091_p5, %p5468_p12 }
  0xed   : > { %p4098_p10 = por %p4097_p6, %p4096_p9 }
  0xee   : > { %p4094_p0 = pneg %p4093_p11 }
  0xef   : > { %p4100_p3 = por %p4099_p4, %p4098_p10 }
  0xf1   : > { %p4101_p8 = pnand %p4100_p3, %p4094_p0 }
  0xf3   : > { %4104 = shalt.err (!%p4101_p8)
}
  0xf4   : > { %s4105_s14 = scalar_lea.vmem %s4684_s15, 512  ;;  %s4283_s23 = smov [#allocation10]  }
  0xf5   : > { %p4106_p13 = scmp.ne.s32.totalorder %s4684_s15, %s4105_s14  ;;  %s4110_s19 = sshll.u32 %s4283_s23, 4  ;;  %s4111_s19 = int_to_ptr.vmem [resolvable:$false] %s4110_s19 }
  0xf6   : > { %s4112_s26 = scalar_lea.vmem %s4111_s19, 1024  ;;  %p4113_p5 = scmp.lt.s32.totalorder %s4684_s15, %s4111_s19 }
  0xf7   : > { %p4108_p2 = pnand %p4106_p13, %p5468_p12  ;;  %p4114_p11 = scmp.lt.s32.totalorder %s4112_s26, %s4105_s14 }
  0xf9   : > { %p4109_p1 = pneg %p4108_p2  ;;  %p4115_p9 = por %p4114_p11, %p4113_p5 }
  0xfb   : > { %p4116_p6 = pnand %p4115_p9, %p4109_p1 }
  0xfd   : > { %4119 = shalt.err (!%p4116_p6)
}
  0xfe   : > { %s5471_s6 = scalar_lea.sflag [#allocation9], %s4473_s11  ;;  %s4716_s16 = scalar_lea.hbm %s5387_s9, %s4484_s22 }
  0xff   : > { %3629 = dma.hbm_to_vmem [thread:$0]  (!%p5469_p7), %s4680_s25, 512, %s4684_s15, %s5471_s6, %s4279_s17, %s4279_s17, %s4280_s24  }
 0x100   : > { %s578_s1 = scalar_lea.vmem [#allocation13], %s4476_s21  ;;  %s4120_s12 = scalar_lea.hbm %s4716_s16, 16 }
 0x101   : > { %s585_s28 = sshll.u32 %s578_s1, 4  ;;  %p4121_p0 = scmp.ne.s32.totalorder %s4716_s16, %s4120_s12  ;;  %s586_s28 = int_to_ptr.vmem [resolvable:$true] %s585_s28 }
 0x102   : > { %s4125_s17 = scalar_lea.hbm %s5387_s9, 32  ;;  %p4126_p3 = scmp.lt.u32.totalorder %s4716_s16, %s5387_s9 }
 0x103   : > { %p4123_p10 = pnand %p4121_p0, %p5468_p12  ;;  %p4127_p8 = scmp.lt.u32.totalorder %s4125_s17, %s4120_s12 }
 0x104   : > { %p4129_p2 = scmp.lt.u32.totalorder %s4120_s12, %s4716_s16 }
 0x105   : > { %p4124_p4 = pneg %p4123_p10  ;;  %p4128_p13 = por %p4127_p8, %p4126_p3 }
 0x107   : > { %p4130_p1 = por %p4129_p2, %p4128_p13 }
 0x109   : > { %p4131_p5 = pnand %p4130_p1, %p4124_p4 }
 0x10b   : > { %4134 = shalt.err (!%p4131_p5)
}
 0x10c   : > { %s4135_s21 = scalar_lea.vmem %s586_s28, 16  ;;  %s4284_s22 = smov [#allocation13]  }
 0x10d   : > { %p4136_p11 = scmp.ne.s32.totalorder %s586_s28, %s4135_s21  ;;  %s4140_s15 = sshll.u32 %s4284_s22, 4  ;;  %s4141_s15 = int_to_ptr.vmem [resolvable:$false] %s4140_s15 }
 0x10e   : > { %s4142_s4 = scalar_lea.vmem %s4141_s15, 32  ;;  %p4143_p0 = scmp.lt.s32.totalorder %s586_s28, %s4141_s15 }
 0x10f   : > { %p4138_p9 = pnand %p4136_p11, %p5468_p12  ;;  %p4144_p10 = scmp.lt.s32.totalorder %s4142_s4, %s4135_s21 }
 0x111   : > { %p4139_p6 = pneg %p4138_p9  ;;  %p4145_p7 = por %p4144_p10, %p4143_p0 }
 0x113   : > { %p4146_p3 = pnand %p4145_p7, %p4139_p6 }
 0x115   : > { %4149 = shalt.err (!%p4146_p3)
}
 0x116   : > { %p5472_p8 = scmp.ne.s32.totalorder %s5450_s29, 0  ;;  %s5473_s20 = scalar_lea.sflag [#allocation12], %s4473_s11 }
 0x117   : > { %s593_s14 = scalar_lea.sflag [#allocation15], %s4473_s11  ;;  %s4150_s23 = scalar_lea.hbm %s4577_s30, 1024 }
 0x118   : > { %3635 = dma.hbm_to_vmem [thread:$0]  (!%p5472_p8), %s4716_s16, 16, %s586_s28, %s5473_s20  }
 0x119   : > { %p4151_p4 = scmp.ne.s32.totalorder %s4577_s30, %s4150_s23  ;;  %s5474_s6 = sld [smem:[#allocation45_spill]] }
 0x11a   : > { %p4159_p11 = scmp.lt.u32.totalorder %s4150_s23, %s4577_s30 }
 0x11b   : > { %p4153_p13 = pnand %p4151_p4, %p5468_p12 }
 0x11d   : > { %p4154_p2 = pneg %p4153_p13 }
 0x11f   : > { %s4155_s8 = scalar_lea.hbm %s5474_s6, 2048  ;;  %p4156_p7 = scmp.lt.u32.totalorder %s4577_s30, %s5474_s6 }
 0x120   : > { %p4157_p1 = scmp.lt.u32.totalorder %s4155_s8, %s4150_s23 }
 0x122   : > { %p4158_p5 = por %p4157_p1, %p4156_p7 }
 0x124   : > { %p4160_p9 = por %p4159_p11, %p4158_p5 }
 0x126   : > { %p4161_p6 = pnand %p4160_p9, %p4154_p2 }
 0x128   : > { %4164 = shalt.err (!%p4161_p6)
}
 0x129   : > { %s5475_s16 = sld [smem:[#allocation38_spill]]  ;;  %s4285_s12 = smov [#allocation14]  }
 0x12a   : > { %s4170_s2 = sshll.u32 %s4285_s12, 4  ;;  %s4171_s2 = int_to_ptr.vmem [resolvable:$false] %s4170_s2 }
 0x12b   : > { %s4172_s0 = scalar_lea.vmem %s4171_s2, 2048 }
 0x12f   : > { %s4165_s28 = scalar_lea.vmem %s5475_s16, 1024  ;;  %p4173_p4 = scmp.lt.s32.totalorder %s5475_s16, %s4171_s2 }
 0x130   : > { %p4166_p0 = scmp.ne.s32.totalorder %s5475_s16, %s4165_s28  ;;  %p4174_p13 = scmp.lt.s32.totalorder %s4172_s0, %s4165_s28 }
 0x132   : > { %p4168_p10 = pnand %p4166_p0, %p5468_p12  ;;  %p4175_p7 = por %p4174_p13, %p4173_p4 }
 0x134   : > { %p4169_p3 = pneg %p4168_p10 }
 0x136   : > { %p4176_p1 = pnand %p4175_p7, %p4169_p3 }
 0x138   : > { %4179 = shalt.err (!%p4176_p1)
}
 0x139   : > { %s5476_s17 = smov 8   ;;  %s5477_s24 = smov 128  }
 0x13a   : > { %3638 = dma.hbm_to_vmem [thread:$0]  (!%p5472_p8), %s4577_s30, 1024, %s5475_s16, %s593_s14, %s5477_s24, %s5477_s24, %s5476_s17  }
 0x13b   : > { %s5478_s27 = sld [smem:[#allocation34_spill]] }
 0x141   : > { %p5479_p12 = scmp.ne.s32.totalorder %s5478_s27, 0 }
 0x142   : > { %s5480_s25 = sld [smem:[#allocation32_spill]] (!%p5479_p12) }
 0x143   : > { %623 = sbr.rel (%p5479_p12) target bundleno = 4523 (0x11ab), region = 76 }
 0x148   : > { %p5481_p2 = scmp.ne.s32.totalorder (!%p5479_p12), %s5480_s25, 0 }
 0x14a   : > { %4213 = dma.done.wait (%p5481_p2), [#allocation4], 1024  }
 0x14b   : > { %4215 = vsyncadd (%p5481_p2), [#allocation4], 4294966272  ;;  %s5482_s21 = sld [smem:[#allocation31_spill]]  ;;  %s5484_s29 = sld [smem:[#allocation26_spill]] }
 0x14c   : > { %s5485_s15 = sld [smem:[#allocation33_spill]] }
 0x151   : > { %s5483_s22 = sadd.s32 4294967295, %s5482_s21   ;;  %s4774_s20 = sand.u32 1, %s5484_s29  }
 0x152   : > { %s629_s4 = sand.u32 1, %s5483_s22   ;;  %s632_s23 = scalar_lea.vmem [#allocation5], %s4774_s20 }
 0x153   : > { %s630_s11 = scalar_lea.sflag [#allocation6], %s629_s4  ;;  %p5486_p8 = scmp.ne.s32.totalorder %s5485_s15, 0 }
 0x155   : > { %4217 = dma.done.wait (%p5486_p8), %s630_s11, 32  }
 0x156   : > { %4219 = vsyncadd (%p5486_p8), %s630_s11, 4294967264  ;;  %s3200_s30 = sshll.u32 %s4774_s20, 6  ;;  %s640_s14 = scalar_lea.vmem [#allocation7], %s4774_s20 }
 0x157   : > { %s646_s19 = scalar_lea.sflag [#allocation9], %s629_s4  ;;  %s4783_s26 = scalar_lea.vmem [#allocation8], %s3200_s30 }
 0x158   : > { %4221 = dma.done.wait (%p5486_p8), %s646_s19, 1536  }
 0x159   : > { %4223 = vsyncadd (%p5486_p8), %s646_s19, 4294965760  ;;  %s3201_s6 = sshll.u32 %s4774_s20, 5  ;;  %s664_s10 = scalar_lea.sflag [#allocation12], %s629_s4 }
 0x15a   : > { %s4790_s8 = scalar_lea.vmem [#allocation10], %s3201_s6  ;;  %s666_s1 = scalar_lea.vmem [#allocation11], %s4774_s20 }
 0x15b   : > { %4225 = dma.done.wait (%p5486_p8), %s664_s10, 32  }
 0x15c   : > { %4227 = vsyncadd (%p5486_p8), %s664_s10, 4294967264  ;;  %s680_s28 = scalar_lea.sflag [#allocation15], %s629_s4  ;;  %s4798_s12 = scalar_lea.vmem [#allocation14], %s3200_s30 }
 0x15d   : > { %4229 = dma.done.wait (%p5486_p8), %s680_s28, 1024  }
 0x15e   : > { %4231 = vsyncadd (%p5486_p8), %s680_s28, 4294966272 }
 0x15f   : > { %4233 = dma.done.wait (%p5481_p2), [#allocation15], 16  }
 0x160   : > { %4235 = vsyncadd (%p5481_p2), [#allocation15], 4294967280 }
 0x161   : > { %4237 = dma.done.wait (%p5481_p2), [#allocation18], 16  }
 0x162   : > { %4239 = vsyncadd (%p5481_p2), [#allocation18], 4294967280  ;;  %s5487_s2 = sld [smem:[#allocation29_spill]]  ;;  %s5488_s0 = sld [smem:[#allocation28_spill]] }
 0x163   : > { %s5489_s29 = sld [smem:[#allocation39_spill]]  ;;  %s5490_s19 = sld [smem:[#allocation46_spill]] }
 0x164   : > { %s5491_s28 = sld [smem:[#allocation48_spill]] }
 0x168   : > { %p772_p5 = scmp.lt.s32.totalorder %s5487_s2, 1  ;;  %p777_p11 = scmp.lt.s32.totalorder %s5488_s0, 1 }
 0x169   : > { %p3211_p9 = scmp.ne.s32.totalorder %s5488_s0, 0 }
 0x16a   : > { %s5515_s2 = smov (!%p772_p5, %s5487_s2), 1  ;;  %vm794_vm0 = vcmask (!%p3211_p9), 523264  }
 0x16b   : > { %s778_s17 = scalar_select %p777_p11, %s5488_s0, 1 }
 0x16c   : > { %s3292_s24 = sshll.u32 %s5515_s2, 4  ;;  %s3294_s27 = sshll.u32 %s5515_s2, 3 }
 0x16d   : > { %s776_s15 = scalar_lea.vmem %s5489_s29, %s3292_s24  ;;  %s3293_s4 = sshll.u32 %s778_s17, 6 }
 0x16e   : > { %s4822_s25 = scalar_lea.vmem %s5490_s19, %s3293_s4  ;;  %s4827_s16 = scalar_lea.vmem %s5491_s28, %s3294_s27  ;;  %v792_v0 = vld [vmem:[%s776_s15] sm:$0xff] (!%p3211_p9)  ;;  %v793_v1 = vld [vmem:[%s776_s15 + $0x8] sm:$0xff] (!%p3211_p9) }
 0x16f   : > { %791 = sbr.rel (%p3211_p9) target bundleno = 374 (0x176), region = 120  ;;  %795 = vst.msk [vmem:[#allocation2] sm:$0xff] (!%p3211_p9), %vm794_vm0, %v792_v0  ;;  %796 = vst.msk [vmem:[#allocation2 + $0x8] sm:$0xff] (!%p3211_p9), %vm794_vm0, %v793_v1 }
 0x176 PF: > { %v4830_v2 = vld [vmem:[#allocation2] sm:$0xff]  ;;  %vm801_vm1 = vcmask 523264   ;;  %v798_v3 = vld [vmem:[#allocation2 + $0x8] sm:$0xff]  ;;  %v3759_v17 = vld [vmem:[%s4783_s26] ss:$8 sps:$4 sm:$0xff]   ;;  %v4286_v24 = vmov 0  }
 0x177   : > { %v802_v4 = vsel %vm801_vm1, %v4830_v2, 0.0  ;;  %v805_v5 = vsel %vm801_vm1, %v798_v3, 0.0  ;;  %v3757_v16 = vld [vmem:[%s4783_s26 + $0x4] ss:$8 sps:$4 sm:$0xff]   ;;  %v3760_v18 = vld [vmem:[%s4783_s26 + $0x14] ss:$8 sps:$4 sm:$0xff]   ;;  %929 = vmatprep.mubr.bf16.mxu1 %v4286_v24 }
 0x178   : > { %803 = vadd.xlane.f32.xlu0 %v802_v4  ;;  %897 = vmatprep.subr.bf16.mxu1 %v3757_v16  ;;  %v3762_v19 = vld [vmem:[%s4783_s26 + $0x10] ss:$8 sps:$4 sm:$0xff]   ;;  %v3763_v20 = vld [vmem:[%s4783_s26 + $0x24] ss:$8 sps:$4 sm:$0xff]   ;;  %v3765_v21 = vld [vmem:[%s4783_s26 + $0x20] ss:$8 sps:$4 sm:$0xff]  }
 0x179   : > { %898 = vmatpush1.bf16.msra.mxu1 %v3759_v17  ;;  %v3766_v22 = vld [vmem:[%s4783_s26 + $0x34] ss:$8 sps:$4 sm:$0xff]   ;;  %v3768_v23 = vld [vmem:[%s4783_s26 + $0x30] ss:$8 sps:$4 sm:$0xff]   ;;  %v4287_v25 = vmov 0.0   ;;  %v3770_v44 = vld [vmem:[#allocation3 + $0x8] sm:$0xff]  }
 0x17a   : > { %899 = vmatprep.subr.bf16.mxu1 %v3760_v18  ;;  %3393 = vmatprep.subr.bf16.mxu0 %v4287_v25  ;;  %v3212_v34 = vld [vmem:[%s632_s23] ss:$0 sm:$0xff]  ;;  %v3769_v42 = vld [vmem:[#allocation3] sm:$0xff]   ;;  %v3772_v46 = vld [vmem:[#allocation3 + $0x18] sm:$0xff]   ;;  %vm4288_vm2 = vmmov 0   ;;  %s5492_s26 = sld [smem:[#allocation40_spill]] }
 0x17b   : > { %v3213_v38 = vld [vmem:[%s640_s14] ss:$0 sm:$0xff]  ;;  %v3773_v47 = vld [vmem:[#allocation3 + $0x20] sm:$0xff]   ;;  %v3774_v48 = vld [vmem:[#allocation3 + $0x28] sm:$0xff]   ;;  %3395 = vmatprep.mubr.msk.bf16.mxu0 %vm4288_vm2, %v4287_v25  ;;  %s5493_s17 = sld [smem:[#allocation41_spill]]  ;;  %s4289_s15 = smov 96  }
 0x17c   : > { %806 = vadd.xlane.f32.xlu0 %v805_v5  ;;  %v3771_v45 = vld [vmem:[#allocation3 + $0x10] sm:$0xff]   ;;  %v3776_v50 = vld [vmem:[#allocation3 + $0x38] sm:$0xff]   ;;  %s4290_s4 = smov 112   ;;  %s4291_s11 = smov 80   ;;  %vm1115_vm3 = vcmask 130048   ;;  %vm1388_vm4 = vcmask 1043456  }
 0x17d   : > { %900 = vmatpush1.bf16.msra.mxu1 %v3762_v19  ;;  %v3775_v49 = vld [vmem:[#allocation3 + $0x30] sm:$0xff]   ;;  %s4292_s30 = smov 64   ;;  %vm1320_vm6 = vcmask 64512   ;;  %s4293_s19 = smov 16   ;;  %vm1595_vm7 = vcmask 261120   ;;  %vm1597_vm8 = vcmask 392192  }
 0x17e   : > { %901 = vmatprep.subr.bf16.mxu1 %v3763_v20  ;;  %s4295_s6 = smov 48  }
 0x180   : > { %v940_v58 = vld [vmem:[%s5492_s26] sm:$0xff]  ;;  %v941_v60 = vld [vmem:[%s5492_s26 + $0x8] sm:$0xff] }
 0x181   : > { %902 = vmatpush1.bf16.msra.mxu1 %v3765_v21  ;;  %s5494_s24 = smov %s5493_s17  ;;  %v1050_v59 = vld [vmem:[%s5493_s17] sm:$0xff] }
 0x182   : > { %903 = vmatprep.subr.bf16.mxu1 %v3766_v22  ;;  %v1051_v62 = vld [vmem:[%s5494_s24 + $0x8] sm:$0xff] }
 0x185   : > { %904 = vmatpush1.bf16.msra.mxu1 %v3768_v23 }
 0x186   : > { %3373 = vmatprep.subr.bf16.mxu1 %v4287_v25 }
 0x205   : > { %v804_v6 = vpop.xlane.xlu0 %803 }
 0x206   : > { %v809_v7 = vmul.f32 0.015625, %v804_v6 }
 0x208   : > { %v811_v8 = vsub.f32 %v4830_v2, %v809_v7 }
 0x209   : > { %v807_v9 = vpop.xlane.xlu0 %806 }
 0x20a   : > { %v810_v10 = vmul.f32 0.015625, %v807_v9  ;;  %v813_v11 = vmul.f32 %v811_v8, %v811_v8 }
 0x20c   : > { %v812_v12 = vsub.f32 %v798_v3, %v810_v10  ;;  %v815_v13 = vsel %vm801_vm1, %v813_v11, 0.0 }
 0x20d   : > { %816 = vadd.xlane.f32.xlu1 %v815_v13 }
 0x20e   : > { %v814_v14 = vmul.f32 %v812_v12, %v812_v12 }
 0x210   : > { %v818_v15 = vsel %vm801_vm1, %v814_v14, 0.0 }
 0x211   : > { %819 = vadd.xlane.f32.xlu1 %v818_v15 }
 0x29a   : > { %v817_v26 = vpop.xlane.xlu1 %816 }
 0x29b   : > { %v821_v27 = vmul.f32 0.015625, %v817_v26 }
 0x29d   : > { %v823_v28 = vadd.f32 1e-05, %v821_v27 }
 0x29e   : > { %v820_v29 = vpop.xlane.xlu1 %819 }
 0x29f   : > { %3801 = vrsqrt.f32 %v823_v28  ;;  %v822_v30 = vmul.f32 0.015625, %v820_v29 }
 0x2a1   : > { %v824_v31 = vadd.f32 1e-05, %v822_v30 }
 0x2a3   : > { %3803 = vrsqrt.f32 %v824_v31 }
 0x2a9   : > { %v3802_v32 = vpop.eup %3801 }
 0x2aa   : > { %v827_v33 = vmul.f32 %v3802_v32, %v811_v8 }
 0x2ac   : > { %v835_v37 = vmul.f32 %v3212_v34, %v827_v33 }
 0x2ad   : > { %v3804_v35 = vpop.eup %3803 }
 0x2ae   : > { %v828_v36 = vmul.f32 %v3804_v35, %v812_v12  ;;  %v843_v40 = vadd.f32 %v3213_v38, %v835_v37 }
 0x2b0   : > { %v836_v39 = vmul.f32 %v3212_v34, %v828_v36 }
 0x2b2   : > { %v844_v41 = vadd.f32 %v3213_v38, %v836_v39  ;;  %v1309_v39 = vlaneseq }
 0x2b4   : > { %v845_v43 = vpack.c.bf16 %v844_v41, %v843_v40  ;;  %v1310_v40 = vshrl.u32 %v1309_v39, 7  ;;  %v1312_v41 = vand.u32 127, %v1309_v39 }
 0x2b6   : > { %3222 = vmatmul.mubr.msk.bf16.vlgmr.msra.gmra.mrb[0].mxu1 %vm801_vm1, %v845_v43  ;;  %vm4953_vm5 = vcmp.ge.s32.totalorder %v1310_v40, %v1312_v41 }
 0x2b7   : > { %3374 = vmatpush3.bf16.msra.mxu1 %v3769_v42  ;;  %3389 = vmatprep.mubr.msk.bf16.mxu1 %vm4288_vm2, %v4287_v25 }
 0x2b8   : > { %3375 = vmatprep.subr.bf16.mxu1 %v4287_v25 }
 0x2bb   : > { %3376 = vmatpush3.bf16.msra.mxu1 %v3770_v44 }
 0x2bc   : > { %3377 = vmatprep.subr.bf16.mxu1 %v4287_v25 }
 0x2bf   : > { %3378 = vmatpush3.bf16.msra.mxu1 %v3771_v45 }
 0x2c0   : > { %3379 = vmatprep.subr.bf16.mxu1 %v4287_v25 }
 0x2c3   : > { %3380 = vmatpush3.bf16.msra.mxu1 %v3772_v46 }
 0x2c4   : > { %3381 = vmatprep.subr.bf16.mxu1 %v4287_v25 }
 0x2c7   : > { %3382 = vmatpush3.bf16.msra.mxu1 %v3773_v47 }
 0x2c8   : > { %3383 = vmatprep.subr.bf16.mxu1 %v4287_v25 }
 0x2cb   : > { %3384 = vmatpush3.bf16.msra.mxu1 %v3774_v48 }
 0x2cc   : > { %3385 = vmatprep.subr.bf16.mxu1 %v4287_v25 }
 0x2cf   : > { %3386 = vmatpush3.bf16.msra.mxu1 %v3775_v49 }
 0x2d0   : > { %3387 = vmatprep.subr.bf16.mxu1 %v4287_v25 }
 0x2d3   : > { %3388 = vmatpush3.bf16.msra.mxu1 %v3776_v50 }
 0x2d4   : > { %3411 = vmatprep.subr.bf16.mxu1 %v4287_v25 }
 0x389   : > { %v931_v51 = vpop.f32.mrb[0].mxu1 }
 0x38a   : > { %v933_v52 = vpop.f32.mrb[1].mxu1  ;;  %v942_v63 = vmul.f32 %v940_v58, %v931_v51 }
 0x38b   : > { %v935_v53 = vpop.f32.mrb[2].mxu1 }
 0x38c   : > { %v944_v54 = vpack.c.bf16 %v935_v53, %v931_v51  ;;  %v937_v55 = vpop.f32.mrb[3].mxu1  ;;  %v943_v4 = vmul.f32 %v941_v60, %v935_v53 }
 0x38d   : > { %v4866_v56 = vpack.i.bf16 %v937_v55, %v933_v52  ;;  %v4868_v57 = vpack.c.bf16 %v937_v55, %v933_v52 }
 0x38e   : > { %3390 = vmatmul.mubr.bf16.vlgmr.msra.gmra.mrb[4].mxu1 %v944_v54 }
 0x38f   : > { %3413 = vmatprep.mubr.msk.bf16.mxu1 %vm4288_vm2, %v4287_v25  ;;  %v4947_v38 = vsel %vm1388_vm4, %v4868_v57, 0 }
 0x461   : > { %v1043_v61 = vpop.f32.mrb[4].mxu1 }
 0x462   : > { %v1052_v0 = vmul.f32 %v1050_v59, %v1043_v61  ;;  %v3391_v1 = vpop.f32.mrb[5].mxu1 }
 0x463   : > { %v1046_v3 = vpop.f32.mrb[6].mxu1 }
 0x464   : > { %v1054_v5 = vadd.f32 %v1052_v0, %v942_v63  ;;  %v1053_v6 = vmul.f32 %v1051_v62, %v1046_v3  ;;  %v3392_v7 = vpop.f32.mrb[7].mxu1 }
 0x466   : > { %v1055_v8 = vadd.f32 %v1053_v6, %v943_v4 }
 0x468   : > { %v3732_v9 = vpack.i.bf16 %v1055_v8, %v1054_v5  ;;  %v4884_v10 = vpack.c.bf16 %v1055_v8, %v1054_v5 }
 0x46a   : > { %3733 = vrot.lane.b32.xlu1 %v3732_v9, %s4289_s15  ;;  %3728 = vrot.lane.b32.xlu0 %v3732_v9, %s4290_s4 }
 0x46e   : > { %3738 = vrot.lane.b32.xlu1 %v3732_v9, %s4291_s11 }
 0x472   : > { %1113 = vrot.lane.b32.xlu1 %v4884_v10, %s4292_s30 }
 0x4dc   : > { %v3734_v11 = vpop.permute.xlu1 %3733  ;;  %v3729_v12 = vpop.permute.xlu0 %3728 }
 0x4dd   : > { %v3736_v13 = vunpack.i.h.bf16 %v3734_v11  ;;  %v3735_v14 = vunpack.i.l.bf16 %v3734_v11  ;;  %v3731_v15 = vunpack.i.h.bf16 %v3729_v12  ;;  %v3730_v16 = vunpack.i.l.bf16 %v3729_v12 }
 0x4df   : > { %v4890_v17 = vpack.c.bf16 %v3736_v13, %v3735_v14  ;;  %v4892_v18 = vpack.c.bf16 %v3731_v15, %v3730_v16 }
 0x4e0   : > { %v3739_v19 = vpop.permute.xlu1 %3738 }
 0x4e1   : > { %v3741_v20 = vunpack.i.h.bf16 %v3739_v19  ;;  %v3740_v21 = vunpack.i.l.bf16 %v3739_v19  ;;  %1163 = vrot.lane.b32.xlu0 %v4892_v18, %s4292_s30  ;;  %1212 = vrot.lane.b32.xlu1 %v4890_v17, %s4292_s30 }
 0x4e3   : > { %v4898_v22 = vpack.c.bf16 %v3741_v20, %v3740_v21 }
 0x4e4   : > { %v1114_v23 = vpop.permute.xlu1 %1113 }
 0x4e5   : > { %1261 = vrot.lane.b32.xlu0 %v4898_v22, %s4292_s30  ;;  %3743 = vrot.lane.b32.xlu1 %v4866_v56, %s4290_s4  ;;  %v4904_v26 = vsel %vm1115_vm3, %v1114_v23, 0 }
 0x4e6   : > { %3394 = vmatpush3.bf16.xpose.msra.mxu0 %v4904_v26 }
 0x4e7   : > { %3399 = vmatprep.subr.bf16.mxu0 %v4287_v25 }
 0x4ed   : > { %3396 = vmatmul.mubr.msk.bf16.vlgmr.msra.gmra.mrb[0].mxu0 %vm1115_vm3, %v4884_v10 }
 0x4ee   : > { %3401 = vmatprep.mubr.msk.bf16.mxu0 %vm4288_vm2, %v4287_v25 }
 0x553   : > { %v1164_v27 = vpop.permute.xlu0 %1163  ;;  %v1213_v28 = vpop.permute.xlu1 %1212 }
 0x554   : > { %v4913_v29 = vsel %vm1115_vm3, %v1164_v27, 0  ;;  %v4923_v35 = vsel %vm1115_vm3, %v1213_v28, 0 }
 0x555   : > { %3400 = vmatpush3.bf16.xpose.msra.mxu0 %v4913_v29 }
 0x556   : > { %3405 = vmatprep.subr.bf16.mxu0 %v4287_v25 }
 0x557   : > { %v1262_v30 = vpop.permute.xlu0 %1261  ;;  %v3744_v31 = vpop.permute.xlu1 %3743 }
 0x558   : > { %v4918_v32 = vsel %vm1115_vm3, %v1262_v30, 0  ;;  %v3746_v33 = vunpack.i.h.bf16 %v3744_v31  ;;  %v3745_v34 = vunpack.i.l.bf16 %v3744_v31 }
 0x559   : > { %3412 = vmatpush3.bf16.xpose.msra.mxu1 %v4918_v32 }
 0x55a   : > { %3423 = vmatprep.subr.bf16.mxu1 %v4287_v25  ;;  %v4925_v36 = vpack.c.bf16 %v3746_v33, %v3745_v34 }
 0x55c   : > { %3402 = vmatmul.mubr.msk.bf16.vlgmr.msra.gmra.mrb[4].mxu0 %vm1115_vm3, %v4892_v18  ;;  %v4937_v37 = vsel %vm1388_vm4, %v4925_v36, 0 }
 0x55d   : > { %3406 = vmatpush3.bf16.xpose.msra.mxu0 %v4923_v35  ;;  %3407 = vmatprep.mubr.msk.bf16.mxu0 %vm4288_vm2, %v4287_v25 }
 0x55e   : > { %3417 = vmatprep.subr.bf16.mxu0 %v4287_v25 }
 0x560   : > { %3414 = vmatmul.mubr.msk.bf16.vlgmr.msra.gmra.mrb[8].mxu1 %vm1115_vm3, %v4898_v22 }
 0x561   : > { %3424 = vmatpush3.bf16.msra.mxu1 %v4937_v37  ;;  %3425 = vmatprep.mubr.msk.bf16.mxu1 %vm4288_vm2, %v4287_v25 }
 0x562   : > { %3435 = vmatprep.subr.bf16.mxu1 %v4287_v25 }
 0x564   : > { %3408 = vmatmul.mubr.msk.bf16.vlgmr.msra.gmra.mrb[8].mxu0 %vm1115_vm3, %v4890_v17 }
 0x565   : > { %3418 = vmatpush3.bf16.msra.mxu0 %v4947_v38  ;;  %3419 = vmatprep.mubr.msk.bf16.mxu0 %vm4288_vm2, %v4287_v25 }
 0x566   : > { %3429 = vmatprep.subr.bf16.mxu0 %v4287_v25 }
 0x5c0   : > { %v1156_v43 = vpop.f32.mrb[0].mxu0 }
 0x5c1   : > { %v1316_v44 = vsel %vm4953_vm5, %v1156_v43, -1e+30  ;;  %v3397_v45 = vpop.f32.mrb[1].mxu0 }
 0x5c2   : > { %v1159_v46 = vpop.f32.mrb[2].mxu0  ;;  %v1321_v47 = vsel %vm1320_vm6, %v1316_v44, -inf }
 0x5c3   : > { %1322 = vmax.xlane.f32.xlu1 %v1321_v47  ;;  %v3398_v48 = vpop.f32.mrb[3].mxu0 }
 0x5d4   : > { %3753 = vrot.lane.b32.xlu1 %v4866_v56, %s4291_s11 }
 0x62f   : > { %v1205_v49 = vpop.f32.mrb[4].mxu0 }
 0x630   : > { %v1317_v50 = vsel %vm4953_vm5, %v1205_v49, -1e+30  ;;  %v3403_v51 = vpop.f32.mrb[5].mxu0 }
 0x631   : > { %v1208_v52 = vpop.f32.mrb[6].mxu0  ;;  %v1324_v53 = vsel %vm1320_vm6, %v1317_v50, -inf }
 0x632   : > { %1325 = vmax.xlane.f32.xlu0 %v1324_v53  ;;  %v3404_v54 = vpop.f32.mrb[7].mxu0 }
 0x633   : > { %v1303_v55 = vpop.f32.mrb[8].mxu1 }
 0x634   : > { %v1319_v58 = vsel %vm4953_vm5, %v1303_v55, -1e+30  ;;  %v3415_v59 = vpop.f32.mrb[9].mxu1 }
 0x635   : > { %v1306_v60 = vpop.f32.mrb[10].mxu1  ;;  %v1330_v61 = vsel %vm1320_vm6, %v1319_v58, -inf  ;;  %v5028_v59 = vrot.slane %v4884_v10, 4  ;;  %v5046_v10 = vrot.slane %v4898_v22, 4 }
 0x636   : > { %1331 = vmax.xlane.f32.xlu0 %v1330_v61  ;;  %v3416_v62 = vpop.f32.mrb[11].mxu1 }
 0x637   : > { %v1254_v63 = vpop.f32.mrb[8].mxu0 }
 0x638   : > { %v1318_v0 = vsel %vm4953_vm5, %v1254_v63, -1e+30  ;;  %v3409_v1 = vpop.f32.mrb[9].mxu0 }
 0x639   : > { %v1257_v3 = vpop.f32.mrb[10].mxu0  ;;  %v1327_v4 = vsel %vm1320_vm6, %v1318_v0, -inf }
 0x63a   : > { %v3410_v5 = vpop.f32.mrb[11].mxu0  ;;  %1328 = vmax.xlane.f32.xlu0 %v1327_v4 }
 0x650   : > { %v4971_v6 = vpop.xlane.xlu1 %1322  ;;  %3748 = vrot.lane.b32.xlu0 %v4866_v56, %s4289_s15 }
 0x651   : > { %v1333_v7 = vmax.f32 %v4971_v6, -1e+30  ;;  %v5059_v6 = vld [vmem:[%s4790_s8] sm:$0xff]  }
 0x653   : > { %v1349_v8 = vsub.f32 %v1316_v44, %v1333_v7 }
 0x654   : > { %v3754_v23 = vpop.permute.xlu1 %3753 }
 0x655   : > { %v1353_v9 = vmul.f32 1.442695, %v1349_v8  ;;  %v3756_v31 = vunpack.i.h.bf16 %v3754_v23  ;;  %v3755_v34 = vunpack.i.l.bf16 %v3754_v23 }
 0x657   : > { %3805 = vpow2.f32 %v1353_v9  ;;  %v4998_v44 = vpack.c.bf16 %v3756_v31, %v3755_v34  ;;  %v5075_v31 = vld [vmem:[%s4790_s8 + $0x10] sm:$0xff]  }
 0x659   : > { %v5010_v49 = vsel %vm1388_vm4, %v4998_v44, 0 }
 0x661   : > { %v3806_v11 = vpop.eup %3805 }
 0x662   : > { %v1381_v12 = vpack.c.bf16 %v3806_v11, %v3806_v11 }
 0x664   : > { %3420 = vmatmul.mubr.msk.bf16.vlgmr.msra.gmra.mrb[12].mxu0 %vm1320_vm6, %v1381_v12 }
 0x665   : > { %3431 = vmatprep.mubr.msk.bf16.mxu0 %vm4288_vm2, %v4287_v25 }
 0x6bf   : > { %v4981_v13 = vpop.xlane.xlu0 %1325 }
 0x6c0   : > { %v1334_v14 = vmax.f32 %v4981_v13, -1e+30 }
 0x6c2   : > { %v1350_v56 = vsub.f32 %v1317_v50, %v1334_v14  ;;  %v1365_v50 = vsel %vm1320_vm6, %v3806_v11, 0.0  ;;  %v1338_v8 = vsub.f32 -1e+30, %v1334_v14 }
 0x6c3   : > { %v4986_v15 = vpop.xlane.xlu0 %1331 }
 0x6c4   : > { %v1355_v16 = vmul.f32 1.442695, %v1350_v56  ;;  %v1336_v19 = vmax.f32 %v4986_v15, -1e+30  ;;  %v1343_v9 = vmul.f32 1.442695, %v1338_v8 }
 0x6c5   : > { %v5079_v15 = vld [vmem:[%s4790_s8 + $0x18] sm:$0xff]  }
 0x6c6   : > { %v1352_v20 = vsub.f32 %v1319_v58, %v1336_v19  ;;  %3807 = vpow2.f32 %v1355_v16  ;;  %v1340_v12 = vsub.f32 -1e+30, %v1336_v19 }
 0x6c7   : > { %v4991_v21 = vpop.xlane.xlu0 %1328 }
 0x6c8   : > { %v1335_v27 = vmax.f32 %v4991_v21, -1e+30  ;;  %v1359_v28 = vmul.f32 1.442695, %v1352_v20  ;;  %v1347_v16 = vmul.f32 1.442695, %v1340_v12 }
 0x6ca   : > { %v1351_v30 = vsub.f32 %v1318_v0, %v1335_v27  ;;  %3809 = vpow2.f32 %v1359_v28  ;;  %v1339_v11 = vsub.f32 -1e+30, %v1335_v27 }
 0x6cb   : > { %v3749_v33 = vpop.permute.xlu0 %3748 }
 0x6cc   : > { %v1357_v39 = vmul.f32 1.442695, %v1351_v30  ;;  %v3751_v40 = vunpack.i.h.bf16 %v3749_v33  ;;  %v3750_v41 = vunpack.i.l.bf16 %v3749_v33  ;;  %v1345_v56 = vmul.f32 1.442695, %v1339_v11 }
 0x6ce   : > { %v4996_v43 = vpack.c.bf16 %v3751_v40, %v3750_v41  ;;  %3811 = vpow2.f32 %v1357_v39 }
 0x6d0   : > { %v5002_v45 = vsel %vm1388_vm4, %v4996_v43, 0  ;;  %v3808_v46 = vpop.eup %3807 }
 0x6d1   : > { %3430 = vmatpush3.bf16.msra.mxu0 %v5002_v45  ;;  %v1368_v47 = vsel %vm1320_vm6, %v3808_v46, 0.0  ;;  %v1382_v48 = vpack.c.bf16 %v3808_v46, %v3808_v46 }
 0x6d2   : > { %3441 = vmatprep.subr.bf16.mxu0 %v4287_v25  ;;  %1369 = vadd.xlane.f32.xlu1 %v1368_v47 }
 0x6d3   : > { %3426 = vmatmul.mubr.msk.bf16.vlgmr.msra.gmra.mrb[12].mxu1 %vm1320_vm6, %v1382_v48 }
 0x6d4   : > { %3436 = vmatpush3.bf16.msra.mxu1 %v5010_v49  ;;  %3437 = vmatprep.mubr.msk.bf16.mxu1 %vm4288_vm2, %v4287_v25  ;;  %v3810_v51 = vpop.eup %3809 }
 0x6d5   : > { %3453 = vmatprep.subr.bf16.mxu1 %v4287_v25  ;;  %v1384_v55 = vpack.c.bf16 %v3810_v51, %v3810_v51  ;;  %v1374_v58 = vsel %vm1320_vm6, %v3810_v51, 0.0 }
 0x6d6   : > { %1366 = vadd.xlane.f32.xlu1 %v1365_v50 }
 0x6d8   : > { %v3812_v52 = vpop.eup %3811 }
 0x6d9   : > { %v1371_v53 = vsel %vm1320_vm6, %v3812_v52, 0.0  ;;  %v1383_v54 = vpack.c.bf16 %v3812_v52, %v3812_v52 }
 0x6da   : > { %1372 = vadd.xlane.f32.xlu0 %v1371_v53 }
 0x6db   : > { %3432 = vmatmul.mubr.msk.bf16.vlgmr.msra.gmra.mrb[16].mxu0 %vm1320_vm6, %v1383_v54  ;;  %3438 = vmatmul.mubr.msk.bf16.vlgmr.msra.gmra.mrb[16].mxu1 %vm1320_vm6, %v1384_v55 }
 0x6dc   : > { %3455 = vmatprep.mubr.msk.bf16.mxu1 %vm4288_vm2, %v4287_v25  ;;  %3449 = vmatprep.mubr.msk.bf16.mxu0 %vm4288_vm2, %v4287_v25 }
 0x6dd   : > { %3454 = vmatpush3.bf16.xpose.msra.mxu1 %v4904_v26  ;;  %v5037_v26 = vrot.slane %v4892_v18, 4  ;;  %v1337_v18 = vsub.f32 -1e+30, %v1333_v7  ;;  %3442 = vmatpush3.bf16.msra.mxu0 %v5059_v6  ;;  %v5063_v7 = vld [vmem:[%s4790_s8 + $0x8] sm:$0xff]   ;;  %s4294_s8 = smov 32  }
 0x6de   : > { %1375 = vadd.xlane.f32.xlu0 %v1374_v58  ;;  %3459 = vmatprep.subr.bf16.mxu1 %v4287_v25 }
 0x6df   : > { %3443 = vmatprep.subr.bf16.mxu0 %v4287_v25 }
 0x6e1   : > { %3444 = vmatpush3.bf16.msra.mxu0 %v5063_v7 }
 0x6e2   : > { %3445 = vmatprep.subr.bf16.mxu0 %v4287_v25 }
 0x6e4   : > { %3456 = vmatmul.mubr.msk.bf16.vlgmr.msra.gmra.mrb[20].mxu1 %vm1115_vm3, %v5028_v59 }
 0x6e5   : > { %3460 = vmatpush3.bf16.xpose.msra.mxu1 %v4913_v29  ;;  %3461 = vmatprep.mubr.msk.bf16.mxu1 %vm4288_vm2, %v4287_v25  ;;  %v1341_v29 = vmul.f32 1.442695, %v1337_v18 }
 0x6e6   : > { %3471 = vmatprep.subr.bf16.mxu1 %v4287_v25  ;;  %3446 = vmatpush3.bf16.msra.mxu0 %v5075_v31 }
 0x6e7   : > { %3813 = vpow2.f32 %v1341_v29  ;;  %3447 = vmatprep.subr.bf16.mxu0 %v4287_v25 }
 0x6ea   : > { %3448 = vmatpush3.bf16.msra.mxu0 %v5079_v15 }
 0x6eb   : > { %3465 = vmatprep.subr.bf16.mxu0 %v4287_v25 }
 0x6ec   : > { %3462 = vmatmul.mubr.msk.bf16.vlgmr.msra.gmra.mrb[24].mxu1 %vm1115_vm3, %v5037_v26 }
 0x6ed   : > { %3472 = vmatpush3.bf16.xpose.msra.mxu1 %v4918_v32  ;;  %3473 = vmatprep.mubr.msk.bf16.mxu1 %vm4288_vm2, %v4287_v25 }
 0x6ee   : > { %3483 = vmatprep.subr.bf16.mxu1 %v4287_v25 }
 0x6f1   : > { %v3814_v32 = vpop.eup %3813 }
 0x6f2   : > { %v1361_v22 = vmul.f32 0.0, %v3814_v32 }
 0x6f4   : > { %3474 = vmatmul.mubr.msk.bf16.vlgmr.msra.gmra.mrb[28].mxu1 %vm1115_vm3, %v5046_v10 }
 0x6f5   : > { %3484 = vmatpush3.bf16.msra.mxu1 %v4937_v37  ;;  %3485 = vmatprep.mubr.msk.bf16.mxu1 %vm4288_vm2, %v4287_v25 }
 0x6f6   : > { %3495 = vmatprep.subr.bf16.mxu1 %v4287_v25 }
 0x737   : > { %v1426_v60 = vpop.f32.mrb[12].mxu0 }
 0x738   : > { %v1570_v61 = vadd.f32 %v1426_v60, %v1361_v22  ;;  %v3421_v62 = vpop.f32.mrb[13].mxu0 }
 0x739   : > { %v1429_v63 = vpop.f32.mrb[14].mxu0 }
 0x73a   : > { %v3422_v0 = vpop.f32.mrb[15].mxu0 }
 0x75f   : > { %v1370_v37 = vpop.xlane.xlu1 %1369 }
 0x763   : > { %v1367_v1 = vpop.xlane.xlu1 %1366 }
 0x764   : > { %v1377_v3 = vadd.f32 %v1367_v1, %v1361_v22 }
 0x766   : > { %3815 = vrcp.f32 %v1377_v3 }
 0x767   : > { %3817 = vpow2.f32 %v1343_v9  ;;  %v1373_v28 = vpop.xlane.xlu0 %1372 }
 0x768   : > { %3819 = vpow2.f32 %v1345_v56 }
 0x769   : > { %3821 = vpow2.f32 %v1347_v16 }
 0x76b   : > { %v1376_v27 = vpop.xlane.xlu0 %1375 }
 0x770   : > { %v3816_v4 = vpop.eup %3815 }
 0x771   : > { %v5056_v5 = vmul.f32 %v3816_v4, %v1570_v61  ;;  %v3818_v20 = vpop.eup %3817 }
 0x772   : > { %v1362_v23 = vmul.f32 0.0, %v3818_v20  ;;  %v3820_v13 = vpop.eup %3819 }
 0x773   : > { %v3822_v14 = vpop.eup %3821  ;;  %v1363_v21 = vmul.f32 0.0, %v3820_v13 }
 0x774   : > { %v1378_v30 = vadd.f32 %v1370_v37, %v1362_v23  ;;  %v1364_v33 = vmul.f32 0.0, %v3822_v14 }
 0x775   : > { %v1379_v19 = vadd.f32 %v1373_v28, %v1363_v21 }
 0x776   : > { %3823 = vrcp.f32 %v1378_v30  ;;  %v1380_v34 = vadd.f32 %v1376_v27, %v1364_v33  ;;  %v5094_v30 = vrot.slane %v4890_v17, 4 }
 0x777   : > { %3825 = vrcp.f32 %v1379_v19 }
 0x778   : > { %3827 = vrcp.f32 %v1380_v34 }
 0x780   : > { %v3824_v46 = vpop.eup %3823 }
 0x781   : > { %v3826_v53 = vpop.eup %3825 }
 0x782   : > { %v3828_v29 = vpop.eup %3827 }
 0x7a6   : > { %v1472_v39 = vpop.f32.mrb[12].mxu1 }
 0x7a7   : > { %v1571_v40 = vadd.f32 %v1472_v39, %v1362_v23  ;;  %v3427_v41 = vpop.f32.mrb[13].mxu1 }
 0x7a8   : > { %v1475_v47 = vpop.f32.mrb[14].mxu1 }
 0x7a9   : > { %v1577_v48 = vmul.f32 %v3824_v46, %v1571_v40  ;;  %v3428_v50 = vpop.f32.mrb[15].mxu1 }
 0x7ab   : > { %1583 = vrot.lane.b32.xlu0 %v1577_v48, %s4293_s19 }
 0x7ae   : > { %v1518_v51 = vpop.f32.mrb[16].mxu0  ;;  %v1564_v52 = vpop.f32.mrb[16].mxu1 }
 0x7af   : > { %v1572_v54 = vadd.f32 %v1518_v51, %v1363_v21  ;;  %v1573_v55 = vadd.f32 %v1564_v52, %v1364_v33  ;;  %v3433_v58 = vpop.f32.mrb[17].mxu0  ;;  %v3439_v18 = vpop.f32.mrb[17].mxu1 }
 0x7b0   : > { %v1521_v32 = vpop.f32.mrb[18].mxu0  ;;  %v1567_v22 = vpop.f32.mrb[18].mxu1 }
 0x7b1   : > { %v1579_v60 = vmul.f32 %v3826_v53, %v1572_v54  ;;  %v1581_v61 = vmul.f32 %v3828_v29, %v1573_v55  ;;  %v3434_v62 = vpop.f32.mrb[19].mxu0  ;;  %v3440_v63 = vpop.f32.mrb[19].mxu1 }
 0x7b3   : > { %1587 = vrot.lane.b32.xlu1 %v1579_v60, %s4294_s8 }
 0x7b7   : > { %v1707_v0 = vpop.f32.mrb[20].mxu1  ;;  %1591 = vrot.lane.b32.xlu1 %v1581_v61, %s4295_s6 }
 0x7b8   : > { %v3457_v37 = vpop.f32.mrb[21].mxu1  ;;  %v1845_v28 = vsel %vm1320_vm6, %v1707_v0, -inf }
 0x7b9   : > { %v1710_v1 = vpop.f32.mrb[22].mxu1 }
 0x7ba   : > { %v3458_v3 = vpop.f32.mrb[23].mxu1 }
 0x7bf   : > { %v1751_v4 = vpop.f32.mrb[24].mxu1 }
 0x7c0   : > { %v3463_v8 = vpop.f32.mrb[25].mxu1  ;;  %v1848_v20 = vsel %vm1320_vm6, %v1751_v4, -inf }
 0x7c1   : > { %v1754_v9 = vpop.f32.mrb[26].mxu1 }
 0x7c2   : > { %v3464_v11 = vpop.f32.mrb[27].mxu1 }
 0x7c7   : > { %v5087_v12 = vpop.f32.mrb[28].mxu1 }
 0x7c8   : > { %v3475_v56 = vpop.f32.mrb[29].mxu1  ;;  %v1854_v22 = vsel %vm1320_vm6, %v5087_v12, -inf }
 0x7c9   : > { %v1842_v16 = vpop.f32.mrb[30].mxu1 }
 0x7ca   : > { %v3476_v23 = vpop.f32.mrb[31].mxu1  ;;  %1849 = vmax.xlane.f32.xlu0 %v1848_v20 }
 0x7db   : > { %1846 = vmax.xlane.f32.xlu1 %v1845_v28 }
 0x7ec   : > { %2085 = vrot.lane.b32.xlu1 %v5028_v59, %s4292_s30 }
 0x7f0   : > { %2175 = vrot.lane.b32.xlu1 %v5094_v30, %s4292_s30 }
 0x7f4   : > { %2220 = vrot.lane.b32.xlu1 %v5046_v10, %s4292_s30 }
 0x81d   : > { %v1584_v13 = vpop.permute.xlu0 %1583 }
 0x81e   : > { %v1594_v21 = vsel %vm1115_vm3, %v5056_v5, %v1584_v13 }
 0x825   : > { %v1588_v14 = vpop.permute.xlu1 %1587 }
 0x826   : > { %v1596_v27 = vsel %vm1595_vm7, %v1594_v21, %v1588_v14 }
 0x829   : > { %v1592_v33 = vpop.permute.xlu1 %1591 }
 0x82a   : > { %v1598_v19 = vsel %vm1597_vm8, %v1596_v27, %v1592_v33 }
 0x82b   : > { %v1599_v17 = vpack.c.bf16 %v1598_v19, %v1598_v19 }
 0x82d   : > { %3450 = vmatmul.mubr.msk.bf16.vlgmr.msra.gmra.mrb[20].mxu0 %vm801_vm1, %v1599_v17 }
 0x82e   : > { %3466 = vmatpush3.bf16.xpose.msra.mxu0 %v4923_v35  ;;  %3467 = vmatprep.mubr.msk.bf16.mxu0 %vm4288_vm2, %v4287_v25 }
 0x82f   : > { %3477 = vmatprep.subr.bf16.mxu0 %v4287_v25 }
 0x835   : > { %3468 = vmatmul.mubr.msk.bf16.vlgmr.msra.gmra.mrb[24].mxu0 %vm1115_vm3, %v5094_v30 }
 0x836   : > { %3478 = vmatpush3.bf16.msra.mxu0 %v4947_v38  ;;  %3479 = vmatprep.mubr.msk.bf16.mxu0 %vm4288_vm2, %v4287_v25 }
 0x837   : > { %3489 = vmatprep.subr.bf16.mxu0 %v4287_v25 }
 0x857   : > { %v1850_v5 = vpop.xlane.xlu0 %1849 }
 0x858   : > { %v5115_v34 = vmax.f32 %v1850_v5, -1e+30 }
 0x85a   : > { %v1874_v35 = vsub.f32 %v1751_v4, %v5115_v34 }
 0x85c   : > { %v1879_v39 = vmul.f32 1.442695, %v1874_v35 }
 0x85e   : > { %3829 = vpow2.f32 %v1879_v39  ;;  %v2338_v39 = vrot.slane %v4868_v57, 4 }
 0x868   : > { %v5118_v40 = vpop.eup %3829  ;;  %v1847_v41 = vpop.xlane.xlu1 %1846 }
 0x869   : > { %v5120_v46 = vmax.f32 %v1847_v41, -1e+30  ;;  %v1906_v38 = vpack.c.bf16 %v5118_v40, %v5118_v40  ;;  %v2386_v41 = vrot.slane %v4925_v36, 4 }
 0x86b   : > { %v1873_v47 = vsub.f32 %v1707_v0, %v5120_v46  ;;  %3486 = vmatmul.mubr.msk.bf16.vlgmr.msra.gmra.mrb[32].mxu1 %vm1320_vm6, %v1906_v38  ;;  %v2391_v57 = vsel %vm1388_vm4, %v2386_v41, 0 }
 0x86c   : > { %3496 = vmatpush3.bf16.msra.mxu1 %v5010_v49  ;;  %3497 = vmatprep.mubr.msk.bf16.mxu1 %vm4288_vm2, %v4287_v25  ;;  %v2086_v28 = vpop.permute.xlu1 %2085 }
 0x86d   : > { %v1877_v48 = vmul.f32 1.442695, %v1873_v47  ;;  %3507 = vmatprep.subr.bf16.mxu1 %v4287_v25  ;;  %v2088_v14 = vsel %vm1115_vm3, %v2086_v28, 0 }
 0x86f   : > { %3831 = vpow2.f32 %v1877_v48 }
 0x870   : > { %v2176_v33 = vpop.permute.xlu1 %2175 }
 0x871   : > { %v2178_v17 = vsel %vm1115_vm3, %v2176_v33, 0 }
 0x874   : > { %v2221_v5 = vpop.permute.xlu1 %2220 }
 0x875   : > { %v2223_v35 = vsel %vm1115_vm3, %v2221_v5, 0 }
 0x879   : > { %v5130_v50 = vpop.eup %3831 }
 0x87a   : > { %v1905_v51 = vpack.c.bf16 %v5130_v50, %v5130_v50 }
 0x87c   : > { %3480 = vmatmul.mubr.msk.bf16.vlgmr.msra.gmra.mrb[28].mxu0 %vm1320_vm6, %v1905_v51 }
 0x87d   : > { %3490 = vmatpush3.bf16.msra.mxu0 %v5002_v45  ;;  %3491 = vmatprep.mubr.msk.bf16.mxu0 %vm4288_vm2, %v4287_v25 }
 0x87e   : > { %3501 = vmatprep.subr.bf16.mxu0 %v4287_v25 }
 0x900   : > { %v1661_v49 = vpop.f32.mrb[20].mxu0 }
 0x901   : > { %v1667_v52 = vadd.f32 %v1661_v49, %v4830_v2  ;;  %v3451_v53 = vpop.f32.mrb[21].mxu0 }
 0x902   : > { %v1664_v54 = vpop.f32.mrb[22].mxu0 }
 0x903   : > { %1668 = vst.msk [vmem:[#allocation2] sm:$0xff] %vm801_vm1, %v1667_v52  ;;  %v3452_v55 = vpop.f32.mrb[23].mxu0 }
 0x908   : > { %v1795_v58 = vpop.f32.mrb[24].mxu0 }
 0x909   : > { %v3469_v18 = vpop.f32.mrb[25].mxu0  ;;  %v1851_v29 = vsel %vm1320_vm6, %v1795_v58, -inf }
 0x90a   : > { %v1798_v32 = vpop.f32.mrb[26].mxu0  ;;  %1852 = vmax.xlane.f32.xlu0 %v1851_v29 }
 0x90b   : > { %v3470_v45 = vpop.f32.mrb[27].mxu0 }
 0x90e   : > { %1855 = vmax.xlane.f32.xlu0 %v1854_v22  ;;  %v1892_v22 = vsel %vm1320_vm6, %v5118_v40, 0.0 }
 0x924   : > { %2130 = vrot.lane.b32.xlu0 %v5037_v26, %s4292_s30 }
 0x93e   : > { %v5146_v2 = vpop.f32.mrb[32].mxu1 }
 0x93f   : > { %v3487_v60 = vpop.f32.mrb[33].mxu1 }
 0x940   : > { %v1992_v61 = vpop.f32.mrb[34].mxu1 }
 0x941   : > { %v3488_v62 = vpop.f32.mrb[35].mxu1 }
 0x94f   : > { %v5148_v63 = vpop.f32.mrb[28].mxu0 }
 0x950   : > { %v3481_v0 = vpop.f32.mrb[29].mxu0 }
 0x951   : > { %v1949_v37 = vpop.f32.mrb[30].mxu0 }
 0x952   : > { %v3482_v1 = vpop.f32.mrb[31].mxu0 }
 0x997   : > { %v1853_v3 = vpop.xlane.xlu0 %1852 }
 0x998   : > { %v5150_v4 = vmax.f32 %v1853_v3, -1e+30 }
 0x99a   : > { %v1875_v8 = vsub.f32 %v1795_v58, %v5150_v4  ;;  %v1863_v33 = vsub.f32 -1e+30, %v5150_v4 }
 0x99b   : > { %v1856_v9 = vpop.xlane.xlu0 %1855 }
 0x99c   : > { %v1881_v11 = vmul.f32 1.442695, %v1875_v8  ;;  %v5153_v56 = vmax.f32 %v1856_v9, -1e+30  ;;  %v1869_v5 = vmul.f32 1.442695, %v1863_v33 }
 0x99e   : > { %3833 = vpow2.f32 %v1881_v11  ;;  %v1876_v16 = vsub.f32 %v5087_v12, %v5153_v56 }
 0x99f   : > { %v2131_v27 = vpop.permute.xlu0 %2130 }
 0x9a0   : > { %v1883_v20 = vmul.f32 1.442695, %v1876_v16  ;;  %v2133_v19 = vsel %vm1115_vm3, %v2131_v27, 0  ;;  %v1862_v27 = vsub.f32 -1e+30, %v5115_v34 }
 0x9a2   : > { %3835 = vpow2.f32 %v1883_v20 }
 0x9a8   : > { %v5157_v23 = vpop.eup %3833 }
 0x9a9   : > { %v1907_v13 = vpack.c.bf16 %v5157_v23, %v5157_v23 }
 0x9ab   : > { %3492 = vmatmul.mubr.msk.bf16.vlgmr.msra.gmra.mrb[32].mxu0 %vm1320_vm6, %v1907_v13 }
 0x9ac   : > { %v5163_v21 = vpop.eup %3835  ;;  %3502 = vmatpush3.bf16.xpose.msra.mxu0 %v2088_v14  ;;  %3503 = vmatprep.mubr.msk.bf16.mxu0 %vm4288_vm2, %v4287_v25  ;;  %v1895_v14 = vsel %vm1320_vm6, %v5157_v23, 0.0  ;;  %v1864_v23 = vsub.f32 -1e+30, %v5153_v56 }
 0x9ad   : > { %v1908_v12 = vpack.c.bf16 %v5163_v21, %v5163_v21  ;;  %3513 = vmatprep.subr.bf16.mxu0 %v4287_v25  ;;  %v1898_v3 = vsel %vm1320_vm6, %v5163_v21, 0.0  ;;  %v1861_v21 = vsub.f32 -1e+30, %v5120_v46 }
 0x9af   : > { %3498 = vmatmul.mubr.msk.bf16.vlgmr.msra.gmra.mrb[36].mxu1 %vm1320_vm6, %v1908_v12  ;;  %v1865_v12 = vmul.f32 1.442695, %v1861_v21 }
 0x9b0   : > { %3508 = vmatpush3.bf16.xpose.msra.mxu1 %v2133_v19  ;;  %3509 = vmatprep.mubr.msk.bf16.mxu1 %vm4288_vm2, %v4287_v25  ;;  %v1867_v19 = vmul.f32 1.442695, %v1862_v27 }
 0x9b1   : > { %3519 = vmatprep.subr.bf16.mxu1 %v4287_v25  ;;  %3837 = vpow2.f32 %v1865_v12 }
 0x9b2   : > { %3839 = vpow2.f32 %v1867_v19 }
 0x9b3   : > { %3504 = vmatmul.mubr.msk.bf16.vlgmr.msra.gmra.mrb[36].mxu0 %vm1115_vm3, %v5028_v59  ;;  %v2343_v59 = vsel %vm1388_vm4, %v2338_v39, 0  ;;  %3841 = vpow2.f32 %v1869_v5 }
 0x9b4   : > { %3514 = vmatpush3.bf16.xpose.msra.mxu0 %v2178_v17  ;;  %3515 = vmatprep.mubr.msk.bf16.mxu0 %vm4288_vm2, %v4287_v25 }
 0x9b5   : > { %3525 = vmatprep.subr.bf16.mxu0 %v4287_v25 }
 0x9b7   : > { %3510 = vmatmul.mubr.msk.bf16.vlgmr.msra.gmra.mrb[40].mxu1 %vm1115_vm3, %v5037_v26 }
 0x9b8   : > { %3520 = vmatpush3.bf16.xpose.msra.mxu1 %v2223_v35  ;;  %3521 = vmatprep.mubr.msk.bf16.mxu1 %vm4288_vm2, %v4287_v25 }
 0x9b9   : > { %3531 = vmatprep.subr.bf16.mxu1 %v4287_v25 }
 0x9bb   : > { %3516 = vmatmul.mubr.msk.bf16.vlgmr.msra.gmra.mrb[40].mxu0 %vm1115_vm3, %v5094_v30 }
 0x9bc   : > { %3526 = vmatpush3.bf16.msra.mxu0 %v2343_v59  ;;  %3527 = vmatprep.mubr.msk.bf16.mxu0 %vm4288_vm2, %v4287_v25 }
 0x9bd   : > { %3537 = vmatprep.subr.bf16.mxu0 %v4287_v25 }
 0x9bf   : > { %3522 = vmatmul.mubr.msk.bf16.vlgmr.msra.gmra.mrb[44].mxu1 %vm1115_vm3, %v5046_v10 }
 0x9c0   : > { %3532 = vmatpush3.bf16.msra.mxu1 %v2391_v57  ;;  %3533 = vmatprep.mubr.msk.bf16.mxu1 %vm4288_vm2, %v4287_v25 }
 0x9c1   : > { %3543 = vmatprep.subr.bf16.mxu1 %v4287_v25 }
 0xa7e   : > { %v5201_v26 = vpop.f32.mrb[32].mxu0 }
 0xa7f   : > { %v3493_v36 = vpop.f32.mrb[33].mxu0 }
 0xa80   : > { %v2035_v30 = vpop.f32.mrb[34].mxu0 }
 0xa81   : > { %v3494_v38 = vpop.f32.mrb[35].mxu0 }
 0xa82   : > { %v5203_v47 = vpop.f32.mrb[36].mxu1 }
 0xa83   : > { %v3499_v48 = vpop.f32.mrb[37].mxu1 }
 0xa84   : > { %v2078_v51 = vpop.f32.mrb[38].mxu1 }
 0xa85   : > { %v3500_v49 = vpop.f32.mrb[39].mxu1  ;;  %v1871_v51 = vmul.f32 1.442695, %v1864_v23 }
 0xa86   : > { %v2124_v52 = vpop.f32.mrb[36].mxu0 }
 0xa87   : > { %v2265_v10 = vsel %vm4953_vm5, %v2124_v52, -1e+30  ;;  %v3505_v53 = vpop.f32.mrb[37].mxu0 }
 0xa88   : > { %v2127_v54 = vpop.f32.mrb[38].mxu0  ;;  %v2269_v55 = vsel %vm1320_vm6, %v2265_v10, -inf }
 0xa89   : > { %2270 = vmax.xlane.f32.xlu1 %v2269_v55  ;;  %v3506_v58 = vpop.f32.mrb[39].mxu0 }
 0xa8a   : > { %v2169_v18 = vpop.f32.mrb[40].mxu1 }
 0xa8b   : > { %v2266_v29 = vsel %vm4953_vm5, %v2169_v18, -1e+30  ;;  %v3511_v32 = vpop.f32.mrb[41].mxu1 }
 0xa8c   : > { %v2172_v45 = vpop.f32.mrb[42].mxu1  ;;  %v2272_v60 = vsel %vm1320_vm6, %v2266_v29, -inf }
 0xa8d   : > { %1893 = vadd.xlane.f32.xlu1 %v1892_v22  ;;  %2273 = vmax.xlane.f32.xlu0 %v2272_v60  ;;  %v3512_v61 = vpop.f32.mrb[43].mxu1 }
 0xa8e   : > { %v2214_v62 = vpop.f32.mrb[40].mxu0 }
 0xa8f   : > { %v2267_v0 = vsel %vm4953_vm5, %v2214_v62, -1e+30  ;;  %v3517_v37 = vpop.f32.mrb[41].mxu0 }
 0xa90   : > { %v2217_v1 = vpop.f32.mrb[42].mxu0  ;;  %v2275_v8 = vsel %vm1320_vm6, %v2267_v0, -inf  ;;  %v2434_v37 = vrot.slane %v4996_v43, 4 }
 0xa91   : > { %v3518_v9 = vpop.f32.mrb[43].mxu0  ;;  %1899 = vadd.xlane.f32.xlu1 %v1898_v3  ;;  %2276 = vmax.xlane.f32.xlu0 %v2275_v8 }
 0xa92   : > { %v2259_v40 = vpop.f32.mrb[44].mxu1 }
 0xa93   : > { %v2268_v11 = vsel %vm4953_vm5, %v2259_v40, -1e+30  ;;  %v3523_v16 = vpop.f32.mrb[45].mxu1  ;;  %v2439_v40 = vsel %vm1388_vm4, %v2434_v37, 0 }
 0xa94   : > { %v2262_v20 = vpop.f32.mrb[46].mxu1  ;;  %v2278_v28 = vsel %vm1320_vm6, %v2268_v11, -inf }
 0xa95   : > { %2279 = vmax.xlane.f32.xlu0 %v2278_v28  ;;  %v3524_v13 = vpop.f32.mrb[47].mxu1 }
 0xa99   : > { %1896 = vadd.xlane.f32.xlu0 %v1895_v14 }
 0xb16   : > { %v2271_v42 = vpop.xlane.xlu1 %2270 }
 0xb17   : > { %v2281_v17 = vmax.f32 %v5120_v46, %v2271_v42 }
 0xb19   : > { %v2285_v35 = vsub.f32 %v5120_v46, %v2281_v17  ;;  %v2297_v39 = vsub.f32 %v2265_v10, %v2281_v17  ;;  %v3838_v10 = vpop.eup %3837 }
 0xb1a   : > { %v2274_v59 = vpop.xlane.xlu0 %2273  ;;  %v5234_v32 = vmul.f32 0.0, %v3838_v10 }
 0xb1b   : > { %v2289_v41 = vmul.f32 1.442695, %v2285_v35  ;;  %v2301_v57 = vmul.f32 1.442695, %v2297_v39  ;;  %v2282_v36 = vmax.f32 %v5115_v34, %v2274_v59  ;;  %v1889_v39 = vsel %vm1320_vm6, %v5130_v50, 0.0  ;;  %v1894_v50 = vpop.xlane.xlu1 %1893 }
 0xb1c   : > { %v2081_v61 = vadd.f32 %v5148_v63, %v5234_v32 }
 0xb1d   : > { %3843 = vpow2.f32 %v2289_v41  ;;  %v2286_v30 = vsub.f32 %v5115_v34, %v2282_v36  ;;  %v2298_v38 = vsub.f32 %v2266_v29, %v2282_v36  ;;  %v3840_v29 = vpop.eup %3839 }
 0xb1e   : > { %3845 = vpow2.f32 %v2301_v57  ;;  %v2277_v48 = vpop.xlane.xlu0 %2276  ;;  %v3842_v60 = vpop.eup %3841  ;;  %v5242_v3 = vmul.f32 0.0, %v3840_v29 }
 0xb1f   : > { %v2291_v49 = vmul.f32 1.442695, %v2286_v30  ;;  %v2303_v52 = vmul.f32 1.442695, %v2298_v38  ;;  %v2283_v46 = vmax.f32 %v5150_v4, %v2277_v48  ;;  %v1887_v16 = vmul.f32 0.0, %v3842_v60 }
 0xb20   : > { %v2082_v9 = vadd.f32 %v5146_v2, %v5242_v3 }
 0xb21   : > { %3847 = vpow2.f32 %v2291_v49  ;;  %v2287_v53 = vsub.f32 %v5150_v4, %v2283_v46  ;;  %v2299_v54 = vsub.f32 %v2267_v0, %v2283_v46  ;;  %v2083_v14 = vadd.f32 %v5201_v26, %v1887_v16 }
 0xb22   : > { %3849 = vpow2.f32 %v2303_v52  ;;  %v2280_v55 = vpop.xlane.xlu0 %2279 }
 0xb23   : > { %3851 = vpow2.f32 %v1871_v51  ;;  %v2293_v58 = vmul.f32 1.442695, %v2287_v53  ;;  %v2305_v18 = vmul.f32 1.442695, %v2299_v54  ;;  %v2284_v34 = vmax.f32 %v5153_v56, %v2280_v55 }
 0xb25   : > { %3853 = vpow2.f32 %v2293_v58  ;;  %v2288_v45 = vsub.f32 %v5153_v56, %v2284_v34  ;;  %v2300_v22 = vsub.f32 %v2268_v11, %v2284_v34  ;;  %v2482_v11 = vrot.slane %v4998_v44, 4 }
 0xb26   : > { %3855 = vpow2.f32 %v2305_v18  ;;  %v1897_v41 = vpop.xlane.xlu0 %1896 }
 0xb27   : > { %v5239_v4 = vpop.eup %3843  ;;  %v2295_v62 = vmul.f32 1.442695, %v2288_v45  ;;  %v2307_v0 = vmul.f32 1.442695, %v2300_v22  ;;  %v2487_v44 = vsel %vm1388_vm4, %v2482_v11, 0  ;;  %v1903_v52 = vadd.f32 %v1897_v41, %v1887_v16 }
 0xb28   : > { %v3846_v1 = vpop.eup %3845  ;;  %v5245_v8 = vmul.f32 %v5239_v4, %v2081_v61 }
 0xb29   : > { %3857 = vpow2.f32 %v2295_v62  ;;  %v2333_v56 = vpack.c.bf16 %v3846_v1, %v3846_v1 }
 0xb2a   : > { %3859 = vpow2.f32 %v2307_v0 }
 0xb2b   : > { %v3848_v63 = vpop.eup %3847  ;;  %3528 = vmatmul.mubr.msk.bf16.vlgmr.msra.gmra.mrb[44].mxu0 %vm1320_vm6, %v2333_v56 }
 0xb2c   : > { %v3850_v43 = vpop.eup %3849  ;;  %3538 = vmatpush3.bf16.msra.mxu0 %v2439_v40  ;;  %3539 = vmatprep.mubr.msk.bf16.mxu0 %vm4288_vm2, %v4287_v25  ;;  %v5254_v20 = vmul.f32 %v3848_v63, %v2082_v9 }
 0xb2d   : > { %v3852_v28 = vpop.eup %3851  ;;  %v2316_v13 = vsel %vm1320_vm6, %v3850_v43, 0.0  ;;  %v2334_v2 = vpack.c.bf16 %v3850_v43, %v3850_v43  ;;  %3549 = vmatprep.subr.bf16.mxu0 %v4287_v25 }
 0xb2e   : > { %2317 = vadd.xlane.f32.xlu0 %v2316_v13  ;;  %v1888_v12 = vmul.f32 0.0, %v3852_v28 }
 0xb2f   : > { %v3854_v21 = vpop.eup %3853  ;;  %3534 = vmatmul.mubr.msk.bf16.vlgmr.msra.gmra.mrb[48].mxu1 %vm1320_vm6, %v2334_v2 }
 0xb30   : > { %v3856_v27 = vpop.eup %3855  ;;  %3544 = vmatpush3.bf16.msra.mxu1 %v2487_v44  ;;  %3545 = vmatprep.mubr.msk.bf16.mxu1 %vm4288_vm2, %v4287_v25  ;;  %v5263_v33 = vmul.f32 %v3854_v21, %v2083_v14  ;;  %v2084_v17 = vadd.f32 %v5203_v47, %v1888_v12  ;;  %v1900_v47 = vpop.xlane.xlu1 %1899  ;;  %v2311_v46 = vmul.f32 %v3854_v21, %v1903_v52  ;;  %v5296_v21 = vld [vmem:[#allocation2] sm:$0xff] }
 0xb31   : > { %v2319_v19 = vsel %vm1320_vm6, %v3856_v27, 0.0  ;;  %v2335_v42 = vpack.c.bf16 %v3856_v27, %v3856_v27  ;;  %v1904_v10 = vadd.f32 %v1900_v47, %v1888_v12  ;;  %v2606_v44 = vsel %vm801_vm1, %v5296_v21, 0.0  ;;  %v3781_v52 = vld [vmem:[%s4798_s12] ss:$8 sps:$4 sm:$0xff]  }
 0xb32   : > { %2320 = vadd.xlane.f32.xlu1 %v2319_v19 }
 0xb33   : > { %v3858_v26 = vpop.eup %3857  ;;  %3540 = vmatmul.mubr.msk.bf16.vlgmr.msra.gmra.mrb[48].mxu0 %vm1320_vm6, %v2335_v42 }
 0xb34   : > { %v3860_v5 = vpop.eup %3859  ;;  %v5268_v35 = vmul.f32 %v3858_v26, %v2084_v17  ;;  %3550 = vmatpush3.bf16.msra.mxu0 %v5059_v6  ;;  %3557 = vmatprep.mubr.msk.bf16.mxu0 %vm4288_vm2, %v4287_v25  ;;  %v2313_v6 = vsel %vm1320_vm6, %v3846_v1, 0.0  ;;  %v2312_v54 = vmul.f32 %v3858_v26, %v1904_v10  ;;  %v3789_v10 = vld [vmem:[%s4798_s12 + $0x24] ss:$8 sps:$4 sm:$0xff]  }
 0xb35   : > { %v2322_v59 = vsel %vm1320_vm6, %v3860_v5, 0.0  ;;  %v2336_v23 = vpack.c.bf16 %v3860_v5, %v3860_v5  ;;  %3551 = vmatprep.subr.bf16.mxu0 %v4287_v25 }
 0xb36   : > { %1890 = vadd.xlane.f32.xlu1 %v1889_v39  ;;  %2323 = vadd.xlane.f32.xlu0 %v2322_v59  ;;  %v3881_v39 = vld [vmem:[#allocation2 + $0x8] sm:$0xff] }
 0xb37   : > { %3546 = vmatmul.mubr.msk.bf16.vlgmr.msra.gmra.mrb[52].mxu1 %vm1320_vm6, %v2336_v23 }
 0xb38   : > { %3552 = vmatpush3.bf16.msra.mxu0 %v5063_v7  ;;  %2732 = vmatprep.mubr.bf16.mxu1 %v4286_v24 }
 0xb39   : > { %3553 = vmatprep.subr.bf16.mxu0 %v4287_v25 }
 0xb3a   : > { %2314 = vadd.xlane.f32.xlu0 %v2313_v6 }
 0xb3c   : > { %3554 = vmatpush3.bf16.msra.mxu0 %v5075_v31  ;;  %v1902_v31 = vadd.f32 %v1894_v50, %v5242_v3 }
 0xb3d   : > { %3555 = vmatprep.subr.bf16.mxu0 %v4287_v25 }
 0xb3e   : > { %v2310_v49 = vmul.f32 %v3848_v63, %v1902_v31 }
 0xb40   : > { %3556 = vmatpush3.bf16.msra.mxu0 %v5079_v15 }
 0xb41   : > { %3561 = vmatprep.subr.bf16.mxu0 %v4287_v25 }
 0xbbb   : > { %v2318_v7 = vpop.xlane.xlu0 %2317 }
 0xbbc   : > { %v2326_v15 = vadd.f32 %v2318_v7, %v2310_v49  ;;  %v3783_v49 = vld [vmem:[%s4798_s12 + $0x4] ss:$8 sps:$4 sm:$0xff]  }
 0xbbd   : > { %2700 = vmatprep.subr.bf16.mxu1 %v3783_v49 }
 0xbbe   : > { %2701 = vmatpush1.bf16.msra.mxu1 %v3781_v52 }
 0xbbf   : > { %v2321_v57 = vpop.xlane.xlu1 %2320 }
 0xbc0   : > { %v2327_v53 = vadd.f32 %v2321_v57, %v2311_v46  ;;  %v3784_v46 = vld [vmem:[%s4798_s12 + $0x10] ss:$8 sps:$4 sm:$0xff]  }
 0xbc3   : > { %v1891_v36 = vpop.xlane.xlu1 %1890  ;;  %v2324_v24 = vpop.xlane.xlu0 %2323 }
 0xbc4   : > { %v1901_v30 = vadd.f32 %v1891_v36, %v5234_v32  ;;  %v2328_v55 = vadd.f32 %v2324_v24, %v2312_v54  ;;  %v3790_v54 = vld [vmem:[%s4798_s12 + $0x30] ss:$8 sps:$4 sm:$0xff]  }
 0xbc6   : > { %v2309_v38 = vmul.f32 %v5239_v4, %v1901_v30 }
 0xbc7   : > { %v2315_v48 = vpop.xlane.xlu0 %2314 }
 0xbc8   : > { %v2325_v51 = vadd.f32 %v2315_v48, %v2309_v38 }
 0xbca   : > { %3861 = vrcp.f32 %v2325_v51 }
 0xbcb   : > { %3863 = vrcp.f32 %v2326_v15  ;;  %v3786_v15 = vld [vmem:[%s4798_s12 + $0x14] ss:$8 sps:$4 sm:$0xff]  }
 0xbcc   : > { %3865 = vrcp.f32 %v2327_v53  ;;  %2702 = vmatprep.subr.bf16.mxu1 %v3786_v15  ;;  %v3787_v53 = vld [vmem:[%s4798_s12 + $0x20] ss:$8 sps:$4 sm:$0xff]  }
 0xbcd   : > { %3867 = vrcp.f32 %v2328_v55  ;;  %2703 = vmatpush1.bf16.msra.mxu1 %v3784_v46  ;;  %v3792_v55 = vld [vmem:[%s4798_s12 + $0x34] ss:$8 sps:$4 sm:$0xff]   ;;  %s5497_s12 = scalar_lea.vmem [#allocation13], %s4774_s20  ;;  %s5498_s20 = sld [smem:[#allocation28_spill]] }
 0xbce   : > { %2704 = vmatprep.subr.bf16.mxu1 %v3789_v10 }
 0xbd1   : > { %2705 = vmatpush1.bf16.msra.mxu1 %v3787_v53 }
 0xbd2   : > { %2706 = vmatprep.subr.bf16.mxu1 %v3792_v55 }
 0xbd3   : > { %p3282_p6 = scmp.ne.s32.totalorder %s5498_s20, 1 }
 0xbd4   : > { %v3862_v29 = vpop.eup %3861  ;;  %vm2925_vm9 = vcmask (!%p3282_p6), 519168  }
 0xbd5   : > { %v3864_v62 = vpop.eup %3863  ;;  %2707 = vmatpush1.bf16.msra.mxu1 %v3790_v54 }
 0xbfe   : > { %v2379_v58 = vpop.f32.mrb[44].mxu0 }
 0xbff   : > { %v2529_v18 = vadd.f32 %v2379_v58, %v5245_v8  ;;  %v3529_v34 = vpop.f32.mrb[45].mxu0  ;;  %v3866_v8 = vpop.eup %3865 }
 0xc00   : > { %v2382_v32 = vpop.f32.mrb[46].mxu0  ;;  %v3868_v28 = vpop.eup %3867 }
 0xc01   : > { %v2534_v45 = vmul.f32 %v3862_v29, %v2529_v18  ;;  %v3530_v22 = vpop.f32.mrb[47].mxu0 }
 0xc02   : > { %v2427_v60 = vpop.f32.mrb[48].mxu1 }
 0xc03   : > { %v2530_v61 = vadd.f32 %v2427_v60, %v5254_v20  ;;  %v3535_v4 = vpop.f32.mrb[49].mxu1 }
 0xc04   : > { %v2430_v0 = vpop.f32.mrb[50].mxu1 }
 0xc05   : > { %v2536_v37 = vmul.f32 %v3864_v62, %v2530_v61  ;;  %v3536_v1 = vpop.f32.mrb[51].mxu1  ;;  %v3261_v61 = vld [vmem:[%s666_s1] ss:$0 sm:$0xff] }
 0xc06   : > { %v2475_v3 = vpop.f32.mrb[48].mxu0 }
 0xc07   : > { %v2531_v56 = vadd.f32 %v2475_v3, %v5263_v33  ;;  %v3541_v9 = vpop.f32.mrb[49].mxu0  ;;  %2542 = vrot.lane.b32.xlu1 %v2536_v37, %s4293_s19  ;;  %v3262_v37 = vld [vmem:[%s5497_s12] ss:$0 sm:$0xff] }
 0xc08   : > { %v2478_v63 = vpop.f32.mrb[50].mxu0 }
 0xc09   : > { %v2538_v40 = vmul.f32 %v3866_v8, %v2531_v56  ;;  %v3542_v11 = vpop.f32.mrb[51].mxu0  ;;  %v3793_v8 = vld [vmem:[%s4822_s25] sm:$0xff]   ;;  %v3794_v63 = vld [vmem:[%s4822_s25 + $0x8] sm:$0xff]  }
 0xc0a   : > { %v2523_v43 = vpop.f32.mrb[52].mxu1  ;;  %v3796_v11 = vld [vmem:[%s4822_s25 + $0x18] sm:$0xff]  }
 0xc0b   : > { %v2532_v16 = vadd.f32 %v2523_v43, %v5268_v35  ;;  %2546 = vrot.lane.b32.xlu0 %v2538_v40, %s4294_s8  ;;  %v3547_v20 = vpop.f32.mrb[53].mxu1  ;;  %v3795_v40 = vld [vmem:[%s4822_s25 + $0x10] sm:$0xff]   ;;  %v3797_v43 = vld [vmem:[%s4822_s25 + $0x20] sm:$0xff]  }
 0xc0c   : > { %v2526_v13 = vpop.f32.mrb[54].mxu1  ;;  %v3799_v20 = vld [vmem:[%s4822_s25 + $0x30] sm:$0xff]  }
 0xc0d   : > { %v2540_v2 = vmul.f32 %v3868_v28, %v2532_v16  ;;  %v3548_v14 = vpop.f32.mrb[55].mxu1  ;;  %v3798_v16 = vld [vmem:[%s4822_s25 + $0x28] sm:$0xff]   ;;  %v3800_v28 = vld [vmem:[%s4822_s25 + $0x38] sm:$0xff]  }
 0xc0f   : > { %2550 = vrot.lane.b32.xlu1 %v2540_v2, %s4295_s6 }
 0xc33   : > { %2607 = vadd.xlane.f32.xlu1 %v2606_v44 }
 0xc79   : > { %v2543_v27 = vpop.permute.xlu1 %2542 }
 0xc7a   : > { %v2553_v33 = vsel %vm1115_vm3, %v2534_v45, %v2543_v27 }
 0xc7d   : > { %v2547_v12 = vpop.permute.xlu0 %2546 }
 0xc7e   : > { %v2554_v19 = vsel %vm1595_vm7, %v2553_v33, %v2547_v12 }
 0xc81   : > { %v2551_v42 = vpop.permute.xlu1 %2550 }
 0xc82   : > { %v2555_v17 = vsel %vm1597_vm8, %v2554_v19, %v2551_v42 }
 0xc83   : > { %v2556_v26 = vpack.c.bf16 %v2555_v17, %v2555_v17 }
 0xc85   : > { %3558 = vmatmul.mubr.msk.bf16.vlgmr.msra.gmra.mrb[52].mxu0 %vm801_vm1, %v2556_v26 }
 0xc86   : > { %3577 = vmatprep.mubr.msk.bf16.mxu0 %vm4288_vm2, %v4287_v25  ;;  %3562 = vmatpush3.bf16.msra.mxu0 %v3793_v8 }
 0xc87   : > { %3563 = vmatprep.subr.bf16.mxu0 %v4287_v25 }
 0xc8a   : > { %3564 = vmatpush3.bf16.msra.mxu0 %v3794_v63 }
 0xc8b   : > { %3565 = vmatprep.subr.bf16.mxu0 %v4287_v25 }
 0xc8e   : > { %3566 = vmatpush3.bf16.msra.mxu0 %v3795_v40 }
 0xc8f   : > { %3567 = vmatprep.subr.bf16.mxu0 %v4287_v25 }
 0xc92   : > { %3568 = vmatpush3.bf16.msra.mxu0 %v3796_v11 }
 0xc93   : > { %3569 = vmatprep.subr.bf16.mxu0 %v4287_v25 }
 0xc96   : > { %3570 = vmatpush3.bf16.msra.mxu0 %v3797_v43 }
 0xc97   : > { %3571 = vmatprep.subr.bf16.mxu0 %v4287_v25 }
 0xc9a   : > { %3572 = vmatpush3.bf16.msra.mxu0 %v3798_v16 }
 0xc9b   : > { %3573 = vmatprep.subr.bf16.mxu0 %v4287_v25 }
 0xc9e   : > { %3574 = vmatpush3.bf16.msra.mxu0 %v3799_v20 }
 0xc9f   : > { %3575 = vmatprep.subr.bf16.mxu0 %v4287_v25 }
 0xca2   : > { %3576 = vmatpush3.bf16.msra.mxu0 %v3800_v28 }
 0xcc0   : > { %v2608_v5 = vpop.xlane.xlu1 %2607 }
 0xcc1   : > { %v2612_v50 = vmul.f32 0.015625, %v2608_v5 }
 0xcc3   : > { %v2614_v41 = vsub.f32 %v5296_v21, %v2612_v50 }
 0xcc5   : > { %v2616_v36 = vmul.f32 %v2614_v41, %v2614_v41 }
 0xcc7   : > { %v2618_v24 = vsel %vm801_vm1, %v2616_v36, 0.0 }
 0xd58   : > { %v2594_v35 = vpop.f32.mrb[52].mxu0 }
 0xd59   : > { %v2600_v59 = vadd.f32 %v3881_v39, %v2594_v35  ;;  %v3559_v23 = vpop.f32.mrb[53].mxu0 }
 0xd5a   : > { %v2597_v6 = vpop.f32.mrb[54].mxu0 }
 0xd5b   : > { %2601 = vst.msk [vmem:[#allocation2 + $0x8] sm:$0xff] %vm801_vm1, %v2600_v59  ;;  %v3560_v47 = vpop.f32.mrb[55].mxu0 }
 0xd62   : > { %v5308_v57 = vld [vmem:[#allocation2 + $0x8] sm:$0xff] }
 0xd63   : > { %v2609_v7 = vsel %vm801_vm1, %v5308_v57, 0.0 }
 0xd64   : > { %2610 = vadd.xlane.f32.xlu0 %v2609_v7 }
 0xd68   : > { %2619 = vadd.xlane.f32.xlu0 %v2618_v24 }
 0xdf1   : > { %v2611_v30 = vpop.xlane.xlu0 %2610 }
 0xdf2   : > { %v2613_v38 = vmul.f32 0.015625, %v2611_v30 }
 0xdf4   : > { %v2615_v48 = vsub.f32 %v5308_v57, %v2613_v38 }
 0xdf5   : > { %v2620_v58 = vpop.xlane.xlu0 %2619 }
 0xdf6   : > { %v2617_v31 = vmul.f32 %v2615_v48, %v2615_v48  ;;  %v2624_v18 = vmul.f32 0.015625, %v2620_v58 }
 0xdf8   : > { %v2621_v51 = vsel %vm801_vm1, %v2617_v31, 0.0  ;;  %v2626_v34 = vadd.f32 1e-05, %v2624_v18 }
 0xdf9   : > { %2622 = vadd.xlane.f32.xlu1 %v2621_v51 }
 0xdfa   : > { %3869 = vrsqrt.f32 %v2626_v34 }
 0xe04   : > { %v3870_v22 = vpop.eup %3869 }
 0xe05   : > { %v2630_v60 = vmul.f32 %v3870_v22, %v2614_v41 }
 0xe07   : > { %v2638_v62 = vmul.f32 %v3261_v61, %v2630_v60 }
 0xe09   : > { %v2646_v3 = vadd.f32 %v3262_v37, %v2638_v62 }
 0xe86   : > { %v2623_v29 = vpop.xlane.xlu1 %2622 }
 0xe87   : > { %v2625_v32 = vmul.f32 0.015625, %v2623_v29  ;;  %v3283_v29 = vld [vmem:[#allocation16] ss:$0 sm:$0xff] (!%p3282_p6) }
 0xe89   : > { %v2627_v45 = vadd.f32 1e-05, %v2625_v32 }
 0xe8b   : > { %3871 = vrsqrt.f32 %v2627_v45  ;;  %v3284_v45 = vld [vmem:[#allocation17] ss:$0 sm:$0xff] (!%p3282_p6) }
 0xe95   : > { %v3872_v4 = vpop.eup %3871 }
 0xe96   : > { %v2631_v0 = vmul.f32 %v3872_v4, %v2615_v48 }
 0xe98   : > { %v2639_v1 = vmul.f32 %v3261_v61, %v2631_v0 }
 0xe9a   : > { %v2647_v56 = vadd.f32 %v3262_v37, %v2639_v1 }
 0xe9c   : > { %v2648_v9 = vpack.c.bf16 %v2647_v56, %v2646_v3 }
 0xe9e   : > { %3271 = vmatmul.mubr.msk.bf16.vlgmr.msra.gmra.mrb[56].mxu1 %vm801_vm1, %v2648_v9 }
 0xf71   : > { %v2734_v13 = vpop.f32.mrb[56].mxu1 }
 0xf72   : > { %v2736_v2 = vpop.f32.mrb[57].mxu1 }
 0xf73   : > { %v3272_v14 = vmul.f32 -1.442695, %v2736_v2  ;;  %v2738_v44 = vpop.f32.mrb[58].mxu1 }
 0xf74   : > { %v2740_v27 = vpop.f32.mrb[59].mxu1 }
 0xf75   : > { %3873 = vpow2.f32 %v3272_v14  ;;  %v3273_v12 = vmul.f32 -1.442695, %v2740_v27 }
 0xf77   : > { %3875 = vpow2.f32 %v3273_v12 }
 0xf7f   : > { %v3874_v33 = vpop.eup %3873 }
 0xf80   : > { %v2749_v19 = vadd.f32 1.0, %v3874_v33 }
 0xf81   : > { %v3876_v42 = vpop.eup %3875 }
 0xf82   : > { %3877 = vrcp.f32 %v2749_v19  ;;  %v2750_v17 = vadd.f32 1.0, %v3876_v42 }
 0xf84   : > { %3879 = vrcp.f32 %v2750_v17 }
 0xf8c   : > { %v3878_v26 = vpop.eup %3877 }
 0xf8d   : > { %v2755_v5 = vmul.f32 %v3878_v26, %v2736_v2 }
 0xf8e   : > { %v3880_v35 = vpop.eup %3879 }
 0xf8f   : > { %v2757_v25 = vmul.f32 %v2755_v5, %v2734_v13  ;;  %v2756_v39 = vmul.f32 %v3880_v35, %v2740_v27 }
 0xf91   : > { %v2758_v59 = vmul.f32 %v2756_v39, %v2738_v44 }
 0xf93   : > { %v2759_v23 = vpack.c.bf16 %v2758_v59, %v2757_v25 }
 0xf95   : > { %3578 = vmatmul.mubr.bf16.vlgmr.msra.gmra.mrb[56].mxu0 %v2759_v23 }
0x1067   : > { %2872 = sbr.rel (%p3282_p6) target bundleno = 4523 (0x11ab), region = 124 }
0x1068   : > { %v2858_v6 = vpop.f32.mrb[56].mxu0 }
0x1069   : > { %v2865_v50 = vadd.f32 %v2858_v6, %v5296_v21  ;;  %v3579_v47 = vpop.f32.mrb[57].mxu0 }
0x106a   : > { %v2861_v41 = vpop.f32.mrb[58].mxu0 }
0x106b   : > { %2867 = vst.msk [vmem:[#allocation2] sm:$0xff] %vm801_vm1, %v2865_v50  ;;  %v2866_v7 = vadd.f32 %v2861_v41, %v5308_v57  ;;  %v3580_v36 = vpop.f32.mrb[59].mxu0  ;;  %v2875_v24 = vsel (!%p3282_p6), %vm801_vm1, %v2865_v50, 0.0 }
0x106c   : > { %2876 = vadd.xlane.f32.xlu0 (!%p3282_p6), %v2875_v24 }
0x106d   : > { %2868 = vst.msk [vmem:[#allocation2 + $0x8] sm:$0xff] %vm801_vm1, %v2866_v7  ;;  %v2878_v30 = vsel (!%p3282_p6), %vm801_vm1, %v2866_v7, 0.0 }
0x1070   : > { %2879 = vadd.xlane.f32.xlu0 %v2878_v30 }
0x10f9   : > { %v2877_v38 = vpop.xlane.xlu0 %2876 }
0x10fa   : > { %v2881_v21 = vmul.f32 0.015625, %v2877_v38 }
0x10fc   : > { %v2883_v48 = vsub.f32 %v2865_v50, %v2881_v21 }
0x10fd   : > { %v2880_v31 = vpop.xlane.xlu0 %2879 }
0x10fe   : > { %v2882_v51 = vmul.f32 0.015625, %v2880_v31  ;;  %v2885_v49 = vmul.f32 %v2883_v48, %v2883_v48 }
0x1100   : > { %v2884_v52 = vsub.f32 %v2866_v7, %v2882_v51  ;;  %v2887_v57 = vsel %vm801_vm1, %v2885_v49, 0.0 }
0x1101   : > { %2888 = vadd.xlane.f32.xlu1 %v2887_v57 }
0x1102   : > { %v2886_v15 = vmul.f32 %v2884_v52, %v2884_v52 }
0x1104   : > { %v2890_v46 = vsel %vm801_vm1, %v2886_v15, 0.0 }
0x1105   : > { %2891 = vadd.xlane.f32.xlu1 %v2890_v46 }
0x118e   : > { %v2889_v10 = vpop.xlane.xlu1 %2888 }
0x118f   : > { %v2893_v53 = vmul.f32 0.015625, %v2889_v10 }
0x1191   : > { %v2895_v54 = vadd.f32 1e-05, %v2893_v53 }
0x1192   : > { %v2892_v55 = vpop.xlane.xlu1 %2891 }
0x1193   : > { %3882 = vrsqrt.f32 %v2895_v54  ;;  %v2894_v58 = vmul.f32 0.015625, %v2892_v55 }
0x1195   : > { %v2896_v18 = vadd.f32 1e-05, %v2894_v58 }
0x1197   : > { %3884 = vrsqrt.f32 %v2896_v18 }
0x119d   : > { %v3883_v34 = vpop.eup %3882 }
0x119e   : > { %v2899_v32 = vmul.f32 %v3883_v34, %v2883_v48 }
0x11a0   : > { %v2907_v22 = vmul.f32 %v3283_v29, %v2899_v32 }
0x11a1   : > { %v3885_v60 = vpop.eup %3884 }
0x11a2   : > { %v2915_v61 = vadd.f32 %v3284_v45, %v2907_v22  ;;  %v2900_v4 = vmul.f32 %v3885_v60, %v2884_v52 }
0x11a4   : > { %v3295_v62 = vpack.c.bf16 %v2915_v61, %v2915_v61  ;;  %v2908_v0 = vmul.f32 %v3283_v29, %v2900_v4 }
0x11a6   : > { %2926 = vst.msk [vmem:[%s4827_s16] sm:$0xf] %vm2925_vm9, %v3295_v62  ;;  %v2916_v37 = vadd.f32 %v3284_v45, %v2908_v0 }
0x11a8   : > { %v3296_v1 = vpack.c.bf16 %v2916_v37, %v2916_v37 }
0x11aa   : > { %2927 = vst.msk [vmem:[%s4827_s16 + $0x4] sm:$0xf] %vm2925_vm9, %v3296_v1 }
0x11ab PF: > { %s5499_s1 = sld [smem:[#allocation31_spill]]  ;;  %s5500_s29 = sld [smem:[#allocation26_spill]] }
0x11ac   : > { %s5501_s30 = sld [smem:[#allocation27_spill]]  ;;  %s5502_s15 = sld [smem:[#allocation37_spill]] }
0x11ad   : > { %s5503_s17 = sld [smem:[#allocation30_spill]]  ;;  %s5504_s25 = sld [smem:[#allocation35_spill]] }
0x11ae   : > { %s5505_s19 = sld [smem:[#allocation36_spill]]  ;;  %s5506_s16 = smov %s4262_s18 }
0x11b1   : > { %s38_s20 = sadd.s32 1, %s5499_s1  }
0x11b2   : > { %p35_p0 = scmp.ge.s32.totalorder %s38_s20, 6  }
0x11b3   : > { %s5507_s18 = smov %s5504_s25 }
0x11b4   :  { %37 = sbr.rel (!%p35_p0) target bundleno = 24 (0x18), region = 215 }
0x11bb   :  { %2949 = vsyncpa [#allocation4], 1 }
0x11bc   :  { %2951 = vsyncpa [#allocation4 + $0x1], 1 }
0x11bd   :  { %2952 = vsyncpa [#allocation6], 1 }
0x11be   :  { %2954 = vsyncpa [#allocation6 + $0x1], 1 }
0x11bf   :  { %2955 = vsyncpa [#allocation9], 1 }
0x11c0   :  { %2957 = vsyncpa [#allocation9 + $0x1], 1 }
0x11c1   :  { %2958 = vsyncpa [#allocation12], 1 }
0x11c2   :  { %2960 = vsyncpa [#allocation12 + $0x1], 1 }
0x11c3   :  { %2961 = vsyncpa [#allocation15], 1 }
0x11c4   :  { %2963 = vsyncpa [#allocation15 + $0x1], 1 }
0x11c5   :  { %2964 = vsyncpa [#allocation18], 1 }

</bundles_post_ra>
